<compile_context>
chip_gen: v6e
topology: v6e:2x2x1
jax: 0.10.0
libtpu: 0.0.40
codegen_flags: <defaults>
</compile_context>

<pallas_src>
import functools

import jax
import jax.numpy as jnp
from jax import lax
from jax.experimental import pallas as pl
from jax.experimental.pallas import tpu as pltpu

BN_EPS = 1e-5
SHIFTS = (-3, -2, -1, 1, 2, 3)   # off-center taps; dilation == |shift|
PAD = 3                          # max |shift|
_FUSED_MAX_BYTES = 1 << 20       # fuse into one kernel when f32 input <= 1 MiB


# -----------------------------------------------------------------------------
# shared in-kernel helpers
# -----------------------------------------------------------------------------
def _axial_mix(y4, pad_ref, c0, bias_hw, wh, ww):
    """pw1 output -> concatenated [x, dw1(x), dw2(x), dw3(x)] channel layout.
    All 12 dilated off-center taps are static slices of ONE zero-padded VMEM
    scratch; every tap is a full-lane multiply-add on the VPU."""
    tn, H, W, C = y4.shape
    pad_ref[...] = jnp.zeros_like(pad_ref)
    pad_ref[:, PAD:PAD + H, PAD:PAD + W, :] = y4
    xc = y4 * c0 + bias_hw                                   # center taps + dw biases
    for t, s in enumerate(SHIFTS):
        xc = xc + wh[t:t + 1, :] * pad_ref[:, PAD + s:PAD + s + H, PAD:PAD + W, :]
        xc = xc + ww[t:t + 1, :] * pad_ref[:, PAD:PAD + H, PAD + s:PAD + s + W, :]
    return xc


def _gelu_exact(x):
    """0.5*x*(1+erf(x/sqrt(2))); erf via Abramowitz & Stegun 7.1.26 (~1.5e-7
    abs error).  The reciprocal and exp run on the EUP slot (free next to the
    MXU / VPU work)."""
    z = x * 0.7071067811865476
    az = jnp.abs(z)
    t = pl.reciprocal(1.0 + 0.3275911 * az, approx=True)
    poly = t * (0.254829592 + t * (-0.284496736 + t * (1.421413741
               + t * (-1.453152027 + t * 1.061405429))))
    erf_abs = 1.0 - poly * jnp.exp(-az * az)
    erf_z = jnp.where(z >= 0.0, erf_abs, -erf_abs)
    return 0.5 * x * (1.0 + erf_z)


# -----------------------------------------------------------------------------
# fully fused single-pass kernel (batch-statistics BN computed in-kernel)
# -----------------------------------------------------------------------------
def _fused_kernel(x_ref, w1t_ref, b1t_ref, c0_ref, bias_ref, wh_ref, ww_ref,
                  w2_ref, b2_ref, gamma_ref, beta_ref, o_ref, pad_ref):
    tn, H, W, C = x_ref.shape
    S = tn * H * W

    x2d = x_ref[...].reshape(S, C).astype(jnp.bfloat16)
    y4 = (jnp.dot(x2d, w1t_ref[...], preferred_element_type=jnp.float32)
          + b1t_ref[...]).reshape(tn, H, W, C)

    xc = _axial_mix(y4, pad_ref, c0_ref[...], bias_ref[...], wh_ref[...], ww_ref[...])
    xc2d = xc.reshape(S, C)

    mean = jnp.mean(xc2d, axis=0, keepdims=True)
    var = jnp.maximum(jnp.mean(xc2d * xc2d, axis=0, keepdims=True) - mean * mean, 0.0)
    inv = lax.rsqrt(var + BN_EPS)
    xn = (xc2d - mean) * (gamma_ref[...] * inv) + beta_ref[...]

    out = jnp.dot(xn.astype(jnp.bfloat16), w2_ref[...],
                  preferred_element_type=jnp.float32) + b2_ref[...]
    o_ref[...] = _gelu_exact(out).reshape(tn, H, W, C)


# -----------------------------------------------------------------------------
# two-pass pipelined path
# -----------------------------------------------------------------------------
def _stage1_kernel(x_ref, w1t_ref, b1t_ref, c0_ref, bias_ref, wh_ref, ww_ref,
                   xc_ref, stats_ref, pad_ref):
    tn, H, W, C = x_ref.shape
    S = tn * H * W

    x2d = x_ref[...].reshape(S, C).astype(jnp.bfloat16)
    y4 = (jnp.dot(x2d, w1t_ref[...], preferred_element_type=jnp.float32)
          + b1t_ref[...]).reshape(tn, H, W, C)

    xc = _axial_mix(y4, pad_ref, c0_ref[...], bias_ref[...], wh_ref[...], ww_ref[...])
    xc_ref[...] = xc.astype(xc_ref.dtype)            # bf16 intermediate -> half HBM traffic

    # per-tile partial BN statistics; reduced across tiles outside the kernel
    xc2d = xc.reshape(S, C)
    ssum = jnp.sum(xc2d, axis=0, keepdims=True)
    ssq = jnp.sum(xc2d * xc2d, axis=0, keepdims=True)
    stats_ref[...] = jnp.concatenate([ssum, ssq], axis=0).reshape(1, 2, C)


def _stage2_kernel(xc_ref, scale_ref, shift_ref, w2_ref, b2_ref, o_ref):
    tn, H, W, C = xc_ref.shape
    S = tn * H * W
    xn = xc_ref[...].reshape(S, C).astype(jnp.float32) * scale_ref[...] + shift_ref[...]
    out = jnp.dot(xn.astype(jnp.bfloat16), w2_ref[...],
                  preferred_element_type=jnp.float32) + b2_ref[...]
    o_ref[...] = _gelu_exact(out).reshape(tn, H, W, C)


# -----------------------------------------------------------------------------
# wrapper
# -----------------------------------------------------------------------------
def _pick_tile_n(N, H, W, C):
    """Batch tile that divides N, keeps the per-tile working set ~1 MiB and
    gives >=2 grid steps when possible (pipelining + megacore sharding)."""
    rows = H * W
    by_vmem = max(1, (1 << 20) // max(1, 8 * rows * C * 4))   # ~8 live f32 slabs/tile
    by_rows = max(1, 512 // max(1, rows))                     # ~128-512 matmul rows
    tn = max(1, min(N, by_vmem, by_rows))
    while N % tn:
        tn -= 1
    if tn == N and N > 1:                                     # ensure >=2 grid steps
        tn = max(d for d in range(1, N) if N % d == 0)
    return tn


@functools.partial(jax.jit, static_argnames=("force_two_pass",))
def bottleneck_forward_nhwc(x_nhwc, packed, running_mean=None, running_var=None,
                            *, force_two_pass=False):
    """NHWC forward of BottleNeckBlock.  With running_mean/var == None BatchNorm
    uses batch statistics (PyTorch training-mode forward, the default state
    right after __init__); pass running stats to reproduce eval()-mode."""
    N, H, W, C = x_nhwc.shape

    def full(shape):
        return pl.BlockSpec(shape, lambda i: (0,) * len(shape))

    # ---- fused single-pass kernel: no HBM intermediate, one launch ----
    if (running_mean is None and not force_two_pass
            and N * H * W * C * 4 <= _FUSED_MAX_BYTES):
        blk = pl.BlockSpec((N, H, W, C), lambda i: (0, 0, 0, 0))
        return pl.pallas_call(
            _fused_kernel,
            grid=(1,),
            in_specs=[blk, full((C, C)), full((1, C)), full((1, C)), full((1, C)),
                      full((6, C)), full((6, C)), full((C, C)), full((1, C)),
                      full((1, C)), full((1, C))],
            out_specs=blk,
            out_shape=jax.ShapeDtypeStruct((N, H, W, C), jnp.float32),
            scratch_shapes=[pltpu.VMEM((N, H + 2 * PAD, W + 2 * PAD, C), jnp.float32)],
            compiler_params=pltpu.CompilerParams(dimension_semantics=("arbitrary",)),
        )(x_nhwc, packed["w1t"], packed["b1t"], packed["c0"], packed["bias_hw"],
          packed["wh"], packed["ww"], packed["w2"], packed["b2"],
          packed["gamma"], packed["beta"])

    # ---- two-pass pipelined path (large batches / eval-mode BN) ----
    tn = _pick_tile_n(N, H, W, C)
    grid = (N // tn,)
    tile4 = pl.BlockSpec((tn, H, W, C), lambda i: (i, 0, 0, 0))
    cparams = pltpu.CompilerParams(dimension_semantics=("parallel",))

    xc, stats = pl.pallas_call(
        _stage1_kernel,
        grid=grid,
        in_specs=[tile4, full((C, C)), full((1, C)), full((1, C)), full((1, C)),
                  full((6, C)), full((6, C))],
        out_specs=[tile4, pl.BlockSpec((1, 2, C), lambda i: (i, 0, 0))],
        out_shape=[jax.ShapeDtypeStruct((N, H, W, C), jnp.bfloat16),
                   jax.ShapeDtypeStruct((grid[0], 2, C), jnp.float32)],
        scratch_shapes=[pltpu.VMEM((tn, H + 2 * PAD, W + 2 * PAD, C), jnp.float32)],
        compiler_params=cparams,
    )(x_nhwc, packed["w1t"], packed["b1t"], packed["c0"], packed["bias_hw"],
      packed["wh"], packed["ww"])

    # global BatchNorm statistics (reduced across ALL tiles, tiny XLA glue)
    if running_mean is None:
        cnt = float(N * H * W)
        mean = stats[:, 0, :].sum(axis=0) / cnt
        var = jnp.maximum(stats[:, 1, :].sum(axis=0) / cnt - mean * mean, 0.0)
    else:
        mean, var = running_mean, running_var
    inv = lax.rsqrt(var + BN_EPS)
    scale = (packed["gamma"] * inv).astype(jnp.float32)
    shift = (packed["beta"] - packed["gamma"] * mean * inv).astype(jnp.float32)

    return pl.pallas_call(
        _stage2_kernel,
        grid=grid,
        in_specs=[tile4, full((1, C)), full((1, C)), full((C, C)), full((1, C))],
        out_specs=tile4,
        out_shape=jax.ShapeDtypeStruct((N, H, W, C), jnp.float32),
        compiler_params=cparams,
    )(xc, scale, shift, packed["w2"], packed["b2"])


# -----------------------------------------------------------------------------
# parameter handling (PyTorch-layout params -> lane-dense kernel layout)
# -----------------------------------------------------------------------------
def init_params(key, dim):
    """Synthetic parameters in PyTorch-like layout.
      w1[c,o]      = pw1.weight[o,c,0,0]              b1 = pw1.bias
      whs[d,k,c]   = dw{d+1}.dw_h.weight[c,0,k,0]     bhs[d] = dw{d+1}.dw_h.bias
      wws[d,k,c]   = dw{d+1}.dw_w.weight[c,0,0,k]     bws[d] = dw{d+1}.dw_w.bias
      gamma/beta   = bn.weight/bias reshaped (4, gc)
      w2s[g,c,o]   = pw2.weight[o, g*gc+c, 0, 0]      b2 = pw2.bias
    """
    gc = dim // 4
    ks = jax.random.split(key, 10)
    rnd = lambda k, shape: 0.1 * jax.random.normal(k, shape, dtype=jnp.float32)
    return {
        "w1": rnd(ks[0], (dim, gc)), "b1": rnd(ks[1], (1, gc)),
        "whs": rnd(ks[2], (3, 3, gc)), "bhs": rnd(ks[3], (3, gc)),
        "wws": rnd(ks[4], (3, 3, gc)), "bws": rnd(ks[5], (3, gc)),
        "gamma": 1.0 + rnd(ks[6], (4, gc)), "beta": rnd(ks[7], (4, gc)),
        "w2s": rnd(ks[8], (4, gc, dim)), "b2": rnd(ks[9], (1, dim)),
    }


def pack_params(p):
    """One-time host-side repack into the lane-dense layout the kernels use."""
    dim = p["w1"].shape[0]
    gc = dim // 4
    c0 = jnp.ones((dim,), jnp.float32)        # identity term (x + dw_h + dw_w / group 0)
    bias_hw = jnp.zeros((dim,), jnp.float32)
    wh = jnp.zeros((len(SHIFTS), dim), jnp.float32)
    ww = jnp.zeros((len(SHIFTS), dim), jnp.float32)
    for g in (1, 2, 3):                       # channel group g <- AxialDW, dilation g
        sl = slice(g * gc, (g + 1) * gc)
        c0 = c0.at[sl].add(p["whs"][g - 1, 1] + p["wws"][g - 1, 1])
        bias_hw = bias_hw.at[sl].set(p["bhs"][g - 1] + p["bws"][g - 1])
    for t, s in enumerate(SHIFTS):
        g, k = abs(s), (0 if s < 0 else 2)    # tap k=0 -> shift -d, k=2 -> +d
        sl = slice(g * gc, (g + 1) * gc)
        wh = wh.at[t, sl].set(p["whs"][g - 1, k])
        ww = ww.at[t, sl].set(p["wws"][g - 1, k])
    return {
        "w1t": jnp.tile(p["w1"], (1, 4)).astype(jnp.bfloat16),     # (dim, 4*gc)
        "b1t": jnp.tile(p["b1"], (1, 4)).astype(jnp.float32),      # (1, 4*gc)
        "c0": c0.reshape(1, dim), "bias_hw": bias_hw.reshape(1, dim),
        "wh": wh, "ww": ww,
        "gamma": p["gamma"].reshape(1, dim), "beta": p["beta"].reshape(1, dim),
        "w2": p["w2s"].reshape(dim, dim).astype(jnp.bfloat16),
        "b2": p["b2"].astype(jnp.float32),
    }


# -----------------------------------------------------------------------------
# pure-JAX f32 reference (mirrors the PyTorch module, NCHW in/out)
# -----------------------------------------------------------------------------
def reference_forward(x_nchw, p):
    N, C, H, W = x_nchw.shape
    gc = C // 4
    x = jnp.transpose(x_nchw, (0, 2, 3, 1))
    S = N * H * W
    y = (x.reshape(S, C) @ p["w1"] + p["b1"]).reshape(N, H, W, gc)

    def shift(t, s, axis):
        if s == 0:
            return t
        n = t.shape[axis]
        cfg = [(0, 0)] * t.ndim
        if s > 0:
            cfg[axis] = (0, s)
            return jnp.pad(lax.slice_in_dim(t, s, n, axis=axis), cfg)
        cfg[axis] = (-s, 0)
        return jnp.pad(lax.slice_in_dim(t, 0, n + s, axis=axis), cfg)

    def axial(t, di, d):
        acc = t + p["bhs"][di] + p["bws"][di]
        for k in range(3):
            s = (k - 1) * d
            acc = acc + p["whs"][di, k] * shift(t, s, 1)
            acc = acc + p["wws"][di, k] * shift(t, s, 2)
        return acc

    xc = jnp.concatenate([y, axial(y, 0, 1), axial(y, 1, 2), axial(y, 2, 3)], -1)
    xc2 = xc.reshape(S, C)
    mean = xc2.mean(axis=0)
    var = jnp.mean((xc2 - mean) ** 2, axis=0)
    xn = (xc2 - mean) * lax.rsqrt(var + BN_EPS) * p["gamma"].reshape(-1) + p["beta"].reshape(-1)
    out = jax.nn.gelu(xn @ p["w2s"].reshape(C, C) + p["b2"], approximate=False)
    return jnp.transpose(out.reshape(N, H, W, C), (0, 3, 1, 2))


if __name__ == "__main__":
    # BottleNeckBlock(dim=128) as instantiated by ULite inside PolicyValueNet.
    dim, N, H, W = 128, 4, 8, 8
    key = jax.random.PRNGKey(0)
    kx, kp = jax.random.split(key)
    x_nchw = jax.random.normal(kx, (N, dim, H, W), dtype=jnp.float32)
    params = init_params(kp, dim)
    packed = pack_params(params)
    ref = reference_forward(x_nchw, params)

    # One relayout at the model boundary; a fully-NHWC network would elide it.
    x_nhwc = jnp.transpose(x_nchw, (0, 2, 3, 1))

    # fused single-pass path (the one the real net hits)
    out_f = jax.block_until_ready(bottleneck_forward_nhwc(x_nhwc, packed))
    out_f = jnp.transpose(out_f, (0, 3, 1, 2))
    assert out_f.shape == (N, dim, H, W), out_f.shape
    assert bool(jnp.all(jnp.isfinite(out_f)))
    err_f = float(jnp.max(jnp.abs(out_f - ref)))
    assert err_f < 1e-1, f"fused path max abs error vs f32 reference: {err_f}"

    # two-pass pipelined path (large-batch / eval-mode fallback)
    out_2 = jax.block_until_ready(
        bottleneck_forward_nhwc(x_nhwc, packed, force_two_pass=True))
    out_2 = jnp.transpose(out_2, (0, 3, 1, 2))
    assert bool(jnp.all(jnp.isfinite(out_2)))
    err_2 = float(jnp.max(jnp.abs(out_2 - ref)))
    assert err_2 < 1e-1, f"two-pass path max abs error vs f32 reference: {err_2}"

    print("KERNEL_OK")
</pallas_src>

<mosaic_0001>
module attributes {stable_mosaic.version = 11 : i64} {
  func.func @_fused_kernel(%arg0: i32, %arg1: memref<4x8x8x128xf32, #tpu.memory_space<vmem>>, %arg2: memref<128x128xbf16, #tpu.memory_space<vmem>>, %arg3: memref<1x128xf32, #tpu.memory_space<vmem>>, %arg4: memref<1x128xf32, #tpu.memory_space<vmem>>, %arg5: memref<1x128xf32, #tpu.memory_space<vmem>>, %arg6: memref<6x128xf32, #tpu.memory_space<vmem>>, %arg7: memref<6x128xf32, #tpu.memory_space<vmem>>, %arg8: memref<128x128xbf16, #tpu.memory_space<vmem>>, %arg9: memref<1x128xf32, #tpu.memory_space<vmem>>, %arg10: memref<1x128xf32, #tpu.memory_space<vmem>>, %arg11: memref<1x128xf32, #tpu.memory_space<vmem>>, %arg12: memref<4x8x8x128xf32, #tpu.memory_space<vmem>>, %arg13: memref<4x14x14x128xf32, #tpu.memory_space<vmem>>) attributes {dimension_semantics = [#tpu.dimension_semantics<arbitrary>], iteration_bounds = array<i64: 1>, scalar_prefetch = 0 : i64, scratch_operands = 1 : i64, tpu.core_type = #tpu.core_type<tc>, window_params = [{pipeline_mode = #tpu.pipeline_mode<synchronous>, transform_indices = @transform_0, window_bounds = array<i64: 4, 8, 8, 128>}, {pipeline_mode = #tpu.pipeline_mode<synchronous>, transform_indices = @transform_1, window_bounds = array<i64: 128, 128>}, {pipeline_mode = #tpu.pipeline_mode<synchronous>, transform_indices = @transform_2, window_bounds = array<i64: 1, 128>}, {pipeline_mode = #tpu.pipeline_mode<synchronous>, transform_indices = @transform_3, window_bounds = array<i64: 1, 128>}, {pipeline_mode = #tpu.pipeline_mode<synchronous>, transform_indices = @transform_4, window_bounds = array<i64: 1, 128>}, {pipeline_mode = #tpu.pipeline_mode<synchronous>, transform_indices = @transform_5, window_bounds = array<i64: 6, 128>}, {pipeline_mode = #tpu.pipeline_mode<synchronous>, transform_indices = @transform_6, window_bounds = array<i64: 6, 128>}, {pipeline_mode = #tpu.pipeline_mode<synchronous>, transform_indices = @transform_7, window_bounds = array<i64: 128, 128>}, {pipeline_mode = #tpu.pipeline_mode<synchronous>, transform_indices = @transform_8, window_bounds = array<i64: 1, 128>}, {pipeline_mode = #tpu.pipeline_mode<synchronous>, transform_indices = @transform_9, window_bounds = array<i64: 1, 128>}, {pipeline_mode = #tpu.pipeline_mode<synchronous>, transform_indices = @transform_10, window_bounds = array<i64: 1, 128>}, {pipeline_mode = #tpu.pipeline_mode<synchronous>, transform_indices = @transform_11, window_bounds = array<i64: 4, 8, 8, 128>}]} {
    %c0 = arith.constant 0 : index
    %c0_0 = arith.constant 0 : index
    %c0_1 = arith.constant 0 : index
    %c0_2 = arith.constant 0 : index
    %0 = vector.load %arg1[%c0, %c0_0, %c0_1, %c0_2] : memref<4x8x8x128xf32, #tpu.memory_space<vmem>>, vector<4x8x8x128xf32>
    %1 = vector.shape_cast %0 : vector<4x8x8x128xf32> to vector<256x128xf32>
    %2 = arith.truncf %1 : vector<256x128xf32> to vector<256x128xbf16>
    %c0_3 = arith.constant 0 : index
    %c0_4 = arith.constant 0 : index
    %3 = vector.load %arg2[%c0_3, %c0_4] : memref<128x128xbf16, #tpu.memory_space<vmem>>, vector<128x128xbf16>
    %cst = arith.constant dense<0.000000e+00> : vector<256x128xf32>
    %4 = tpu.matmul %2, %3, %cst {dimension_numbers = #tpu.dot_dimension_numbers<[1], [0], [0], [1], [0, 0, 1, 1], [], []>} : vector<256x128xbf16>, vector<128x128xbf16>, vector<256x128xf32> -> vector<256x128xf32>
    %c0_5 = arith.constant 0 : index
    %c0_6 = arith.constant 0 : index
    %5 = vector.load %arg3[%c0_5, %c0_6] : memref<1x128xf32, #tpu.memory_space<vmem>>, vector<1x128xf32>
    %6 = vector.broadcast %5 : vector<1x128xf32> to vector<256x128xf32>
    %7 = arith.addf %4, %6 : vector<256x128xf32>
    %8 = vector.shape_cast %7 : vector<256x128xf32> to vector<4x8x8x128xf32>
    %c0_7 = arith.constant 0 : index
    %c0_8 = arith.constant 0 : index
    %9 = vector.load %arg4[%c0_7, %c0_8] : memref<1x128xf32, #tpu.memory_space<vmem>>, vector<1x128xf32>
    %c0_9 = arith.constant 0 : index
    %c0_10 = arith.constant 0 : index
    %10 = vector.load %arg5[%c0_9, %c0_10] : memref<1x128xf32, #tpu.memory_space<vmem>>, vector<1x128xf32>
    %c0_11 = arith.constant 0 : index
    %c0_12 = arith.constant 0 : index
    %11 = vector.load %arg6[%c0_11, %c0_12] : memref<6x128xf32, #tpu.memory_space<vmem>>, vector<6x128xf32>
    %c0_13 = arith.constant 0 : index
    %c0_14 = arith.constant 0 : index
    %12 = vector.load %arg7[%c0_13, %c0_14] : memref<6x128xf32, #tpu.memory_space<vmem>>, vector<6x128xf32>
    %cst_15 = arith.constant 0.000000e+00 : f32
    %13 = vector.broadcast %cst_15 : f32 to vector<4x14x14x128xf32>
    %c0_16 = arith.constant 0 : index
    %c0_17 = arith.constant 0 : index
    %c0_18 = arith.constant 0 : index
    %c0_19 = arith.constant 0 : index
    %14 = vector.load %arg13[%c0_16, %c0_17, %c0_18, %c0_19] : memref<4x14x14x128xf32, #tpu.memory_space<vmem>>, vector<4x14x14x128xf32>
    tpu.vector_store %arg13[%c0_16, %c0_17, %c0_18, %c0_19], %13 {strides = array<i32>} : memref<4x14x14x128xf32, #tpu.memory_space<vmem>>, vector<4x14x14x128xf32>,
    %c0_20 = arith.constant 0 : index
    %c3 = arith.constant 3 : index
    %c3_21 = arith.constant 3 : index
    %c0_22 = arith.constant 0 : index
    %15 = vector.load %arg13[%c0_20, %c3, %c3_21, %c0_22] : memref<4x14x14x128xf32, #tpu.memory_space<vmem>>, vector<4x8x8x128xf32>
    tpu.vector_store %arg13[%c0_20, %c3, %c3_21, %c0_22], %8 {strides = array<i32>} : memref<4x14x14x128xf32, #tpu.memory_space<vmem>>, vector<4x8x8x128xf32>,
    %16 = vector.shape_cast %9 : vector<1x128xf32> to vector<1x1x1x128xf32>
    %17 = vector.broadcast %16 : vector<1x1x1x128xf32> to vector<4x8x8x128xf32>
    %18 = arith.mulf %8, %17 : vector<4x8x8x128xf32>
    %19 = vector.shape_cast %10 : vector<1x128xf32> to vector<1x1x1x128xf32>
    %20 = vector.broadcast %19 : vector<1x1x1x128xf32> to vector<4x8x8x128xf32>
    %21 = arith.addf %18, %20 : vector<4x8x8x128xf32>
    %22 = vector.extract_strided_slice %11 {offsets = [0, 0], sizes = [1, 128], strides = [1, 1]} : vector<6x128xf32> to vector<1x128xf32>
    %c0_23 = arith.constant 0 : index
    %c0_24 = arith.constant 0 : index
    %c3_25 = arith.constant 3 : index
    %c0_26 = arith.constant 0 : index
    %23 = vector.load %arg13[%c0_23, %c0_24, %c3_25, %c0_26] : memref<4x14x14x128xf32, #tpu.memory_space<vmem>>, vector<4x8x8x128xf32>
    %24 = vector.shape_cast %22 : vector<1x128xf32> to vector<1x1x1x128xf32>
    %25 = vector.broadcast %24 : vector<1x1x1x128xf32> to vector<4x8x8x128xf32>
    %26 = arith.mulf %25, %23 : vector<4x8x8x128xf32>
    %27 = arith.addf %21, %26 : vector<4x8x8x128xf32>
    %28 = vector.extract_strided_slice %12 {offsets = [0, 0], sizes = [1, 128], strides = [1, 1]} : vector<6x128xf32> to vector<1x128xf32>
    %c0_27 = arith.constant 0 : index
    %c3_28 = arith.constant 3 : index
    %c0_29 = arith.constant 0 : index
    %c0_30 = arith.constant 0 : index
    %29 = vector.load %arg13[%c0_27, %c3_28, %c0_29, %c0_30] : memref<4x14x14x128xf32, #tpu.memory_space<vmem>>, vector<4x8x8x128xf32>
    %30 = vector.shape_cast %28 : vector<1x128xf32> to vector<1x1x1x128xf32>
    %31 = vector.broadcast %30 : vector<1x1x1x128xf32> to vector<4x8x8x128xf32>
    %32 = arith.mulf %31, %29 : vector<4x8x8x128xf32>
    %33 = arith.addf %27, %32 : vector<4x8x8x128xf32>
    %34 = vector.extract_strided_slice %11 {offsets = [1, 0], sizes = [1, 128], strides = [1, 1]} : vector<6x128xf32> to vector<1x128xf32>
    %c0_31 = arith.constant 0 : index
    %c1 = arith.constant 1 : index
    %c3_32 = arith.constant 3 : index
    %c0_33 = arith.constant 0 : index
    %35 = vector.load %arg13[%c0_31, %c1, %c3_32, %c0_33] : memref<4x14x14x128xf32, #tpu.memory_space<vmem>>, vector<4x8x8x128xf32>
    %36 = vector.shape_cast %34 : vector<1x128xf32> to vector<1x1x1x128xf32>
    %37 = vector.broadcast %36 : vector<1x1x1x128xf32> to vector<4x8x8x128xf32>
    %38 = arith.mulf %37, %35 : vector<4x8x8x128xf32>
    %39 = arith.addf %33, %38 : vector<4x8x8x128xf32>
    %40 = vector.extract_strided_slice %12 {offsets = [1, 0], sizes = [1, 128], strides = [1, 1]} : vector<6x128xf32> to vector<1x128xf32>
    %c0_34 = arith.constant 0 : index
    %c3_35 = arith.constant 3 : index
    %c1_36 = arith.constant 1 : index
    %c0_37 = arith.constant 0 : index
    %41 = vector.load %arg13[%c0_34, %c3_35, %c1_36, %c0_37] : memref<4x14x14x128xf32, #tpu.memory_space<vmem>>, vector<4x8x8x128xf32>
    %42 = vector.shape_cast %40 : vector<1x128xf32> to vector<1x1x1x128xf32>
    %43 = vector.broadcast %42 : vector<1x1x1x128xf32> to vector<4x8x8x128xf32>
    %44 = arith.mulf %43, %41 : vector<4x8x8x128xf32>
    %45 = arith.addf %39, %44 : vector<4x8x8x128xf32>
    %46 = vector.extract_strided_slice %11 {offsets = [2, 0], sizes = [1, 128], strides = [1, 1]} : vector<6x128xf32> to vector<1x128xf32>
    %c0_38 = arith.constant 0 : index
    %c2 = arith.constant 2 : index
    %c3_39 = arith.constant 3 : index
    %c0_40 = arith.constant 0 : index
    %47 = vector.load %arg13[%c0_38, %c2, %c3_39, %c0_40] : memref<4x14x14x128xf32, #tpu.memory_space<vmem>>, vector<4x8x8x128xf32>
    %48 = vector.shape_cast %46 : vector<1x128xf32> to vector<1x1x1x128xf32>
    %49 = vector.broadcast %48 : vector<1x1x1x128xf32> to vector<4x8x8x128xf32>
    %50 = arith.mulf %49, %47 : vector<4x8x8x128xf32>
    %51 = arith.addf %45, %50 : vector<4x8x8x128xf32>
    %52 = vector.extract_strided_slice %12 {offsets = [2, 0], sizes = [1, 128], strides = [1, 1]} : vector<6x128xf32> to vector<1x128xf32>
    %c0_41 = arith.constant 0 : index
    %c3_42 = arith.constant 3 : index
    %c2_43 = arith.constant 2 : index
    %c0_44 = arith.constant 0 : index
    %53 = vector.load %arg13[%c0_41, %c3_42, %c2_43, %c0_44] : memref<4x14x14x128xf32, #tpu.memory_space<vmem>>, vector<4x8x8x128xf32>
    %54 = vector.shape_cast %52 : vector<1x128xf32> to vector<1x1x1x128xf32>
    %55 = vector.broadcast %54 : vector<1x1x1x128xf32> to vector<4x8x8x128xf32>
    %56 = arith.mulf %55, %53 : vector<4x8x8x128xf32>
    %57 = arith.addf %51, %56 : vector<4x8x8x128xf32>
    %58 = vector.extract_strided_slice %11 {offsets = [3, 0], sizes = [1, 128], strides = [1, 1]} : vector<6x128xf32> to vector<1x128xf32>
    %c0_45 = arith.constant 0 : index
    %c4 = arith.constant 4 : index
    %c3_46 = arith.constant 3 : index
    %c0_47 = arith.constant 0 : index
    %59 = vector.load %arg13[%c0_45, %c4, %c3_46, %c0_47] : memref<4x14x14x128xf32, #tpu.memory_space<vmem>>, vector<4x8x8x128xf32>
    %60 = vector.shape_cast %58 : vector<1x128xf32> to vector<1x1x1x128xf32>
    %61 = vector.broadcast %60 : vector<1x1x1x128xf32> to vector<4x8x8x128xf32>
    %62 = arith.mulf %61, %59 : vector<4x8x8x128xf32>
    %63 = arith.addf %57, %62 : vector<4x8x8x128xf32>
    %64 = vector.extract_strided_slice %12 {offsets = [3, 0], sizes = [1, 128], strides = [1, 1]} : vector<6x128xf32> to vector<1x128xf32>
    %c0_48 = arith.constant 0 : index
    %c3_49 = arith.constant 3 : index
    %c4_50 = arith.constant 4 : index
    %c0_51 = arith.constant 0 : index
    %65 = vector.load %arg13[%c0_48, %c3_49, %c4_50, %c0_51] : memref<4x14x14x128xf32, #tpu.memory_space<vmem>>, vector<4x8x8x128xf32>
    %66 = vector.shape_cast %64 : vector<1x128xf32> to vector<1x1x1x128xf32>
    %67 = vector.broadcast %66 : vector<1x1x1x128xf32> to vector<4x8x8x128xf32>
    %68 = arith.mulf %67, %65 : vector<4x8x8x128xf32>
    %69 = arith.addf %63, %68 : vector<4x8x8x128xf32>
    %70 = vector.extract_strided_slice %11 {offsets = [4, 0], sizes = [1, 128], strides = [1, 1]} : vector<6x128xf32> to vector<1x128xf32>
    %c0_52 = arith.constant 0 : index
    %c5 = arith.constant 5 : index
    %c3_53 = arith.constant 3 : index
    %c0_54 = arith.constant 0 : index
    %71 = vector.load %arg13[%c0_52, %c5, %c3_53, %c0_54] : memref<4x14x14x128xf32, #tpu.memory_space<vmem>>, vector<4x8x8x128xf32>
    %72 = vector.shape_cast %70 : vector<1x128xf32> to vector<1x1x1x128xf32>
    %73 = vector.broadcast %72 : vector<1x1x1x128xf32> to vector<4x8x8x128xf32>
    %74 = arith.mulf %73, %71 : vector<4x8x8x128xf32>
    %75 = arith.addf %69, %74 : vector<4x8x8x128xf32>
    %76 = vector.extract_strided_slice %12 {offsets = [4, 0], sizes = [1, 128], strides = [1, 1]} : vector<6x128xf32> to vector<1x128xf32>
    %c0_55 = arith.constant 0 : index
    %c3_56 = arith.constant 3 : index
    %c5_57 = arith.constant 5 : index
    %c0_58 = arith.constant 0 : index
    %77 = vector.load %arg13[%c0_55, %c3_56, %c5_57, %c0_58] : memref<4x14x14x128xf32, #tpu.memory_space<vmem>>, vector<4x8x8x128xf32>
    %78 = vector.shape_cast %76 : vector<1x128xf32> to vector<1x1x1x128xf32>
    %79 = vector.broadcast %78 : vector<1x1x1x128xf32> to vector<4x8x8x128xf32>
    %80 = arith.mulf %79, %77 : vector<4x8x8x128xf32>
    %81 = arith.addf %75, %80 : vector<4x8x8x128xf32>
    %82 = vector.extract_strided_slice %11 {offsets = [5, 0], sizes = [1, 128], strides = [1, 1]} : vector<6x128xf32> to vector<1x128xf32>
    %c0_59 = arith.constant 0 : index
    %c6 = arith.constant 6 : index
    %c3_60 = arith.constant 3 : index
    %c0_61 = arith.constant 0 : index
    %83 = vector.load %arg13[%c0_59, %c6, %c3_60, %c0_61] : memref<4x14x14x128xf32, #tpu.memory_space<vmem>>, vector<4x8x8x128xf32>
    %84 = vector.shape_cast %82 : vector<1x128xf32> to vector<1x1x1x128xf32>
    %85 = vector.broadcast %84 : vector<1x1x1x128xf32> to vector<4x8x8x128xf32>
    %86 = arith.mulf %85, %83 : vector<4x8x8x128xf32>
    %87 = arith.addf %81, %86 : vector<4x8x8x128xf32>
    %88 = vector.extract_strided_slice %12 {offsets = [5, 0], sizes = [1, 128], strides = [1, 1]} : vector<6x128xf32> to vector<1x128xf32>
    %c0_62 = arith.constant 0 : index
    %c3_63 = arith.constant 3 : index
    %c6_64 = arith.constant 6 : index
    %c0_65 = arith.constant 0 : index
    %89 = vector.load %arg13[%c0_62, %c3_63, %c6_64, %c0_65] : memref<4x14x14x128xf32, #tpu.memory_space<vmem>>, vector<4x8x8x128xf32>
    %90 = vector.shape_cast %88 : vector<1x128xf32> to vector<1x1x1x128xf32>
    %91 = vector.broadcast %90 : vector<1x1x1x128xf32> to vector<4x8x8x128xf32>
    %92 = arith.mulf %91, %89 : vector<4x8x8x128xf32>
    %93 = arith.addf %87, %92 : vector<4x8x8x128xf32>
    %94 = vector.shape_cast %93 : vector<4x8x8x128xf32> to vector<256x128xf32>
    %cst_66 = arith.constant dense<0.000000e+00> : vector<128xf32>
    %95 = vector.multi_reduction <add>, %94, %cst_66 [0] : vector<256x128xf32> to vector<128xf32>
    %96 = vector.shape_cast %95 : vector<128xf32> to vector<1x128xf32>
    %cst_67 = arith.constant 2.560000e+02 : f32
    %97 = vector.broadcast %cst_67 : f32 to vector<1x128xf32>
    %98 = arith.divf %96, %97 : vector<1x128xf32>
    %99 = arith.mulf %94, %94 : vector<256x128xf32>
    %cst_68 = arith.constant dense<0.000000e+00> : vector<128xf32>
    %100 = vector.multi_reduction <add>, %99, %cst_68 [0] : vector<256x128xf32> to vector<128xf32>
    %101 = vector.shape_cast %100 : vector<128xf32> to vector<1x128xf32>
    %cst_69 = arith.constant 2.560000e+02 : f32
    %102 = vector.broadcast %cst_69 : f32 to vector<1x128xf32>
    %103 = arith.divf %101, %102 : vector<1x128xf32>
    %104 = arith.mulf %98, %98 : vector<1x128xf32>
    %105 = arith.subf %103, %104 : vector<1x128xf32>
    %cst_70 = arith.constant 0.000000e+00 : f32
    %106 = vector.broadcast %cst_70 : f32 to vector<1x128xf32>
    %107 = arith.maximumf %105, %106 : vector<1x128xf32>
    %cst_71 = arith.constant 9.99999974E-6 : f32
    %108 = vector.broadcast %cst_71 : f32 to vector<1x128xf32>
    %109 = arith.addf %107, %108 : vector<1x128xf32>
    %110 = math.rsqrt %109 : vector<1x128xf32>
    %111 = vector.broadcast %98 : vector<1x128xf32> to vector<256x128xf32>
    %112 = arith.subf %94, %111 : vector<256x128xf32>
    %c0_72 = arith.constant 0 : index
    %c0_73 = arith.constant 0 : index
    %113 = vector.load %arg10[%c0_72, %c0_73] : memref<1x128xf32, #tpu.memory_space<vmem>>, vector<1x128xf32>
    %114 = arith.mulf %113, %110 : vector<1x128xf32>
    %115 = vector.broadcast %114 : vector<1x128xf32> to vector<256x128xf32>
    %116 = arith.mulf %112, %115 : vector<256x128xf32>
    %c0_74 = arith.constant 0 : index
    %c0_75 = arith.constant 0 : index
    %117 = vector.load %arg11[%c0_74, %c0_75] : memref<1x128xf32, #tpu.memory_space<vmem>>, vector<1x128xf32>
    %118 = vector.broadcast %117 : vector<1x128xf32> to vector<256x128xf32>
    %119 = arith.addf %116, %118 : vector<256x128xf32>
    %120 = arith.truncf %119 : vector<256x128xf32> to vector<256x128xbf16>
    %c0_76 = arith.constant 0 : index
    %c0_77 = arith.constant 0 : index
    %121 = vector.load %arg8[%c0_76, %c0_77] : memref<128x128xbf16, #tpu.memory_space<vmem>>, vector<128x128xbf16>
    %cst_78 = arith.constant dense<0.000000e+00> : vector<256x128xf32>
    %122 = tpu.matmul %120, %121, %cst_78 {dimension_numbers = #tpu.dot_dimension_numbers<[1], [0], [0], [1], [0, 0, 1, 1], [], []>} : vector<256x128xbf16>, vector<128x128xbf16>, vector<256x128xf32> -> vector<256x128xf32>
    %c0_79 = arith.constant 0 : index
    %c0_80 = arith.constant 0 : index
    %123 = vector.load %arg9[%c0_79, %c0_80] : memref<1x128xf32, #tpu.memory_space<vmem>>, vector<1x128xf32>
    %124 = vector.broadcast %123 : vector<1x128xf32> to vector<256x128xf32>
    %125 = arith.addf %122, %124 : vector<256x128xf32>
    %cst_81 = arith.constant 0.707106769 : f32
    %126 = vector.broadcast %cst_81 : f32 to vector<256x128xf32>
    %127 = arith.mulf %125, %126 : vector<256x128xf32>
    %128 = math.absf %127 : vector<256x128xf32>
    %cst_82 = arith.constant 0.327591091 : f32
    %129 = vector.broadcast %cst_82 : f32 to vector<256x128xf32>
    %130 = arith.mulf %129, %128 : vector<256x128xf32>
    %cst_83 = arith.constant 1.000000e+00 : f32
    %131 = vector.broadcast %cst_83 : f32 to vector<256x128xf32>
    %132 = arith.addf %131, %130 : vector<256x128xf32>
    %133 = tpu.reciprocal %132 {approx = true} : vector<256x128xf32> -> vector<256x128xf32>
    %cst_84 = arith.constant 1.06140542 : f32
    %134 = vector.broadcast %cst_84 : f32 to vector<256x128xf32>
    %135 = arith.mulf %133, %134 : vector<256x128xf32>
    %cst_85 = arith.constant -1.45315206 : f32
    %136 = vector.broadcast %cst_85 : f32 to vector<256x128xf32>
    %137 = arith.addf %136, %135 : vector<256x128xf32>
    %138 = arith.mulf %133, %137 : vector<256x128xf32>
    %cst_86 = arith.constant 1.42141378 : f32
    %139 = vector.broadcast %cst_86 : f32 to vector<256x128xf32>
    %140 = arith.addf %139, %138 : vector<256x128xf32>
    %141 = arith.mulf %133, %140 : vector<256x128xf32>
    %cst_87 = arith.constant -0.284496725 : f32
    %142 = vector.broadcast %cst_87 : f32 to vector<256x128xf32>
    %143 = arith.addf %142, %141 : vector<256x128xf32>
    %144 = arith.mulf %133, %143 : vector<256x128xf32>
    %cst_88 = arith.constant 0.254829586 : f32
    %145 = vector.broadcast %cst_88 : f32 to vector<256x128xf32>
    %146 = arith.addf %145, %144 : vector<256x128xf32>
    %147 = arith.mulf %133, %146 : vector<256x128xf32>
    %cst_89 = arith.constant 0.000000e+00 : f32
    %148 = vector.broadcast %cst_89 : f32 to vector<256x128xf32>
    %149 = arith.subf %148, %128 : vector<256x128xf32>
    %150 = arith.mulf %149, %128 : vector<256x128xf32>
    %151 = math.exp %150 : vector<256x128xf32>
    %152 = arith.mulf %147, %151 : vector<256x128xf32>
    %cst_90 = arith.constant 1.000000e+00 : f32
    %153 = vector.broadcast %cst_90 : f32 to vector<256x128xf32>
    %154 = arith.subf %153, %152 : vector<256x128xf32>
    %cst_91 = arith.constant 0.000000e+00 : f32
    %155 = vector.broadcast %cst_91 : f32 to vector<256x128xf32>
    %156 = arith.cmpf oge, %127, %155 : vector<256x128xf32>
    %cst_92 = arith.constant 0.000000e+00 : f32
    %157 = vector.broadcast %cst_92 : f32 to vector<256x128xf32>
    %158 = arith.subf %157, %154 : vector<256x128xf32>
    %159 = arith.select %156, %154, %158 : vector<256x128xi1>, vector<256x128xf32>
    %cst_93 = arith.constant 5.000000e-01 : f32
    %160 = vector.broadcast %cst_93 : f32 to vector<256x128xf32>
    %161 = arith.mulf %160, %125 : vector<256x128xf32>
    %cst_94 = arith.constant 1.000000e+00 : f32
    %162 = vector.broadcast %cst_94 : f32 to vector<256x128xf32>
    %163 = arith.addf %162, %159 : vector<256x128xf32>
    %164 = arith.mulf %161, %163 : vector<256x128xf32>
    %165 = vector.shape_cast %164 : vector<256x128xf32> to vector<4x8x8x128xf32>
    %c0_95 = arith.constant 0 : index
    %c0_96 = arith.constant 0 : index
    %c0_97 = arith.constant 0 : index
    %c0_98 = arith.constant 0 : index
    %166 = vector.load %arg12[%c0_95, %c0_96, %c0_97, %c0_98] : memref<4x8x8x128xf32, #tpu.memory_space<vmem>>, vector<4x8x8x128xf32>
    tpu.vector_store %arg12[%c0_95, %c0_96, %c0_97, %c0_98], %165 {strides = array<i32>} : memref<4x8x8x128xf32, #tpu.memory_space<vmem>>, vector<4x8x8x128xf32>,
    return
  }
  func.func @transform_0(%arg0: i32) -> (i32, i32, i32, i32) {
    %c0_i32 = arith.constant 0 : i32
    %c0_i32_0 = arith.constant 0 : i32
    %c0_i32_1 = arith.constant 0 : i32
    %c0_i32_2 = arith.constant 0 : i32
    %c0_i32_3 = arith.constant 0 : i32
    return %c0_i32, %c0_i32_0, %c0_i32_1, %c0_i32_2 : i32, i32, i32, i32
  }
  func.func @transform_1(%arg0: i32) -> (i32, i32) {
    %c0_i32 = arith.constant 0 : i32
    %c0_i32_0 = arith.constant 0 : i32
    %c0_i32_1 = arith.constant 0 : i32
    return %c0_i32, %c0_i32_0 : i32, i32
  }
  func.func @transform_2(%arg0: i32) -> (i32, i32) {
    %c0_i32 = arith.constant 0 : i32
    %c0_i32_0 = arith.constant 0 : i32
    %c0_i32_1 = arith.constant 0 : i32
    return %c0_i32, %c0_i32_0 : i32, i32
  }
  func.func @transform_3(%arg0: i32) -> (i32, i32) {
    %c0_i32 = arith.constant 0 : i32
    %c0_i32_0 = arith.constant 0 : i32
    %c0_i32_1 = arith.constant 0 : i32
    return %c0_i32, %c0_i32_0 : i32, i32
  }
  func.func @transform_4(%arg0: i32) -> (i32, i32) {
    %c0_i32 = arith.constant 0 : i32
    %c0_i32_0 = arith.constant 0 : i32
    %c0_i32_1 = arith.constant 0 : i32
    return %c0_i32, %c0_i32_0 : i32, i32
  }
  func.func @transform_5(%arg0: i32) -> (i32, i32) {
    %c0_i32 = arith.constant 0 : i32
    %c0_i32_0 = arith.constant 0 : i32
    %c0_i32_1 = arith.constant 0 : i32
    return %c0_i32, %c0_i32_0 : i32, i32
  }
  func.func @transform_6(%arg0: i32) -> (i32, i32) {
    %c0_i32 = arith.constant 0 : i32
    %c0_i32_0 = arith.constant 0 : i32
    %c0_i32_1 = arith.constant 0 : i32
    return %c0_i32, %c0_i32_0 : i32, i32
  }
  func.func @transform_7(%arg0: i32) -> (i32, i32) {
    %c0_i32 = arith.constant 0 : i32
    %c0_i32_0 = arith.constant 0 : i32
    %c0_i32_1 = arith.constant 0 : i32
    return %c0_i32, %c0_i32_0 : i32, i32
  }
  func.func @transform_8(%arg0: i32) -> (i32, i32) {
    %c0_i32 = arith.constant 0 : i32
    %c0_i32_0 = arith.constant 0 : i32
    %c0_i32_1 = arith.constant 0 : i32
    return %c0_i32, %c0_i32_0 : i32, i32
  }
  func.func @transform_9(%arg0: i32) -> (i32, i32) {
    %c0_i32 = arith.constant 0 : i32
    %c0_i32_0 = arith.constant 0 : i32
    %c0_i32_1 = arith.constant 0 : i32
    return %c0_i32, %c0_i32_0 : i32, i32
  }
  func.func @transform_10(%arg0: i32) -> (i32, i32) {
    %c0_i32 = arith.constant 0 : i32
    %c0_i32_0 = arith.constant 0 : i32
    %c0_i32_1 = arith.constant 0 : i32
    return %c0_i32, %c0_i32_0 : i32, i32
  }
  func.func @transform_11(%arg0: i32) -> (i32, i32, i32, i32) {
    %c0_i32 = arith.constant 0 : i32
    %c0_i32_0 = arith.constant 0 : i32
    %c0_i32_1 = arith.constant 0 : i32
    %c0_i32_2 = arith.constant 0 : i32
    %c0_i32_3 = arith.constant 0 : i32
    return %c0_i32, %c0_i32_0, %c0_i32_1, %c0_i32_2 : i32, i32, i32, i32
  }
}

</mosaic_0001>

<bundles_post_ra>
// kernel: bottleneck_forward_nhwc.1
= control target key start
LH: loop header
LB: loop body
LE: loop exit
PB: predicated region body
PF: predicated region fallthrough
CT: control target
= control target key end

     0   :  { %16 = vsyncpa [#allocation4], 0  ;;  %s5995_s0 = inlined_call_operand.hbm [shape: f32[4,8,8,128], index: 0, kind: input, shape index: {}]   ;;  %s5996_s1 = inlined_call_operand.hbm [shape: bf16[128,128], index: 1, kind: input, shape index: {}]   ;;  %s5997_s2 = inlined_call_operand.hbm [shape: f32[1,128], index: 2, kind: input, shape index: {}]   ;;  %s5998_s3 = inlined_call_operand.hbm [shape: f32[1,128], index: 3, kind: input, shape index: {}]   ;;  %s5999_s4 = inlined_call_operand.hbm [shape: f32[1,128], index: 4, kind: input, shape index: {}]   ;;  %s6000_s5 = inlined_call_operand.vmem [shape: f32[6,128], index: 5, kind: input, shape index: {}]   ;;  %s6001_s6 = inlined_call_operand.vmem [shape: f32[6,128], index: 6, kind: input, shape index: {}]   ;;  %s6002_s7 = inlined_call_operand.hbm [shape: bf16[128,128], index: 7, kind: input, shape index: {}]   ;;  %s6003_s8 = inlined_call_operand.hbm [shape: f32[1,128], index: 8, kind: input, shape index: {}]   ;;  %s6004_s9 = inlined_call_operand.hbm [shape: f32[1,128], index: 9, kind: input, shape index: {}]   ;;  %s6005_s10 = inlined_call_operand.hbm [shape: f32[1,128], index: 10, kind: input, shape index: {}]   ;;  %s6006_s11 = inlined_call_operand.hbm [shape: f32[4,8,8,128], index: 11, kind: output, shape index: {}]  }
   0x1   :  { %17 = vsyncpa [#allocation7], 0 }
   0x2   :  { %18 = vsyncpa [#allocation10], 0 }
   0x3   :  { %19 = vsyncpa [#allocation13], 0 }
   0x4   :  { %20 = vsyncpa [#allocation16], 0 }
   0x5   :  { %21 = vsyncpa [#allocation5], 0  ;;  %s3776_s17 = smov [#allocation6]  }
   0x6   :  { %s39_s18 = sshll.u32 %s3776_s17, 4  ;;  %s40_s18 = int_to_ptr.vmem [resolvable:$true] %s39_s18 }
   0x7   :  { %s3572_s19 = scalar_lea.vmem %s40_s18, 1024  ;;  %p3577_p1 = scmp.lt.s32.totalorder %s40_s18, %s40_s18 }
   0x8   :  { %p3573_p0 = scmp.ne.s32.totalorder %s40_s18, %s3572_s19  ;;  %p3578_p2 = scmp.lt.s32.totalorder %s3572_s19, %s3572_s19 }
   0xa   :  { %p3579_p3 = por %p3578_p2, %p3577_p1 }
   0xc   :  { %p3580_p4 = pnand %p3579_p3, %p3573_p0 }
   0xe   :  { %3583 = shalt.err (!%p3580_p4)
}
   0xf   :  { %s3777_s20 = smov 64   ;;  %s3778_s21 = smov 4  }
  0x10   :  { %45 = dma.hbm_to_vmem [thread:$0]  %s5996_s1, 1024, %s40_s18, [#allocation7], %s3777_s20, %s3777_s20, %s3778_s21  }
  0x11   :  { %s3779_s24 = smov [#allocation9]   ;;  %s3780_s26 = smov [#allocation12]  }
  0x12   :  { %s62_s25 = sshll.u32 %s3779_s24, 4  ;;  %s85_s27 = sshll.u32 %s3780_s26, 4  ;;  %s63_s25 = int_to_ptr.vmem [resolvable:$true] %s62_s25  ;;  %s86_s27 = int_to_ptr.vmem [resolvable:$true] %s85_s27 }
  0x13   :  { %s3592_s28 = scalar_lea.vmem %s63_s25, 16  ;;  %s3596_s29 = scalar_lea.vmem %s63_s25, 32 }
  0x14   :  { %p3593_p5 = scmp.ne.s32.totalorder %s63_s25, %s3592_s28  ;;  %p3597_p6 = scmp.lt.s32.totalorder %s63_s25, %s63_s25 }
  0x15   :  { %p3598_p7 = scmp.lt.s32.totalorder %s3596_s29, %s3592_s28 }
  0x17   :  { %p3599_p8 = por %p3598_p7, %p3597_p6 }
  0x19   :  { %p3600_p9 = pnand %p3599_p8, %p3593_p5 }
  0x1b   :  { %3603 = shalt.err (!%p3600_p9)
}
  0x1c   :  { %65 = dma.hbm_to_vmem [thread:$0]  %s5998_s3, 16, %s63_s25, [#allocation10]  }
  0x1d   :  { %s3612_s13 = scalar_lea.vmem %s86_s27, 1024  ;;  %p3617_p11 = scmp.lt.s32.totalorder %s86_s27, %s86_s27 }
  0x1e   :  { %p3613_p10 = scmp.ne.s32.totalorder %s86_s27, %s3612_s13  ;;  %p3618_p12 = scmp.lt.s32.totalorder %s3612_s13, %s3612_s13 }
  0x20   :  { %p3619_p13 = por %p3618_p12, %p3617_p11 }
  0x22   :  { %p3620_p0 = pnand %p3619_p13, %p3613_p10 }
  0x24   :  { %3623 = shalt.err (!%p3620_p0)
}
  0x25   :  { %91 = dma.hbm_to_vmem [thread:$0]  %s6002_s7, 1024, %s86_s27, [#allocation13], %s3777_s20, %s3777_s20, %s3778_s21  }
  0x26   :  { %s3781_s15 = smov [#allocation15]   ;;  %s3782_s17 = smov [#allocation3]  }
  0x27   :  { %s108_s16 = sshll.u32 %s3781_s15, 4  ;;  %s27_s18 = sshll.u32 %s3782_s17, 4  ;;  %s109_s16 = int_to_ptr.vmem [resolvable:$true] %s108_s16  ;;  %s28_s18 = int_to_ptr.vmem [resolvable:$true] %s27_s18 }
  0x28   :  { %s3632_s19 = scalar_lea.vmem %s109_s16, 16  ;;  %s3636_s3 = scalar_lea.vmem %s109_s16, 32 }
  0x29   :  { %p3633_p1 = scmp.ne.s32.totalorder %s109_s16, %s3632_s19  ;;  %p3637_p2 = scmp.lt.s32.totalorder %s109_s16, %s109_s16 }
  0x2a   :  { %p3638_p3 = scmp.lt.s32.totalorder %s3636_s3, %s3632_s19 }
  0x2c   :  { %p3639_p4 = por %p3638_p3, %p3637_p2 }
  0x2e   :  { %p3640_p5 = pnand %p3639_p4, %p3633_p1 }
  0x30   :  { %3643 = shalt.err (!%p3640_p5)
}
  0x31   :  { %111 = dma.hbm_to_vmem [thread:$0]  %s6004_s9, 16, %s109_s16, [#allocation16]  }
  0x32   :  { %s3652_s24 = scalar_lea.vmem %s28_s18, 4096  ;;  %p3657_p7 = scmp.lt.s32.totalorder %s28_s18, %s28_s18 }
  0x33   :  { %p3653_p6 = scmp.ne.s32.totalorder %s28_s18, %s3652_s24  ;;  %p3658_p8 = scmp.lt.s32.totalorder %s3652_s24, %s3652_s24 }
  0x35   :  { %p3659_p9 = por %p3658_p8, %p3657_p7 }
  0x37   :  { %p3660_p10 = pnand %p3659_p9, %p3653_p6 }
  0x39   :  { %3663 = shalt.err (!%p3660_p10)
}
  0x3a   :  { %s3783_s7 = smov 128   ;;  %s3784_s20 = smov 8  }
  0x3b   :  { %33 = dma.hbm_to_vmem [thread:$0]  %s5995_s0, 4096, %s28_s18, [#allocation4], %s3783_s7, %s3783_s7, %s3784_s20  }
  0x3c   :  { %s3785_s26 = smov [#allocation8]   ;;  %s3786_s9 = smov [#allocation11]  }
  0x3d   :  { %s52_s27 = sshll.u32 %s3785_s26, 4  ;;  %s72_s28 = sshll.u32 %s3786_s9, 4  ;;  %s53_s27 = int_to_ptr.vmem [resolvable:$true] %s52_s27  ;;  %s73_s28 = int_to_ptr.vmem [resolvable:$true] %s72_s28 }
  0x3e   :  { %s3672_s29 = scalar_lea.vmem %s53_s27, 16  ;;  %s3676_s30 = scalar_lea.vmem %s53_s27, 32 }
  0x3f   :  { %p3673_p11 = scmp.ne.s32.totalorder %s53_s27, %s3672_s29  ;;  %p3677_p12 = scmp.lt.s32.totalorder %s53_s27, %s53_s27 }
  0x40   :  { %p3678_p13 = scmp.lt.s32.totalorder %s3676_s30, %s3672_s29 }
  0x42   :  { %p3679_p0 = por %p3678_p13, %p3677_p12 }
  0x44   :  { %p3680_p1 = pnand %p3679_p0, %p3673_p11 }
  0x46   :  { %3683 = shalt.err (!%p3680_p1)
}
  0x47   :  { %55 = dma.hbm_to_vmem [thread:$0]  %s5997_s2, 16, %s53_s27, [#allocation7]  }
  0x48   :  { %s3692_s1 = scalar_lea.vmem %s73_s28, 16  ;;  %s3696_s0 = scalar_lea.vmem %s73_s28, 32 }
  0x49   :  { %p3693_p2 = scmp.ne.s32.totalorder %s73_s28, %s3692_s1  ;;  %p3697_p3 = scmp.lt.s32.totalorder %s73_s28, %s73_s28 }
  0x4a   :  { %p3698_p4 = scmp.lt.s32.totalorder %s3696_s0, %s3692_s1 }
  0x4c   :  { %p3699_p5 = por %p3698_p4, %p3697_p3 }
  0x4e   :  { %p3700_p6 = pnand %p3699_p5, %p3693_p2 }
  0x50   :  { %3703 = shalt.err (!%p3700_p6)
}
  0x51   :  { %75 = dma.hbm_to_vmem [thread:$0]  %s5999_s4, 16, %s73_s28, [#allocation10]  }
  0x52   :  { %s3787_s16 = smov [#allocation14]   ;;  %s3788_s18 = smov [#allocation17]  }
  0x53   :  { %s98_s17 = sshll.u32 %s3787_s16, 4  ;;  %s118_s19 = sshll.u32 %s3788_s18, 4  ;;  %s99_s17 = int_to_ptr.vmem [resolvable:$true] %s98_s17  ;;  %s119_s19 = int_to_ptr.vmem [resolvable:$true] %s118_s19 }
  0x54   :  { %s3712_s3 = scalar_lea.vmem %s99_s17, 16  ;;  %s3716_s2 = scalar_lea.vmem %s99_s17, 32 }
  0x55   :  { %p3713_p7 = scmp.ne.s32.totalorder %s99_s17, %s3712_s3  ;;  %p3717_p8 = scmp.lt.s32.totalorder %s99_s17, %s99_s17 }
  0x56   :  { %p3718_p9 = scmp.lt.s32.totalorder %s3716_s2, %s3712_s3 }
  0x58   :  { %p3719_p10 = por %p3718_p9, %p3717_p8 }
  0x5a   :  { %p3720_p11 = pnand %p3719_p10, %p3713_p7 }
  0x5c   :  { %3723 = shalt.err (!%p3720_p11)
}
  0x5d   :  { %101 = dma.hbm_to_vmem [thread:$0]  %s6003_s8, 16, %s99_s17, [#allocation13]  }
  0x5e   :  { %s3732_s24 = scalar_lea.vmem %s119_s19, 16  ;;  %s3736_s4 = scalar_lea.vmem %s119_s19, 32 }
  0x5f   :  { %p3733_p12 = scmp.ne.s32.totalorder %s119_s19, %s3732_s24  ;;  %p3737_p13 = scmp.lt.s32.totalorder %s119_s19, %s119_s19 }
  0x60   :  { %p3738_p0 = scmp.lt.s32.totalorder %s3736_s4, %s3732_s24 }
  0x62   :  { %p3739_p1 = por %p3738_p0, %p3737_p13 }
  0x64   :  { %p3740_p2 = pnand %p3739_p1, %p3733_p12 }
  0x66   :  { %3743 = shalt.err (!%p3740_p2)
}
  0x67   :  { %121 = dma.hbm_to_vmem [thread:$0]  %s6005_s10, 16, %s119_s19, [#allocation16]  }
  0x68   :  { %3764 = dma.done.wait [#allocation4], 4096  }
  0x69   :  { %3765 = vsyncadd [#allocation4], 4294963200 }
  0x6a   :  { %3766 = dma.done.wait [#allocation7], 1040  }
  0x6b   :  { %3767 = vsyncadd [#allocation7], 4294966256 }
  0x6c   :  { %3768 = dma.done.wait [#allocation10], 32  }
  0x6d   :  { %3769 = vsyncadd [#allocation10], 4294967264 }
  0x6e   :  { %3770 = dma.done.wait [#allocation13], 1040  }
  0x6f   :  { %3771 = vsyncadd [#allocation13], 4294966256 }
  0x70   :  { %3772 = dma.done.wait [#allocation16], 32  }
  0x71   :  { %3773 = vsyncadd [#allocation16], 4294967264  ;;  %v3398_v0 = vld [vmem:[#allocation6 + $0x38] sm:$0xff]   ;;  %v3399_v1 = vld [vmem:[#allocation6 + $0x30] sm:$0xff]   ;;  %v3789_v56 = vmov 0.0   ;;  %v687_v57 = vlaneseq }
  0x72   :  { %3287 = vmatprep.subr.bf16.mxu0 %v3398_v0  ;;  %v3400_v2 = vld [vmem:[#allocation6 + $0x28] sm:$0xff]   ;;  %v3401_v3 = vld [vmem:[#allocation6 + $0x20] sm:$0xff]   ;;  %v3402_v7 = vld [vmem:[#allocation6 + $0x18] sm:$0xff]   ;;  %438 = vst [vmem:[#allocation2 + $0x20] sm:$0xff] %v3789_v56 }
  0x73   :  { %3288 = vmatpush3.bf16.msra.mxu0 %v3398_v0  ;;  %v150_v4 = vld [vmem:[#allocation3] sm:$0xff]  ;;  %v151_v5 = vld [vmem:[#allocation3 + $0x8] sm:$0xff]  ;;  %v3403_v8 = vld [vmem:[#allocation6 + $0x10] sm:$0xff]   ;;  %439 = vst [vmem:[#allocation2 + $0x28] sm:$0x3f] %v3789_v56  ;;  %v3995_v59 = vshrl.u32 %v687_v57, 7 }
  0x74   :  { %3289 = vmatprep.subr.bf16.mxu0 %v3399_v1  ;;  %v182_v6 = vpack.c.bf16 %v151_v5, %v150_v4  ;;  %v3404_v9 = vld [vmem:[#allocation6 + $0x8] sm:$0xff]   ;;  %v3405_v10 = vld [vmem:[#allocation6] sm:$0xff]   ;;  %v152_v11 = vld [vmem:[#allocation3 + $0x10] sm:$0xff]  ;;  %444 = vst [vmem:[#allocation2 + $0x50] sm:$0xff] %v3789_v56 }
  0x75   :  { %v153_v12 = vld [vmem:[#allocation3 + $0x18] sm:$0xff]  ;;  %v154_v13 = vld [vmem:[#allocation3 + $0x20] sm:$0xff]  ;;  %v155_v14 = vld [vmem:[#allocation3 + $0x28] sm:$0xff]  ;;  %445 = vst [vmem:[#allocation2 + $0x58] sm:$0x3f] %v3789_v56  ;;  %v4002_v63 = vsub.s32 0, %v3995_v59 }
  0x76   :  { %3303 = vmatprep.mubr.bf16.mxu0 %v182_v6  ;;  %v183_v15 = vpack.c.bf16 %v153_v12, %v152_v11  ;;  %v184_v16 = vpack.c.bf16 %v155_v14, %v154_v13  ;;  %v156_v17 = vld [vmem:[#allocation3 + $0x30] sm:$0xff]  ;;  %v157_v18 = vld [vmem:[#allocation3 + $0x38] sm:$0xff]  ;;  %v158_v19 = vld [vmem:[#allocation3 + $0x40] sm:$0xff]  ;;  %434 = vst [vmem:[#allocation2] sm:$0xff] %v3789_v56 }
  0x77   :  { %3290 = vmatpush3.bf16.msra.mxu0 %v3399_v1  ;;  %v159_v20 = vld [vmem:[#allocation3 + $0x48] sm:$0xff]  ;;  %v185_v21 = vpack.c.bf16 %v157_v18, %v156_v17  ;;  %v160_v23 = vld [vmem:[#allocation3 + $0x50] sm:$0xff]  ;;  %v161_v24 = vld [vmem:[#allocation3 + $0x58] sm:$0xff]  ;;  %435 = vst [vmem:[#allocation2 + $0x8] sm:$0x3f] %v3789_v56  ;;  %v890_v17 = vsub.s32 1, %v3995_v59 }
  0x78   :  { %3291 = vmatprep.subr.bf16.mxu0 %v3400_v2  ;;  %v186_v22 = vpack.c.bf16 %v159_v20, %v158_v19  ;;  %v162_v25 = vld [vmem:[#allocation3 + $0x60] sm:$0xff]  ;;  %v163_v26 = vld [vmem:[#allocation3 + $0x68] sm:$0xff]  ;;  %v187_v27 = vpack.c.bf16 %v161_v24, %v160_v23  ;;  %v164_v29 = vld [vmem:[#allocation3 + $0x70] sm:$0xff]  ;;  %436 = vst [vmem:[#allocation2 + $0x10] sm:$0xff] %v3789_v56  ;;  %v1091_v18 = vsub.s32 2, %v3995_v59 }
  0x79   :  { %v188_v28 = vpack.c.bf16 %v163_v26, %v162_v25  ;;  %v165_v30 = vld [vmem:[#allocation3 + $0x78] sm:$0xff]  ;;  %v166_v31 = vld [vmem:[#allocation3 + $0x80] sm:$0xff]  ;;  %v167_v32 = vld [vmem:[#allocation3 + $0x88] sm:$0xff]  ;;  %437 = vst [vmem:[#allocation2 + $0x18] sm:$0x3f] %v3789_v56  ;;  %v1292_v26 = vsub.s32 3, %v3995_v59 }
  0x7a   :  { %v189_v33 = vpack.c.bf16 %v165_v30, %v164_v29  ;;  %v190_v34 = vpack.c.bf16 %v167_v32, %v166_v31  ;;  %v168_v35 = vld [vmem:[#allocation3 + $0x90] sm:$0xff]  ;;  %v169_v36 = vld [vmem:[#allocation3 + $0x98] sm:$0xff]  ;;  %v170_v37 = vld [vmem:[#allocation3 + $0xa0] sm:$0xff]  ;;  %440 = vst [vmem:[#allocation2 + $0x30] sm:$0xff] %v3789_v56 }
  0x7b   :  { %3292 = vmatpush3.bf16.msra.mxu0 %v3400_v2  ;;  %v171_v38 = vld [vmem:[#allocation3 + $0xa8] sm:$0xff]  ;;  %v191_v39 = vpack.c.bf16 %v169_v36, %v168_v35  ;;  %v172_v41 = vld [vmem:[#allocation3 + $0xb0] sm:$0xff]  ;;  %v173_v42 = vld [vmem:[#allocation3 + $0xb8] sm:$0xff]  ;;  %441 = vst [vmem:[#allocation2 + $0x38] sm:$0x3f] %v3789_v56 }
  0x7c   :  { %3293 = vmatprep.subr.bf16.mxu0 %v3401_v3  ;;  %v192_v40 = vpack.c.bf16 %v171_v38, %v170_v37  ;;  %v174_v43 = vld [vmem:[#allocation3 + $0xc0] sm:$0xff]  ;;  %v175_v44 = vld [vmem:[#allocation3 + $0xc8] sm:$0xff]  ;;  %v193_v45 = vpack.c.bf16 %v173_v42, %v172_v41  ;;  %v176_v47 = vld [vmem:[#allocation3 + $0xd0] sm:$0xff]  ;;  %442 = vst [vmem:[#allocation2 + $0x40] sm:$0xff] %v3789_v56 }
  0x7d   :  { %v194_v46 = vpack.c.bf16 %v175_v44, %v174_v43  ;;  %v177_v48 = vld [vmem:[#allocation3 + $0xd8] sm:$0xff]  ;;  %v178_v49 = vld [vmem:[#allocation3 + $0xe0] sm:$0xff]  ;;  %v179_v50 = vld [vmem:[#allocation3 + $0xe8] sm:$0xff]  ;;  %443 = vst [vmem:[#allocation2 + $0x48] sm:$0x3f] %v3789_v56 }
  0x7e   :  { %v195_v51 = vpack.c.bf16 %v177_v48, %v176_v47  ;;  %v196_v52 = vpack.c.bf16 %v179_v50, %v178_v49  ;;  %v180_v53 = vld [vmem:[#allocation3 + $0xf0] sm:$0xff]  ;;  %v181_v54 = vld [vmem:[#allocation3 + $0xf8] sm:$0xff]  ;;  %446 = vst [vmem:[#allocation2 + $0x60] sm:$0xff] %v3789_v56  ;;  %447 = vst [vmem:[#allocation2 + $0x68] sm:$0x3f] %v3789_v56 }
  0x7f   :  { %3294 = vmatpush3.bf16.msra.mxu0 %v3401_v3  ;;  %v197_v55 = vpack.c.bf16 %v181_v54, %v180_v53  ;;  %448 = vst [vmem:[#allocation2 + $0x70] sm:$0xff] %v3789_v56  ;;  %449 = vst [vmem:[#allocation2 + $0x78] sm:$0x3f] %v3789_v56  ;;  %v3993_v58 = vld [vmem:[#allocation8] ss:$0 sm:$0xff]  ;;  %v4066_v35 = vld [vmem:[#allocation2 + $0x23] sm:$0xff] }
  0x80   :  { %3295 = vmatprep.subr.bf16.mxu0 %v3402_v7  ;;  %450 = vst [vmem:[#allocation2 + $0x80] sm:$0xff] %v3789_v56  ;;  %451 = vst [vmem:[#allocation2 + $0x88] sm:$0x3f] %v3789_v56  ;;  %v4008_v1 = vld [vmem:[%s6000_s5] sm:$0x3f]  ;;  %v856_v14 = vld [vmem:[#allocation2 + $0x13] sm:$0xff] }
  0x81   :  { %452 = vst [vmem:[#allocation2 + $0x90] sm:$0xff] %v3789_v56  ;;  %453 = vst [vmem:[#allocation2 + $0x98] sm:$0x3f] %v3789_v56  ;;  %v4013_v4 = vld [vmem:[#allocation9] ss:$0 sm:$0xff]  ;;  %v4017_v6 = vrot.slane %v4008_v1, %v4002_v63  ;;  %v4060_v32 = vrot.slane %v4008_v1, %v890_v17 }
  0x82   :  { %454 = vst [vmem:[#allocation2 + $0xa0] sm:$0xff] %v3789_v56  ;;  %455 = vst [vmem:[#allocation2 + $0xa8] sm:$0x3f] %v3789_v56 }
  0x83   :  { %3296 = vmatpush3.bf16.msra.mxu0 %v3402_v7  ;;  %456 = vst [vmem:[#allocation2 + $0xb0] sm:$0xff] %v3789_v56  ;;  %457 = vst [vmem:[#allocation2 + $0xb8] sm:$0x3f] %v3789_v56  ;;  %v692_v25 = vmul.f32 %v856_v14, %v4017_v6  ;;  %v893_v43 = vmul.f32 %v4060_v32, %v4066_v35 }
  0x84   :  { %3297 = vmatprep.subr.bf16.mxu0 %v3403_v8  ;;  %458 = vst [vmem:[#allocation2 + $0xc0] sm:$0xff] %v3789_v56  ;;  %459 = vst [vmem:[#allocation2 + $0xc8] sm:$0x3f] %v3789_v56 }
  0x85   :  { %460 = vst [vmem:[#allocation2 + $0xd0] sm:$0xff] %v3789_v56  ;;  %461 = vst [vmem:[#allocation2 + $0xd8] sm:$0x3f] %v3789_v56 }
  0x86   :  { %462 = vst [vmem:[#allocation2 + $0xe0] sm:$0xff] %v3789_v56  ;;  %463 = vst [vmem:[#allocation2 + $0xe8] sm:$0x3f] %v3789_v56 }
  0x87   :  { %3298 = vmatpush3.bf16.msra.mxu0 %v3403_v8  ;;  %464 = vst [vmem:[#allocation2 + $0xf0] sm:$0xff] %v3789_v56  ;;  %465 = vst [vmem:[#allocation2 + $0xf8] sm:$0x3f] %v3789_v56 }
  0x88   :  { %3299 = vmatprep.subr.bf16.mxu0 %v3404_v9  ;;  %466 = vst [vmem:[#allocation2 + $0x100] sm:$0xff] %v3789_v56  ;;  %467 = vst [vmem:[#allocation2 + $0x108] sm:$0x3f] %v3789_v56 }
  0x89   :  { %468 = vst [vmem:[#allocation2 + $0x110] sm:$0xff] %v3789_v56  ;;  %469 = vst [vmem:[#allocation2 + $0x118] sm:$0x3f] %v3789_v56 }
  0x8a   :  { %470 = vst [vmem:[#allocation2 + $0x120] sm:$0xff] %v3789_v56  ;;  %471 = vst [vmem:[#allocation2 + $0x128] sm:$0x3f] %v3789_v56 }
  0x8b   :  { %3300 = vmatpush3.bf16.msra.mxu0 %v3404_v9  ;;  %472 = vst [vmem:[#allocation2 + $0x130] sm:$0xff] %v3789_v56  ;;  %473 = vst [vmem:[#allocation2 + $0x138] sm:$0x3f] %v3789_v56  ;;  %v4023_v9 = vld [vmem:[#allocation11] ss:$0 sm:$0xff] }
  0x8c   :  { %3301 = vmatprep.subr.bf16.mxu0 %v3405_v10  ;;  %474 = vst [vmem:[#allocation2 + $0x140] sm:$0xff] %v3789_v56  ;;  %475 = vst [vmem:[#allocation2 + $0x148] sm:$0x3f] %v3789_v56 }
  0x8d   :  { %476 = vst [vmem:[#allocation2 + $0x150] sm:$0xff] %v3789_v56  ;;  %477 = vst [vmem:[#allocation2 + $0x158] sm:$0x3f] %v3789_v56 }
  0x8e   :  { %478 = vst [vmem:[#allocation2 + $0x160] sm:$0xff] %v3789_v56  ;;  %479 = vst [vmem:[#allocation2 + $0x168] sm:$0x3f] %v3789_v56 }
  0x8f   :  { %3302 = vmatpush3.bf16.msra.mxu0 %v3405_v10  ;;  %480 = vst [vmem:[#allocation2 + $0x170] sm:$0xff] %v3789_v56  ;;  %481 = vst [vmem:[#allocation2 + $0x178] sm:$0x3f] %v3789_v56 }
  0x90   :  { %482 = vst [vmem:[#allocation2 + $0x180] sm:$0xff] %v3789_v56  ;;  %483 = vst [vmem:[#allocation2 + $0x188] sm:$0x3f] %v3789_v56 }
  0x91   :  { %484 = vst [vmem:[#allocation2 + $0x190] sm:$0xff] %v3789_v56  ;;  %485 = vst [vmem:[#allocation2 + $0x198] sm:$0x3f] %v3789_v56 }
  0x92   :  { %3304 = vmatmul.mubr.bf16.vlgmr.msra.gmra.mxu0 %v183_v15  ;;  %486 = vst [vmem:[#allocation2 + $0x1a0] sm:$0xff] %v3789_v56  ;;  %487 = vst [vmem:[#allocation2 + $0x1a8] sm:$0x3f] %v3789_v56 }
  0x93   :  { %3307 = vmatprep.mubr.bf16.mxu0 %v184_v16  ;;  %488 = vst [vmem:[#allocation2 + $0x1b0] sm:$0xff] %v3789_v56  ;;  %489 = vst [vmem:[#allocation2 + $0x1b8] sm:$0x3f] %v3789_v56 }
  0x94   :  { %490 = vst [vmem:[#allocation2 + $0x1c0] sm:$0xff] %v3789_v56  ;;  %491 = vst [vmem:[#allocation2 + $0x1c8] sm:$0x3f] %v3789_v56 }
  0x95   :  { %492 = vst [vmem:[#allocation2 + $0x1d0] sm:$0xff] %v3789_v56  ;;  %493 = vst [vmem:[#allocation2 + $0x1d8] sm:$0x3f] %v3789_v56 }
  0x96   :  { %494 = vst [vmem:[#allocation2 + $0x1e0] sm:$0xff] %v3789_v56  ;;  %495 = vst [vmem:[#allocation2 + $0x1e8] sm:$0x3f] %v3789_v56 }
  0x97   :  { %496 = vst [vmem:[#allocation2 + $0x1f0] sm:$0xff] %v3789_v56  ;;  %497 = vst [vmem:[#allocation2 + $0x1f8] sm:$0x3f] %v3789_v56 }
  0x98   :  { %498 = vst [vmem:[#allocation2 + $0x200] sm:$0xff] %v3789_v56  ;;  %499 = vst [vmem:[#allocation2 + $0x208] sm:$0x3f] %v3789_v56 }
  0x99   :  { %500 = vst [vmem:[#allocation2 + $0x210] sm:$0xff] %v3789_v56  ;;  %501 = vst [vmem:[#allocation2 + $0x218] sm:$0x3f] %v3789_v56 }
  0x9a   :  { %3308 = vmatmul.mubr.bf16.gmra.mxu0 %v185_v21  ;;  %502 = vst [vmem:[#allocation2 + $0x220] sm:$0xff] %v3789_v56  ;;  %503 = vst [vmem:[#allocation2 + $0x228] sm:$0x3f] %v3789_v56  ;;  %v4041_v21 = vld [vmem:[%s6001_s6] sm:$0x3f] }
  0x9b   :  { %3311 = vmatprep.mubr.bf16.mxu0 %v186_v22  ;;  %504 = vst [vmem:[#allocation2 + $0x230] sm:$0xff] %v3789_v56  ;;  %505 = vst [vmem:[#allocation2 + $0x238] sm:$0x3f] %v3789_v56  ;;  %v4057_v31 = vrot.slane %v4041_v21, %v4002_v63  ;;  %v4077_v49 = vrot.slane %v4041_v21, %v890_v17  ;;  %v4080_v50 = vrot.slane %v4041_v21, %v1091_v18 }
  0x9c   :  { %506 = vst [vmem:[#allocation2 + $0x240] sm:$0xff] %v3789_v56  ;;  %507 = vst [vmem:[#allocation2 + $0x248] sm:$0x3f] %v3789_v56 }
  0x9d   :  { %508 = vst [vmem:[#allocation2 + $0x250] sm:$0xff] %v3789_v56  ;;  %509 = vst [vmem:[#allocation2 + $0x258] sm:$0x3f] %v3789_v56 }
  0x9e   :  { %510 = vst [vmem:[#allocation2 + $0x260] sm:$0xff] %v3789_v56  ;;  %511 = vst [vmem:[#allocation2 + $0x268] sm:$0x3f] %v3789_v56 }
  0x9f   :  { %512 = vst [vmem:[#allocation2 + $0x270] sm:$0xff] %v3789_v56  ;;  %513 = vst [vmem:[#allocation2 + $0x278] sm:$0x3f] %v3789_v56 }
  0xa0   :  { %514 = vst [vmem:[#allocation2 + $0x280] sm:$0xff] %v3789_v56  ;;  %515 = vst [vmem:[#allocation2 + $0x288] sm:$0x3f] %v3789_v56 }
  0xa1   :  { %516 = vst [vmem:[#allocation2 + $0x290] sm:$0xff] %v3789_v56  ;;  %517 = vst [vmem:[#allocation2 + $0x298] sm:$0x3f] %v3789_v56 }
  0xa2   :  { %3312 = vmatmul.mubr.bf16.gmra.mxu0 %v187_v27  ;;  %518 = vst [vmem:[#allocation2 + $0x2a0] sm:$0xff] %v3789_v56  ;;  %519 = vst [vmem:[#allocation2 + $0x2a8] sm:$0x3f] %v3789_v56 }
  0xa3   :  { %3315 = vmatprep.mubr.bf16.mxu0 %v188_v28  ;;  %520 = vst [vmem:[#allocation2 + $0x2b0] sm:$0xff] %v3789_v56  ;;  %521 = vst [vmem:[#allocation2 + $0x2b8] sm:$0x3f] %v3789_v56 }
  0xa4   :  { %522 = vst [vmem:[#allocation2 + $0x2c0] sm:$0xff] %v3789_v56  ;;  %523 = vst [vmem:[#allocation2 + $0x2c8] sm:$0x3f] %v3789_v56 }
  0xa5   :  { %524 = vst [vmem:[#allocation2 + $0x2d0] sm:$0xff] %v3789_v56  ;;  %525 = vst [vmem:[#allocation2 + $0x2d8] sm:$0x3f] %v3789_v56 }
  0xa6   :  { %526 = vst [vmem:[#allocation2 + $0x2e0] sm:$0xff] %v3789_v56  ;;  %527 = vst [vmem:[#allocation2 + $0x2e8] sm:$0x3f] %v3789_v56 }
  0xa7   :  { %528 = vst [vmem:[#allocation2 + $0x2f0] sm:$0xff] %v3789_v56  ;;  %529 = vst [vmem:[#allocation2 + $0x2f8] sm:$0x3f] %v3789_v56 }
  0xa8   :  { %530 = vst [vmem:[#allocation2 + $0x300] sm:$0xff] %v3789_v56  ;;  %531 = vst [vmem:[#allocation2 + $0x308] sm:$0x3f] %v3789_v56 }
  0xa9   :  { %532 = vst [vmem:[#allocation2 + $0x310] sm:$0xff] %v3789_v56  ;;  %533 = vst [vmem:[#allocation2 + $0x318] sm:$0x3f] %v3789_v56 }
  0xaa   :  { %3316 = vmatmul.mubr.bf16.gmra.mxu0 %v189_v33  ;;  %534 = vst [vmem:[#allocation2 + $0x320] sm:$0xff] %v3789_v56  ;;  %535 = vst [vmem:[#allocation2 + $0x328] sm:$0x3f] %v3789_v56  ;;  %v4063_v33 = vrot.slane %v4008_v1, %v1091_v18 }
  0xab   :  { %3319 = vmatprep.mubr.bf16.mxu0 %v190_v34  ;;  %536 = vst [vmem:[#allocation2 + $0x330] sm:$0xff] %v3789_v56  ;;  %537 = vst [vmem:[#allocation2 + $0x338] sm:$0x3f] %v3789_v56 }
  0xac   :  { %538 = vst [vmem:[#allocation2 + $0x340] sm:$0xff] %v3789_v56  ;;  %539 = vst [vmem:[#allocation2 + $0x348] sm:$0x3f] %v3789_v56 }
  0xad   :  { %540 = vst [vmem:[#allocation2 + $0x350] sm:$0xff] %v3789_v56  ;;  %541 = vst [vmem:[#allocation2 + $0x358] sm:$0x3f] %v3789_v56 }
  0xae   :  { %542 = vst [vmem:[#allocation2 + $0x360] sm:$0xff] %v3789_v56  ;;  %543 = vst [vmem:[#allocation2 + $0x368] sm:$0x3f] %v3789_v56 }
  0xaf   :  { %544 = vst [vmem:[#allocation2 + $0x370] sm:$0xff] %v3789_v56  ;;  %545 = vst [vmem:[#allocation2 + $0x378] sm:$0x3f] %v3789_v56 }
  0xb0   :  { %6011 = vst [vmem:[#allocation25_spill] sm:$0xff] %v4002_v63 }
  0xb2   :  { %3320 = vmatmul.mubr.bf16.gmra.mxu0 %v191_v39 }
  0xb3   :  { %3323 = vmatprep.mubr.bf16.mxu0 %v192_v40 }
  0xba   :  { %3324 = vmatmul.mubr.bf16.gmra.mxu0 %v193_v45 }
  0xbb   :  { %3327 = vmatprep.mubr.bf16.mxu0 %v194_v46 }
  0xc2   :  { %3328 = vmatmul.mubr.bf16.gmra.mxu0 %v195_v51 }
  0xc3   :  { %3331 = vmatprep.mubr.bf16.mxu0 %v196_v52  ;;  %v4085_v52 = vrot.slane %v4008_v1, %v1292_v26 }
  0xc5   :  { %6012 = vst [vmem:[#allocation26_spill] sm:$0xff] %v4085_v52 }
  0xca   :  { %3332 = vmatmul.mubr.bf16.gmra.mxu0 %v197_v55 }
 0x152   :  { %v3305_v60 = vpop.f32.mrf.mxu0 }
 0x153   :  { %v3998_v61 = vadd.f32 %v3305_v60, %v3993_v58 }
 0x154   :  { %v303_v62 = vpop.f32.mrf.mxu0 }
 0x155   :  { %549 = vst [vmem:[#allocation2 + $0x53] sm:$0xff] %v3998_v61  ;;  %v304_v0 = vadd.f32 %v3993_v58, %v303_v62  ;;  %v896_v60 = vmul.f32 %v4060_v32, %v3998_v61 }
 0x156   :  { %v3306_v2 = vpop.f32.mrf.mxu0 }
 0x157   :  { %547 = vst [vmem:[#allocation2 + $0x33] sm:$0xff] %v304_v0  ;;  %v4011_v3 = vadd.f32 %v3306_v2, %v3993_v58  ;;  %v694_v12 = vmul.f32 %v4017_v6, %v304_v0  ;;  %v1094_v54 = vmul.f32 %v4063_v33, %v304_v0  ;;  %v696_v2 = vmul.f32 %v4017_v6, %v3998_v61 }
 0x158   :  { %v306_v5 = vpop.f32.mrf.mxu0 }
 0x159   :  { %550 = vst [vmem:[#allocation2 + $0x63] sm:$0xff] %v4011_v3  ;;  %v588_v7 = vmul.f32 %v4013_v4, %v4011_v3  ;;  %v307_v8 = vadd.f32 %v3993_v58, %v306_v5  ;;  %v697_v28 = vmul.f32 %v4017_v6, %v4011_v3 }
 0x15a   :  { %v3309_v10 = vpop.f32.mrf.mxu0 }
 0x15b   :  { %v626_v11 = vadd.f32 %v4023_v9, %v588_v7  ;;  %548 = vst [vmem:[#allocation2 + $0x43] sm:$0xff] %v307_v8  ;;  %v586_v13 = vmul.f32 %v4013_v4, %v307_v8  ;;  %v4029_v15 = vadd.f32 %v3309_v10, %v3993_v58  ;;  %v695_v39 = vmul.f32 %v4017_v6, %v307_v8 }
 0x15c   :  { %v319_v16 = vpop.f32.mrf.mxu0 }
 0x15d   :  { %v4033_v19 = vadd.f32 %v694_v12, %v626_v11  ;;  %v4036_v20 = vadd.f32 %v3993_v58, %v319_v16  ;;  %553 = vst [vmem:[#allocation2 + $0x93] sm:$0xff] %v4029_v15  ;;  %v591_v22 = vmul.f32 %v4013_v4, %v4029_v15  ;;  %v624_v24 = vadd.f32 %v4023_v9, %v586_v13 }
 0x15e   :  { %v3310_v23 = vpop.f32.mrf.mxu0 }
 0x15f   :  { %551 = vst [vmem:[#allocation2 + $0x73] sm:$0xff] %v4036_v20  ;;  %v629_v27 = vadd.f32 %v4023_v9, %v591_v22  ;;  %v589_v29 = vmul.f32 %v4013_v4, %v4036_v20  ;;  %v331_v34 = vadd.f32 %v3310_v23, %v3993_v58  ;;  %v724_v41 = vadd.f32 %v692_v25, %v624_v24 }
 0x160   :  { %v322_v30 = vpop.f32.mrf.mxu0  ;;  %v898_v12 = vmul.f32 %v4060_v32, %v4036_v20  ;;  %v698_v13 = vmul.f32 %v4017_v6, %v4036_v20 }
 0x161   :  { %v729_v37 = vadd.f32 %v697_v28, %v629_v27  ;;  %v627_v38 = vadd.f32 %v4023_v9, %v589_v29  ;;  %v323_v40 = vadd.f32 %v3993_v58, %v322_v30  ;;  %554 = vst [vmem:[#allocation2 + $0xa3] sm:$0xff] %v331_v34  ;;  %v592_v47 = vmul.f32 %v4013_v4, %v331_v34 }
 0x162   :  { %v756_v36 = vld [vmem:[#allocation2 + $0x40] sm:$0xff]  ;;  %v3313_v44 = vpop.f32.mrf.mxu0 }
 0x163   :  { %v792_v42 = vmul.f32 %v4057_v31, %v756_v36  ;;  %v957_v45 = vld [vmem:[#allocation2 + $0x41] sm:$0xff]  ;;  %v727_v46 = vadd.f32 %v695_v39, %v627_v38  ;;  %552 = vst [vmem:[#allocation2 + $0x83] sm:$0xff] %v323_v40  ;;  %v590_v48 = vmul.f32 %v4013_v4, %v323_v40  ;;  %v630_v10 = vadd.f32 %v4023_v9, %v592_v47 }
 0x164   :  { %v761_v53 = vld [vmem:[#allocation2 + $0x90] sm:$0xff]  ;;  %v1158_v55 = vld [vmem:[#allocation2 + $0x42] sm:$0xff]  ;;  %v993_v7 = vmul.f32 %v4077_v49, %v957_v45  ;;  %v335_v11 = vpop.f32.mrf.mxu0  ;;  %v4106_v27 = vadd.f32 %v3313_v44, %v3993_v58  ;;  %v1295_v39 = vmul.f32 %v4085_v52, %v3998_v61  ;;  %v899_v47 = vmul.f32 %v4060_v32, %v323_v40 }
 0x165   :  { %v824_v51 = vadd.f32 %v792_v42, %v724_v41  ;;  %v797_v56 = vmul.f32 %v4057_v31, %v761_v53  ;;  %v628_v14 = vadd.f32 %v4023_v9, %v590_v48  ;;  %v1194_v17 = vmul.f32 %v4080_v50, %v1158_v55 }
 0x166   :  { %v759_v57 = vld [vmem:[#allocation2 + $0x70] sm:$0xff]  ;;  %v4109_v28 = vadd.f32 %v3993_v58, %v335_v11  ;;  %v730_v34 = vadd.f32 %v698_v13, %v630_v10  ;;  %v3314_v38 = vpop.f32.mrf.mxu0  ;;  %v1097_v41 = vmul.f32 %v4063_v33, %v4011_v3  ;;  %557 = vst [vmem:[#allocation2 + $0x133] sm:$0xff] %v4106_v27  ;;  %v897_v53 = vmul.f32 %v4060_v32, %v4011_v3 }
 0x167   :  { %v960_v62 = vld [vmem:[#allocation2 + $0x71] sm:$0xff]  ;;  %v925_v5 = vadd.f32 %v893_v43, %v824_v51  ;;  %v795_v8 = vmul.f32 %v4057_v31, %v759_v57  ;;  %v829_v0 = vadd.f32 %v797_v56, %v729_v37  ;;  %v728_v25 = vadd.f32 %v696_v2, %v628_v14  ;;  %v4122_v51 = vld [vmem:[#allocation2 + $0x103] sm:$0xff] }
 0x168   :  { %v996_v22 = vmul.f32 %v4077_v49, %v960_v62  ;;  %v762_v24 = vld [vmem:[#allocation2 + $0xa0] sm:$0xff]  ;;  %v595_v43 = vmul.f32 %v4013_v4, %v4106_v27  ;;  %555 = vst [vmem:[#allocation2 + $0x113] sm:$0xff] %v4109_v28  ;;  %v338_v57 = vpop.f32.mrf.mxu0  ;;  %v701_v40 = vmul.f32 %v4017_v6, %v4122_v51 }
 0x169   :  { %v1025_v16 = vadd.f32 %v993_v7, %v925_v5  ;;  %v827_v18 = vadd.f32 %v795_v8, %v727_v46  ;;  %v4103_v23 = vadd.f32 %v898_v12, %v829_v0  ;;  %v798_v36 = vmul.f32 %v4057_v31, %v762_v24  ;;  %v4152_v24 = vld [vmem:[#allocation2 + $0xf3] sm:$0xff] }
 0x16a   :  { %v760_v37 = vld [vmem:[#allocation2 + $0x80] sm:$0xff]  ;;  %v633_v2 = vadd.f32 %v4023_v9, %v595_v43  ;;  %v4137_v7 = vadd.f32 %v3314_v38, %v3993_v58  ;;  %v1098_v8 = vmul.f32 %v4063_v33, %v4036_v20  ;;  %v4142_v10 = vadd.f32 %v3993_v58, %v338_v57 }
 0x16b   :  { %6013 = vst [vmem:[#allocation27_spill] sm:$0xff] %v4103_v23  ;;  %v1126_v29 = vadd.f32 %v1094_v54, %v1025_v16  ;;  %v928_v30 = vadd.f32 %v896_v60, %v827_v18  ;;  %v796_v42 = vmul.f32 %v4057_v31, %v760_v37  ;;  %v830_v46 = vadd.f32 %v798_v36, %v730_v34  ;;  %v961_v48 = vld [vmem:[#allocation2 + $0x81] sm:$0xff]  ;;  %v3317_v36 = vpop.f32.mrf.mxu0 }
 0x16c   :  { %v997_v62 = vmul.f32 %v4077_v49, %v961_v48  ;;  %v1162_v5 = vld [vmem:[#allocation2 + $0x82] sm:$0xff]  ;;  %558 = vst [vmem:[#allocation2 + $0x143] sm:$0xff] %v4137_v7  ;;  %v596_v0 = vmul.f32 %v4013_v4, %v4137_v7  ;;  %v733_v14 = vadd.f32 %v701_v40, %v633_v2  ;;  %556 = vst [vmem:[#allocation2 + $0x123] sm:$0xff] %v4142_v10 }
 0x16d   :  { %v1226_v44 = vadd.f32 %v1194_v17, %v1126_v29  ;;  %v1028_v45 = vadd.f32 %v996_v22, %v928_v30  ;;  %v828_v61 = vadd.f32 %v796_v42, %v728_v25  ;;  %v4130_v56 = vadd.f32 %v899_v47, %v830_v46  ;;  %v765_v11 = vld [vmem:[#allocation2 + $0x130] sm:$0xff]  ;;  %v351_v57 = vpop.f32.mrf.mxu0 }
 0x16e   :  { %v1198_v13 = vmul.f32 %v4080_v50, %v1162_v5  ;;  %v801_v16 = vmul.f32 %v4057_v31, %v765_v11  ;;  %v966_v17 = vld [vmem:[#allocation2 + $0x131] sm:$0xff]  ;;  %v1299_v20 = vmul.f32 %v4085_v52, %v4029_v15  ;;  %v902_v25 = vmul.f32 %v4060_v32, %v4109_v28 }
 0x16f   :  { %v4126_v54 = vadd.f32 %v1295_v39, %v1226_v44  ;;  %v4128_v55 = vadd.f32 %v1097_v41, %v1028_v45  ;;  %v929_v60 = vadd.f32 %v897_v53, %v828_v61  ;;  %v634_v29 = vadd.f32 %v4023_v9, %v596_v0 }
 0x170   :  { %v833_v22 = vadd.f32 %v801_v16, %v733_v14  ;;  %v702_v30 = vmul.f32 %v4017_v6, %v4109_v28  ;;  %v594_v34 = vmul.f32 %v4013_v4, %v4142_v10  ;;  %v1002_v38 = vmul.f32 %v4077_v49, %v966_v17  ;;  %v3318_v14 = vpop.f32.mrf.mxu0 }
 0x171   :  { %6014 = vst [vmem:[#allocation28_spill] sm:$0xff] %v4126_v54  ;;  %6015 = vst [vmem:[#allocation29_spill] sm:$0xff] %v4128_v55  ;;  %v1029_v3 = vadd.f32 %v997_v62, %v929_v60  ;;  %v700_v42 = vmul.f32 %v4152_v24, %v4017_v6  ;;  %v4168_v45 = vadd.f32 %v3317_v36, %v3993_v58 }
 0x172   :  { %v934_v15 = vadd.f32 %v902_v25, %v833_v22  ;;  %v734_v39 = vadd.f32 %v702_v30, %v634_v29  ;;  %v632_v41 = vadd.f32 %v4023_v9, %v594_v34  ;;  %v901_v61 = vmul.f32 %v4060_v32, %v4122_v51 }
 0x173   :  { %v1130_v12 = vadd.f32 %v1098_v8, %v1029_v3  ;;  %v766_v43 = vld [vmem:[#allocation2 + $0x140] sm:$0xff]  ;;  %v1103_v53 = vmul.f32 %v4063_v33, %v4142_v10  ;;  %561 = vst [vmem:[#allocation2 + $0x173] sm:$0xff] %v4168_v45  ;;  %v903_v40 = vmul.f32 %v4060_v32, %v4142_v10  ;;  %v1104_v16 = vmul.f32 %v4063_v33, %v4106_v27 }
 0x174   :  { %v1034_v44 = vadd.f32 %v1002_v38, %v934_v15  ;;  %v802_v46 = vmul.f32 %v4057_v31, %v766_v43  ;;  %v967_v47 = vld [vmem:[#allocation2 + $0x141] sm:$0xff]  ;;  %v732_v62 = vadd.f32 %v700_v42, %v632_v41  ;;  %v705_v30 = vmul.f32 %v4017_v6, %v4137_v7 }
 0x175   :  { %v1230_v18 = vadd.f32 %v1198_v13, %v1130_v12  ;;  %v764_v48 = vld [vmem:[#allocation2 + $0x120] sm:$0xff]  ;;  %v1003_v8 = vmul.f32 %v4077_v49, %v967_v47  ;;  %v6007_v12 = vsub.s32 4, %v3995_v59  ;;  %v599_v13 = vmul.f32 %v4013_v4, %v4168_v45 }
 0x176   :  { %v834_v60 = vadd.f32 %v802_v46, %v734_v39  ;;  %v800_v2 = vmul.f32 %v4057_v31, %v764_v48  ;;  %v965_v5 = vld [vmem:[#allocation2 + $0x121] sm:$0xff]  ;;  %v4179_v3 = vadd.f32 %v1103_v53, %v1034_v44  ;;  %v4192_v34 = vadd.f32 %v3993_v58, %v351_v57 }
 0x177   :  { %v4161_v37 = vadd.f32 %v1299_v20, %v1230_v18  ;;  %v1168_v17 = vld [vmem:[#allocation2 + $0x142] sm:$0xff]  ;;  %v1001_v20 = vmul.f32 %v4077_v49, %v965_v5  ;;  %v637_v29 = vadd.f32 %v4023_v9, %v599_v13  ;;  %v1102_v38 = vmul.f32 %v4063_v33, %v4109_v28 }
 0x178   :  { %6016 = vst [vmem:[#allocation30_spill] sm:$0xff] %v4179_v3  ;;  %v832_v11 = vadd.f32 %v800_v2, %v732_v62  ;;  %v935_v0 = vadd.f32 %v903_v40, %v834_v60  ;;  %v1166_v25 = vld [vmem:[#allocation2 + $0x122] sm:$0xff]  ;;  %v4197_v41 = vadd.f32 %v3318_v14, %v3993_v58  ;;  %v1204_v42 = vmul.f32 %v4080_v50, %v1168_v17 }
 0x179   :  { %v737_v43 = vadd.f32 %v705_v30, %v637_v29  ;;  %559 = vst [vmem:[#allocation2 + $0x153] sm:$0xff] %v4192_v34  ;;  %v4205_v46 = vrot.slane %v4041_v21, %v1292_v26  ;;  %v4210_v47 = vrot.slane %v4008_v1, %v6007_v12  ;;  %v1367_v53 = vld [vmem:[#allocation2 + $0x124] sm:$0xff]  ;;  %v597_v60 = vmul.f32 %v4013_v4, %v4192_v34 }
 0x17a   :  { %v933_v18 = vadd.f32 %v901_v61, %v832_v11  ;;  %v1035_v22 = vadd.f32 %v1003_v8, %v935_v0  ;;  %v769_v15 = vld [vmem:[#allocation2 + $0x170] sm:$0xff]  ;;  %v1202_v61 = vmul.f32 %v4080_v50, %v1166_v25  ;;  %562 = vst [vmem:[#allocation2 + $0x183] sm:$0xff] %v4197_v41  ;;  %v906_v62 = vmul.f32 %v4060_v32, %v4192_v34  ;;  %v354_v11 = vpop.f32.mrf.mxu0 }
 0x17b   :  { %v805_v44 = vmul.f32 %v4057_v31, %v769_v15  ;;  %v1303_v40 = vmul.f32 %v4085_v52, %v4106_v27  ;;  %v1305_v5 = vmul.f32 %v4085_v52, %v4192_v34  ;;  %v600_v8 = vmul.f32 %v4013_v4, %v4197_v41  ;;  %v970_v25 = vld [vmem:[#allocation2 + $0x171] sm:$0xff] }
 0x17c   :  { %v1033_v36 = vadd.f32 %v1001_v20, %v933_v18  ;;  %v1136_v39 = vadd.f32 %v1104_v16, %v1035_v22  ;;  %v1403_v0 = vmul.f32 %v4205_v46, %v1367_v53  ;;  %v635_v13 = vadd.f32 %v4023_v9, %v597_v60 }
 0x17d   :  { %v837_v57 = vadd.f32 %v805_v44, %v737_v43  ;;  %v703_v14 = vmul.f32 %v4017_v6, %v4142_v10  ;;  %v638_v20 = vadd.f32 %v4023_v9, %v600_v8  ;;  %v706_v22 = vmul.f32 %v4017_v6, %v4192_v34  ;;  %v3321_v44 = vpop.f32.mrf.mxu0  ;;  %v3407_v8 = vld [vmem:[#allocation12 + $0x30] sm:$0xff]  }
 0x17e   :  { %v1134_v48 = vadd.f32 %v1102_v38, %v1033_v36  ;;  %v1236_v26 = vadd.f32 %v1204_v42, %v1136_v39  ;;  %v355_v30 = vadd.f32 %v3993_v58, %v354_v11  ;;  %v1504_v38 = vmul.f32 %v4210_v47, %v4137_v7  ;;  %v1171_v11 = vld [vmem:[#allocation2 + $0x172] sm:$0xff] }
 0x17f   :  { %v938_v16 = vadd.f32 %v906_v62, %v837_v57  ;;  %v735_v29 = vadd.f32 %v703_v14, %v635_v13  ;;  %v738_v39 = vadd.f32 %v706_v22, %v638_v20  ;;  %v904_v60 = vmul.f32 %v4060_v32, %v4106_v27  ;;  %v367_v20 = vpop.f32.mrf.mxu0 }
 0x180   :  { %v1234_v2 = vadd.f32 %v1202_v61, %v1134_v48  ;;  %v4228_v18 = vadd.f32 %v1305_v5, %v1236_v26  ;;  %v767_v15 = vld [vmem:[#allocation2 + $0x150] sm:$0xff]  ;;  %560 = vst [vmem:[#allocation2 + $0x163] sm:$0xff] %v355_v30  ;;  %v598_v43 = vmul.f32 %v4013_v4, %v355_v30  ;;  %v1006_v61 = vmul.f32 %v4077_v49, %v970_v25  ;;  %v3406_v5 = vld [vmem:[#allocation12 + $0x38] sm:$0xff]  }
 0x181   :  { %v803_v10 = vmul.f32 %v4057_v31, %v767_v15  ;;  %v968_v42 = vld [vmem:[#allocation2 + $0x151] sm:$0xff]  ;;  %v770_v53 = vld [vmem:[#allocation2 + $0x180] sm:$0xff]  ;;  %v1108_v22 = vmul.f32 %v4063_v33, %v4168_v45  ;;  %v1105_v25 = vmul.f32 %v4063_v33, %v4137_v7  ;;  %3335 = vmatprep.subr.bf16.mxu1 %v3406_v5 }
 0x182   :  { %v1335_v17 = vadd.f32 %v1303_v40, %v1234_v2  ;;  %6017 = vst [vmem:[#allocation31_spill] sm:$0xff] %v4228_v18  ;;  %v806_v62 = vmul.f32 %v4057_v31, %v770_v53  ;;  %v1004_v26 = vmul.f32 %v4077_v49, %v968_v42  ;;  %v971_v2 = vld [vmem:[#allocation2 + $0x181] sm:$0xff]  ;;  %v1038_v40 = vadd.f32 %v1006_v61, %v938_v16 }
 0x183   :  { %v835_v57 = vadd.f32 %v803_v10, %v735_v29  ;;  %v636_v14 = vadd.f32 %v4023_v9, %v598_v43  ;;  %v1107_v29 = vmul.f32 %v4063_v33, %v355_v30  ;;  %3336 = vmatpush3.bf16.msra.mxu1 %v3406_v5  ;;  %v4257_v43 = vadd.f32 %v3321_v44, %v3993_v58 }
 0x184   :  { %v1435_v36 = vadd.f32 %v1403_v0, %v1335_v17  ;;  %v838_v13 = vadd.f32 %v806_v62, %v738_v39  ;;  %v907_v17 = vmul.f32 %v4060_v32, %v355_v30  ;;  %v1207_v39 = vmul.f32 %v4080_v50, %v1171_v11  ;;  %3337 = vmatprep.subr.bf16.mxu1 %v3407_v8  ;;  %v3408_v30 = vld [vmem:[#allocation12 + $0x28] sm:$0xff]   ;;  %v3322_v62 = vpop.f32.mrf.mxu0 }
 0x185   :  { %v936_v0 = vadd.f32 %v904_v60, %v835_v57  ;;  %v1139_v42 = vadd.f32 %v1107_v29, %v1038_v40  ;;  %v4260_v61 = vadd.f32 %v3993_v58, %v367_v20  ;;  %565 = vst [vmem:[#allocation2 + $0x213] sm:$0xff] %v4257_v43  ;;  %v905_v5 = vmul.f32 %v4060_v32, %v4137_v7  ;;  %v671_v29 = vld [vmem:[#allocation2 + $0x1c3] sm:$0xff] }
 0x186   :  { %v4238_v48 = vadd.f32 %v1504_v38, %v1435_v36  ;;  %v1007_v36 = vmul.f32 %v4077_v49, %v971_v2  ;;  %v704_v38 = vmul.f32 %v4017_v6, %v4106_v27  ;;  %v939_v15 = vadd.f32 %v907_v17, %v838_v13  ;;  %v3409_v17 = vld [vmem:[#allocation12 + $0x20] sm:$0xff]  }
 0x187   :  { %v1036_v16 = vadd.f32 %v1004_v26, %v936_v0  ;;  %v768_v10 = vld [vmem:[#allocation2 + $0x160] sm:$0xff]  ;;  %v1308_v26 = vmul.f32 %v4085_v52, %v4197_v41  ;;  %v1239_v40 = vadd.f32 %v1207_v39, %v1139_v42  ;;  %563 = vst [vmem:[#allocation2 + $0x1f3] sm:$0xff] %v4260_v61  ;;  %3338 = vmatpush3.bf16.msra.mxu1 %v3407_v8 }
 0x188   :  { %6018 = vst [vmem:[#allocation32_spill] sm:$0xff] %v4238_v48  ;;  %v736_v57 = vadd.f32 %v704_v38, %v636_v14  ;;  %v804_v60 = vmul.f32 %v4057_v31, %v768_v10  ;;  %v1039_v27 = vadd.f32 %v1007_v36, %v939_v15  ;;  %v969_v2 = vld [vmem:[#allocation2 + $0x161] sm:$0xff]  ;;  %v603_v14 = vmul.f32 %v4013_v4, %v4257_v43 }
 0x189   :  { %v4262_v53 = vadd.f32 %v1105_v25, %v1036_v16  ;;  %v4273_v0 = vld [vmem:[#allocation2 + $0x1e3] sm:$0xff]  ;;  %v4275_v13 = vadd.f32 %v1308_v26, %v1239_v40  ;;  %3339 = vmatprep.subr.bf16.mxu1 %v3408_v30  ;;  %v1005_v25 = vmul.f32 %v4077_v49, %v969_v2  ;;  %v370_v16 = vpop.f32.mrf.mxu0  ;;  %v601_v8 = vmul.f32 %v4013_v4, %v4260_v61 }
 0x18a   :  { %v836_v44 = vadd.f32 %v804_v60, %v736_v57  ;;  %v4271_v11 = vadd.f32 %v1108_v22, %v1039_v27  ;;  %v1170_v36 = vld [vmem:[#allocation2 + $0x162] sm:$0xff]  ;;  %v641_v7 = vadd.f32 %v4023_v9, %v603_v14  ;;  %v709_v22 = vmul.f32 %v4017_v6, %v4273_v0 }
 0x18b   :  { %6019 = vst [vmem:[#allocation33_spill] sm:$0xff] %v4262_v53  ;;  %6021 = vst [vmem:[#allocation35_spill] sm:$0xff] %v4275_v13  ;;  %v1106_v15 = vmul.f32 %v4063_v33, %v4192_v34  ;;  %v4288_v39 = vadd.f32 %v3322_v62, %v3993_v58  ;;  %3340 = vmatpush3.bf16.msra.mxu1 %v3408_v30  ;;  %v639_v10 = vadd.f32 %v4023_v9, %v601_v8  ;;  %v3410_v60 = vld [vmem:[#allocation12 + $0x18] sm:$0xff]   ;;  %v872_v30 = vld [vmem:[#allocation2 + $0x1d3] sm:$0xff] }
 0x18c   :  { %6020 = vst [vmem:[#allocation34_spill] sm:$0xff] %v4271_v11  ;;  %v937_v20 = vadd.f32 %v905_v5, %v836_v44  ;;  %v707_v42 = vmul.f32 %v4017_v6, %v671_v29  ;;  %v4293_v57 = vadd.f32 %v3993_v58, %v370_v16  ;;  %3341 = vmatprep.subr.bf16.mxu1 %v3409_v17  ;;  %v773_v2 = vld [vmem:[#allocation2 + $0x210] sm:$0xff]  ;;  %v1371_v34 = vld [vmem:[#allocation2 + $0x164] sm:$0xff] }
 0x18d   :  { %v1206_v26 = vmul.f32 %v4080_v50, %v1170_v36  ;;  %566 = vst [vmem:[#allocation2 + $0x223] sm:$0xff] %v4288_v39  ;;  %v741_v40 = vadd.f32 %v709_v22, %v641_v7  ;;  %v809_v62 = vmul.f32 %v4057_v31, %v773_v2  ;;  %v604_v44 = vmul.f32 %v4013_v4, %v4288_v39  ;;  %v3411_v8 = vld [vmem:[#allocation12 + $0x10] sm:$0xff]  }
 0x18e   :  { %v1037_v38 = vadd.f32 %v1005_v25, %v937_v20  ;;  %564 = vst [vmem:[#allocation2 + $0x203] sm:$0xff] %v4293_v57  ;;  %v1307_v14 = vmul.f32 %v4085_v52, %v4168_v45  ;;  %v974_v20 = vld [vmem:[#allocation2 + $0x211] sm:$0xff]  ;;  %v908_v29 = vmul.f32 %v4060_v32, %v872_v30  ;;  %v739_v36 = vadd.f32 %v707_v42, %v639_v10 }
 0x18f   :  { %v771_v25 = vld [vmem:[#allocation2 + $0x1f0] sm:$0xff]  ;;  %3342 = vmatpush3.bf16.msra.mxu1 %v3409_v17  ;;  %v841_v16 = vadd.f32 %v809_v62, %v741_v40  ;;  %v910_v22 = vmul.f32 %v4060_v32, %v4260_v61  ;;  %v710_v45 = vmul.f32 %v4017_v6, %v4260_v61  ;;  %v642_v10 = vadd.f32 %v4023_v9, %v604_v44 }
 0x190   :  { %v1138_v27 = vadd.f32 %v1106_v15, %v1037_v38  ;;  %v807_v7 = vmul.f32 %v4057_v31, %v771_v25  ;;  %3343 = vmatprep.subr.bf16.mxu1 %v3410_v60  ;;  %v1407_v15 = vmul.f32 %v4205_v46, %v1371_v34  ;;  %v1508_v40 = vmul.f32 %v4210_v47, %v4197_v41 }
 0x191   :  { %v942_v17 = vadd.f32 %v910_v22, %v841_v16  ;;  %v1109_v62 = vmul.f32 %v4063_v33, %v4273_v0  ;;  %v602_v34 = vmul.f32 %v4013_v4, %v4293_v57  ;;  %v742_v25 = vadd.f32 %v710_v45, %v642_v10  ;;  %v3412_v16 = vld [vmem:[#allocation12 + $0x8] sm:$0xff]  }
 0x192   :  { %v1238_v5 = vadd.f32 %v1206_v26, %v1138_v27  ;;  %v972_v27 = vld [vmem:[#allocation2 + $0x1f1] sm:$0xff]  ;;  %v1010_v26 = vmul.f32 %v4077_v49, %v974_v20  ;;  %v839_v2 = vadd.f32 %v807_v7, %v739_v36  ;;  %v708_v22 = vmul.f32 %v872_v30, %v4017_v6 }
 0x193   :  { %3344 = vmatpush3.bf16.msra.mxu1 %v3410_v60  ;;  %v1173_v7 = vld [vmem:[#allocation2 + $0x1f2] sm:$0xff]  ;;  %v1111_v60 = vmul.f32 %v4063_v33, %v4293_v57  ;;  %v1310_v12 = vmul.f32 %v4085_v52, %v4293_v57 }
 0x194   :  { %v1339_v38 = vadd.f32 %v1307_v14, %v1238_v5  ;;  %v940_v5 = vadd.f32 %v908_v29, %v839_v2  ;;  %v1008_v14 = vmul.f32 %v4077_v49, %v972_v27  ;;  %v774_v20 = vld [vmem:[#allocation2 + $0x220] sm:$0xff]  ;;  %v1042_v36 = vadd.f32 %v1010_v26, %v942_v17  ;;  %3345 = vmatprep.subr.bf16.mxu1 %v3411_v8  ;;  %v3325_v29 = vpop.f32.mrf.mxu0 }
 0x195   :  { %v810_v41 = vmul.f32 %v4057_v31, %v774_v20  ;;  %v640_v27 = vadd.f32 %v4023_v9, %v602_v34  ;;  %v911_v26 = vmul.f32 %v4060_v32, %v4293_v57  ;;  %v1209_v10 = vmul.f32 %v4080_v50, %v1173_v7  ;;  %v1174_v63 = vld [vmem:[#allocation2 + $0x202] sm:$0xff] }
 0x196   :  { %v1439_v42 = vadd.f32 %v1407_v15, %v1339_v38  ;;  %v1040_v38 = vadd.f32 %v1008_v14, %v940_v5  ;;  %v772_v15 = vld [vmem:[#allocation2 + $0x200] sm:$0xff]  ;;  %v1143_v30 = vadd.f32 %v1111_v60, %v1042_v36  ;;  %v1175_v5 = vld [vmem:[#allocation2 + $0x212] sm:$0xff]  ;;  %v1511_v36 = vmul.f32 %v4210_v47, %v4257_v43 }
 0x197   :  { %v842_v2 = vadd.f32 %v810_v41, %v742_v25  ;;  %v808_v45 = vmul.f32 %v4057_v31, %v772_v15  ;;  %3346 = vmatpush3.bf16.msra.mxu1 %v3411_v8  ;;  %v1374_v14 = vld [vmem:[#allocation2 + $0x1f4] sm:$0xff]  ;;  %v740_v20 = vadd.f32 %v708_v22, %v640_v27  ;;  %v909_v25 = vmul.f32 %v4060_v32, %v4273_v0  ;;  %v973_v15 = vld [vmem:[#allocation2 + $0x201] sm:$0xff]  ;;  %v383_v8 = vpop.f32.mrf.mxu0 }
 0x198   :  { %v4319_v44 = vadd.f32 %v1508_v40, %v1439_v42  ;;  %v1141_v17 = vadd.f32 %v1109_v62, %v1040_v38  ;;  %v975_v42 = vld [vmem:[#allocation2 + $0x221] sm:$0xff]  ;;  %3347 = vmatprep.subr.bf16.mxu1 %v3412_v16  ;;  %v1112_v62 = vmul.f32 %v4063_v33, %v4257_v43  ;;  %v1211_v22 = vmul.f32 %v4080_v50, %v1175_v5  ;;  %v1376_v5 = vld [vmem:[#allocation2 + $0x214] sm:$0xff] }
 0x199   :  { %v3413_v40 = vld [vmem:[#allocation12] sm:$0xff]   ;;  %v943_v34 = vadd.f32 %v911_v26, %v842_v2  ;;  %v1011_v7 = vmul.f32 %v4077_v49, %v975_v42  ;;  %v840_v38 = vadd.f32 %v808_v45, %v740_v20  ;;  %v1410_v0 = vmul.f32 %v4205_v46, %v1374_v14 }
 0x19a   :  { %6022 = vst [vmem:[#allocation36_spill] sm:$0xff] %v4319_v44  ;;  %v1241_v41 = vadd.f32 %v1209_v10, %v1141_v17  ;;  %v1176_v60 = vld [vmem:[#allocation2 + $0x222] sm:$0xff]  ;;  %v4342_v27 = vadd.f32 %v3325_v29, %v3993_v58  ;;  %v1009_v17 = vmul.f32 %v4077_v49, %v973_v15  ;;  %v4346_v44 = vadd.f32 %v3993_v58, %v383_v8  ;;  %v3326_v29 = vpop.f32.mrf.mxu0 }
 0x19b   :  { %3348 = vmatpush3.bf16.msra.mxu1 %v3412_v16  ;;  %v941_v26 = vadd.f32 %v909_v25, %v840_v38  ;;  %v1043_v10 = vadd.f32 %v1011_v7, %v943_v34  ;;  %v1312_v16 = vmul.f32 %v4085_v52, %v4288_v39  ;;  %v1243_v45 = vadd.f32 %v1211_v22, %v1143_v30 }
 0x19c   :  { %v1342_v2 = vadd.f32 %v1310_v12, %v1241_v41  ;;  %3349 = vmatprep.subr.bf16.mxu1 %v3413_v40  ;;  %569 = vst [vmem:[#allocation2 + $0x253] sm:$0xff] %v4342_v27  ;;  %v607_v12 = vmul.f32 %v4013_v4, %v4342_v27  ;;  %v1212_v14 = vmul.f32 %v4080_v50, %v1176_v60  ;;  %567 = vst [vmem:[#allocation2 + $0x233] sm:$0xff] %v4346_v44 }
 0x19d   :  { %v1041_v20 = vadd.f32 %v1009_v17, %v941_v26  ;;  %v1110_v25 = vmul.f32 %v4063_v33, %v4260_v61  ;;  %v605_v34 = vmul.f32 %v4013_v4, %v4346_v44  ;;  %v1210_v30 = vmul.f32 %v4080_v50, %v1174_v63  ;;  %v1375_v63 = vld [vmem:[#allocation2 + $0x204] sm:$0xff] }
 0x19e   :  { %v1442_v42 = vadd.f32 %v1410_v0, %v1342_v2  ;;  %v645_v15 = vadd.f32 %v4023_v9, %v607_v12  ;;  %v713_v8 = vmul.f32 %v4017_v6, %v4288_v39  ;;  %v711_v61 = vmul.f32 %v4017_v6, %v4293_v57  ;;  %v386_v2 = vpop.f32.mrf.mxu0 }
 0x19f   :  { %3350 = vmatpush3.bf16.msra.mxu1 %v3413_v40  ;;  %v1142_v7 = vadd.f32 %v1110_v25, %v1041_v20  ;;  %v643_v38 = vadd.f32 %v4023_v9, %v605_v34  ;;  %v1144_v22 = vadd.f32 %v1112_v62, %v1043_v10  ;;  %v1412_v0 = vmul.f32 %v4205_v46, %v1376_v5 }
 0x1a0   :  { %v4360_v41 = vadd.f32 %v1511_v36, %v1442_v42  ;;  %v1311_v40 = vmul.f32 %v4085_v52, %v4257_v43  ;;  %v745_v36 = vadd.f32 %v713_v8, %v645_v15  ;;  %v1344_v60 = vadd.f32 %v1312_v16, %v1243_v45  ;;  %v1576_v15 = vld [vmem:[#allocation2 + $0x205] sm:$0xff] }
 0x1a1   :  { %v1242_v26 = vadd.f32 %v1210_v30, %v1142_v7  ;;  %v743_v17 = vadd.f32 %v711_v61, %v643_v38  ;;  %v1244_v42 = vadd.f32 %v1212_v14, %v1144_v22  ;;  %v1313_v12 = vmul.f32 %v4085_v52, %v4346_v44  ;;  %v1577_v14 = vld [vmem:[#allocation2 + $0x215] sm:$0xff]  ;;  %v1377_v30 = vld [vmem:[#allocation2 + $0x224] sm:$0xff] }
 0x1a2   :  { %6023 = vst [vmem:[#allocation37_spill] sm:$0xff] %v4360_v41  ;;  %v1444_v20 = vadd.f32 %v1412_v0, %v1344_v60  ;;  %v1513_v57 = vmul.f32 %v4210_v47, %v4346_v44  ;;  %v4376_v62 = vadd.f32 %v3326_v29, %v3993_v58  ;;  %v1411_v5 = vmul.f32 %v4205_v46, %v1375_v63 }
 0x1a3   :  { %v1343_v10 = vadd.f32 %v1311_v40, %v1242_v26  ;;  %v777_v25 = vld [vmem:[#allocation2 + $0x250] sm:$0xff]  ;;  %v4379_v34 = vadd.f32 %v1313_v12, %v1244_v42  ;;  %v4382_v16 = vadd.f32 %v3993_v58, %v386_v2  ;;  %v6009_v45 = vsub.s32 5, %v3995_v59 }
 0x1a4   :  { %v813_v8 = vmul.f32 %v4057_v31, %v777_v25  ;;  %v4386_v7 = vadd.f32 %v1513_v57, %v1444_v20  ;;  %570 = vst [vmem:[#allocation2 + $0x263] sm:$0xff] %v4376_v62  ;;  %v6024_v29 = vsub.s32 4, %v3995_v59  ;;  %v1512_v58 = vmul.f32 %v4210_v47, %v4288_v39  ;;  %v775_v22 = vld [vmem:[#allocation2 + $0x230] sm:$0xff] }
 0x1a5   :  { %v1443_v61 = vadd.f32 %v1411_v5, %v1343_v10  ;;  %568 = vst [vmem:[#allocation2 + $0x243] sm:$0xff] %v4382_v16  ;;  %v4400_v0 = vrot.slane %v4008_v1, %v6009_v45  ;;  %v978_v63 = vld [vmem:[#allocation2 + $0x251] sm:$0xff]  ;;  %v811_v60 = vmul.f32 %v4057_v31, %v775_v22  ;;  %v1413_v26 = vmul.f32 %v4205_v46, %v1377_v30 }
 0x1a6   :  { %v4392_v38 = vrot.slane %v4041_v21, %v6024_v29  ;;  %v845_v40 = vadd.f32 %v813_v8, %v745_v36  ;;  %v914_v21 = vmul.f32 %v4060_v32, %v4346_v44  ;;  %v976_v20 = vld [vmem:[#allocation2 + $0x231] sm:$0xff]  ;;  %v912_v1 = vmul.f32 %v4060_v32, %v4257_v43  ;;  %v1578_v8 = vld [vmem:[#allocation2 + $0x225] sm:$0xff] }
 0x1a7   :  { %v1544_v42 = vadd.f32 %v1512_v58, %v1443_v61  ;;  %v843_v57 = vadd.f32 %v811_v60, %v743_v17  ;;  %v608_v10 = vmul.f32 %v4013_v4, %v4376_v62  ;;  %v1014_v25 = vmul.f32 %v4077_v49, %v978_v63  ;;  %v1177_v29 = vld [vmem:[#allocation2 + $0x232] sm:$0xff] }
 0x1a8   :  { %v4406_v2 = vmul.f32 %v4392_v38, %v1577_v14  ;;  %v1612_v12 = vmul.f32 %v4392_v38, %v1576_v15  ;;  %v946_v36 = vadd.f32 %v914_v21, %v845_v40  ;;  %v1713_v14 = vmul.f32 %v4400_v0, %v4346_v44 }
 0x1a9   :  { %v606_v30 = vmul.f32 %v4013_v4, %v4382_v16  ;;  %v944_v15 = vadd.f32 %v912_v1, %v843_v57  ;;  %v1012_v17 = vmul.f32 %v4077_v49, %v976_v20  ;;  %v646_v61 = vadd.f32 %v4023_v9, %v608_v10  ;;  %v1378_v57 = vld [vmem:[#allocation2 + $0x234] sm:$0xff] }
 0x1aa   :  { %v1644_v5 = vadd.f32 %v1612_v12, %v1544_v42  ;;  %v714_v58 = vmul.f32 %v4017_v6, %v4346_v44  ;;  %v1113_v22 = vmul.f32 %v4063_v33, %v4288_v39  ;;  %v1046_v21 = vadd.f32 %v1014_v25, %v946_v36  ;;  %v1179_v42 = vld [vmem:[#allocation2 + $0x252] sm:$0xff] }
 0x1ab   :  { %v778_v63 = vld [vmem:[#allocation2 + $0x260] sm:$0xff]  ;;  %v644_v60 = vadd.f32 %v4023_v9, %v606_v30  ;;  %v1044_v12 = vadd.f32 %v1012_v17, %v944_v15  ;;  %v712_v10 = vmul.f32 %v4017_v6, %v4257_v43  ;;  %v1614_v45 = vmul.f32 %v4392_v38, %v1578_v8 }
 0x1ac   :  { %v4425_v40 = vadd.f32 %v1713_v14, %v1644_v5  ;;  %v746_v1 = vadd.f32 %v714_v58, %v646_v61  ;;  %v814_v20 = vmul.f32 %v4057_v31, %v778_v63  ;;  %v1116_v13 = vmul.f32 %v4063_v33, %v4342_v27  ;;  %v979_v14 = vld [vmem:[#allocation2 + $0x261] sm:$0xff]  ;;  %v3329_v58 = vpop.f32.mrf.mxu0 }
 0x1ad   :  { %v1213_v5 = vmul.f32 %v4080_v50, %v1177_v29  ;;  %v1115_v9 = vmul.f32 %v4063_v33, %v4382_v16  ;;  %v1145_v36 = vadd.f32 %v1113_v22, %v1044_v12  ;;  %v744_v30 = vadd.f32 %v712_v10, %v644_v60  ;;  %v977_v54 = vld [vmem:[#allocation2 + $0x241] sm:$0xff] }
 0x1ae   :  { %6025 = vst [vmem:[#allocation38_spill] sm:$0xff] %v4425_v40  ;;  %v776_v40 = vld [vmem:[#allocation2 + $0x240] sm:$0xff]  ;;  %v846_v25 = vadd.f32 %v814_v20, %v746_v1  ;;  %v915_v15 = vmul.f32 %v4060_v32, %v4382_v16  ;;  %v1215_v43 = vmul.f32 %v4080_v50, %v1179_v42  ;;  %v1414_v8 = vmul.f32 %v4205_v46, %v1378_v57 }
 0x1af   :  { %v812_v17 = vmul.f32 %v4057_v31, %v776_v40  ;;  %v1147_v61 = vadd.f32 %v1115_v9, %v1046_v21  ;;  %v1245_v29 = vadd.f32 %v1213_v5, %v1145_v36  ;;  %v1015_v63 = vmul.f32 %v4077_v49, %v979_v14  ;;  %v1579_v5 = vld [vmem:[#allocation2 + $0x235] sm:$0xff] }
 0x1b0   :  { %v947_v41 = vadd.f32 %v915_v15, %v846_v25  ;;  %v1314_v22 = vmul.f32 %v4085_v52, %v4382_v16  ;;  %v1316_v60 = vmul.f32 %v4085_v52, %v4376_v62  ;;  %v913_v42 = vmul.f32 %v4060_v32, %v4288_v39  ;;  %v399_v25 = vpop.f32.mrf.mxu0  ;;  %v1178_v39 = vld [vmem:[#allocation2 + $0x242] sm:$0xff] }
 0x1b1   :  { %v844_v12 = vadd.f32 %v812_v17, %v744_v30  ;;  %v1247_v57 = vadd.f32 %v1215_v43, %v1147_v61  ;;  %v1445_v21 = vadd.f32 %v1413_v26, %v4379_v34  ;;  %v1514_v20 = vmul.f32 %v4210_v47, %v4382_v16 }
 0x1b2   :  { %v1047_v1 = vadd.f32 %v1015_v63, %v947_v41  ;;  %v1346_v40 = vadd.f32 %v1314_v22, %v1245_v29  ;;  %v1515_v10 = vmul.f32 %v4210_v47, %v4342_v27  ;;  %v1013_v9 = vmul.f32 %v4077_v49, %v977_v54  ;;  %v4468_v63 = vld [vmem:[#allocation8] ss:$0 sm:$0xff] }
 0x1b3   :  { %v945_v14 = vadd.f32 %v913_v42, %v844_v12  ;;  %v4455_v36 = vadd.f32 %v1316_v60, %v1247_v57  ;;  %v1546_v15 = vadd.f32 %v1514_v20, %v1445_v21  ;;  %v1645_v34 = vadd.f32 %v4406_v2, %v4386_v7  ;;  %v1379_v12 = vld [vmem:[#allocation2 + $0x244] sm:$0xff]  ;;  %v3545_v20 = vld [vmem:[#allocation2 + $0x53] sm:$0xff] }
 0x1b4   :  { %v4457_v30 = vadd.f32 %v1116_v13, %v1047_v1  ;;  %v1446_v41 = vadd.f32 %v1414_v8, %v1346_v40  ;;  %v1715_v26 = vmul.f32 %v4400_v0, %v4342_v27  ;;  %v1114_v17 = vmul.f32 %v4063_v33, %v4346_v44  ;;  %v3330_v44 = vpop.f32.mrf.mxu0  ;;  %v4488_v40 = vld [vmem:[#allocation2 + $0x2c3] sm:$0xff] }
 0x1b5   :  { %6026 = vst [vmem:[#allocation39_spill] sm:$0xff] %v4455_v36  ;;  %v1045_v43 = vadd.f32 %v1013_v9, %v945_v14  ;;  %v1714_v54 = vmul.f32 %v4400_v0, %v4382_v16  ;;  %v1615_v61 = vmul.f32 %v4392_v38, %v1579_v5  ;;  %v1646_v29 = vadd.f32 %v1614_v45, %v1546_v15  ;;  %v655_v14 = vld [vmem:[#allocation2 + $0x3] sm:$0xff] }
 0x1b6   :  { %6027 = vst [vmem:[#allocation40_spill] sm:$0xff] %v4457_v30  ;;  %v1547_v13 = vadd.f32 %v1515_v10, %v1446_v41  ;;  %v4471_v8 = vadd.f32 %v4468_v63, %v3329_v58  ;;  %v1214_v2 = vmul.f32 %v4080_v50, %v1178_v39  ;;  %v4477_v60 = vadd.f32 %v4468_v63, %v399_v25  ;;  %v4493_v10 = vld [vmem:[#allocation9] ss:$0 sm:$0xff]  ;;  %v402_v39 = vpop.f32.mrf.mxu0  ;;  %v3547_v41 = vld [vmem:[#allocation2 + $0x33] sm:$0xff]  ;;  %v4498_v15 = vld [vmem:[#allocation11] ss:$0 sm:$0xff] }
 0x1b7   :  { %v1146_v7 = vadd.f32 %v1114_v17, %v1045_v43  ;;  %v4474_v22 = vadd.f32 %v1714_v54, %v1645_v34  ;;  %v1716_v16 = vmul.f32 %v4400_v0, %v4376_v62  ;;  %v4481_v45 = vadd.f32 %v1715_v26, %v1646_v29  ;;  %v755_v29 = vld [vmem:[#allocation2 + $0x30] sm:$0xff] }
 0x1b8   :  { %v1647_v42 = vadd.f32 %v1615_v61, %v1547_v13  ;;  %573 = vst [vmem:[#allocation2 + $0x2f3] sm:$0xff] %v4471_v8  ;;  %v611_v58 = vmul.f32 %v4013_v4, %v4471_v8  ;;  %v1315_v1 = vmul.f32 %v4085_v52, %v4342_v27  ;;  %571 = vst [vmem:[#allocation2 + $0x2d3] sm:$0xff] %v4477_v60  ;;  %v679_v4 = vld [vmem:[#allocation2 + $0x2a3] sm:$0xff] }
 0x1b9   :  { %6028 = vst [vmem:[#allocation41_spill] sm:$0xff] %v4474_v22  ;;  %6029 = vst [vmem:[#allocation42_spill] sm:$0xff] %v4481_v45  ;;  %v1246_v57 = vadd.f32 %v1214_v2, %v1146_v7  ;;  %v587_v5 = vmul.f32 %v4493_v10, %v3545_v20  ;;  %v1415_v25 = vmul.f32 %v4205_v46, %v1379_v12  ;;  %v663_v7 = vld [vmem:[#allocation2 + $0xe3] sm:$0xff] }
 0x1ba   :  { %v4491_v21 = vadd.f32 %v1716_v16, %v1647_v42  ;;  %v585_v27 = vmul.f32 %v3547_v41, %v4493_v10  ;;  %v649_v34 = vadd.f32 %v4498_v15, %v611_v58  ;;  %v717_v26 = vmul.f32 %v4017_v6, %v4488_v40  ;;  %v3549_v58 = vld [vmem:[#allocation2 + $0x13] sm:$0xff] }
 0x1bb   :  { %v1347_v9 = vadd.f32 %v1315_v1, %v1246_v57  ;;  %v693_v43 = vmul.f32 %v4017_v6, %v4066_v35  ;;  %v1516_v54 = vmul.f32 %v4210_v47, %v4376_v62  ;;  %v609_v61 = vmul.f32 %v4493_v10, %v4477_v60 }
 0x1bc   :  { %6030 = vst [vmem:[#allocation43_spill] sm:$0xff] %v4491_v21  ;;  %v691_v13 = vmul.f32 %v4017_v6, %v655_v14  ;;  %v715_v2 = vmul.f32 %v4017_v6, %v679_v4  ;;  %v4512_v16 = vadd.f32 %v4468_v63, %v3330_v44  ;;  %v4515_v12 = vadd.f32 %v4468_v63, %v402_v39  ;;  %v880_v4 = vld [vmem:[#allocation2 + $0x2b3] sm:$0xff] }
 0x1bd   :  { %v1447_v17 = vadd.f32 %v1415_v25, %v1347_v9  ;;  %v625_v42 = vadd.f32 %v4498_v15, %v587_v5  ;;  %v4519_v62 = vmul.f32 %v3549_v58, %v4060_v32  ;;  %v647_v20 = vadd.f32 %v4498_v15, %v609_v61 }
 0x1be   :  { %v623_v14 = vadd.f32 %v4498_v15, %v585_v27  ;;  %v4527_v44 = vmul.f32 %v4063_v33, %v4066_v35  ;;  %v749_v9 = vadd.f32 %v717_v26, %v649_v34  ;;  %574 = vst [vmem:[#allocation2 + $0x303] sm:$0xff] %v4512_v16  ;;  %572 = vst [vmem:[#allocation2 + $0x2e3] sm:$0xff] %v4515_v12  ;;  %v757_v34 = vld [vmem:[#allocation2 + $0x50] sm:$0xff] }
 0x1bf   :  { %v4521_v57 = vadd.f32 %v1516_v54, %v1447_v17  ;;  %v781_v1 = vld [vmem:[#allocation2 + $0x2f0] sm:$0xff]  ;;  %v791_v5 = vmul.f32 %v4057_v31, %v755_v29  ;;  %v4534_v39 = vmul.f32 %v4017_v6, %v663_v7  ;;  %v4538_v27 = vmul.f32 %v4060_v32, %v4152_v24 }
 0x1c0   :  { %6032 = vst [vmem:[#allocation45_spill] sm:$0xff] %v4527_v44  ;;  %v817_v25 = vmul.f32 %v4057_v31, %v781_v1  ;;  %v779_v17 = vld [vmem:[#allocation2 + $0x2d0] sm:$0xff]  ;;  %v916_v35 = vmul.f32 %v4060_v32, %v880_v4  ;;  %v747_v61 = vadd.f32 %v715_v2, %v647_v20  ;;  %v918_v1 = vmul.f32 %v4060_v32, %v4477_v60  ;;  %v758_v2 = vld [vmem:[#allocation2 + $0x60] sm:$0xff] }
 0x1c1   :  { %6031 = vst [vmem:[#allocation44_spill] sm:$0xff] %v4521_v57  ;;  %v982_v54 = vld [vmem:[#allocation2 + $0x2f1] sm:$0xff]  ;;  %v815_v58 = vmul.f32 %v4057_v31, %v779_v17  ;;  %v4544_v29 = vadd.f32 %v693_v43, %v625_v42  ;;  %v4548_v7 = vmul.f32 %v4063_v33, %v4122_v51  ;;  %v1117_v21 = vmul.f32 %v4063_v33, %v4488_v40 }
 0x1c2   :  { %v849_v26 = vadd.f32 %v817_v25, %v749_v9  ;;  %v980_v24 = vld [vmem:[#allocation2 + $0x2d1] sm:$0xff]  ;;  %v4553_v45 = vmul.f32 %v3547_v41, %v4060_v32  ;;  %v723_v9 = vadd.f32 %v691_v13, %v623_v14  ;;  %v593_v20 = vmul.f32 %v4493_v10, %v4109_v28 }
 0x1c3   :  { %6033 = vst [vmem:[#allocation46_spill] sm:$0xff] %v4548_v7  ;;  %v847_v25 = vadd.f32 %v815_v58, %v747_v61  ;;  %v4558_v43 = vmul.f32 %v4057_v31, %v757_v34  ;;  %v1018_v51 = vmul.f32 %v4077_v49, %v982_v54  ;;  %v612_v42 = vmul.f32 %v4493_v10, %v4512_v16  ;;  %v1181_v34 = vld [vmem:[#allocation2 + $0x2d2] sm:$0xff] }
 0x1c4   :  { %v950_v17 = vadd.f32 %v918_v1, %v849_v26  ;;  %v716_v22 = vmul.f32 %v880_v4, %v4017_v6  ;;  %v4564_v57 = vadd.f32 %v791_v5, %v723_v9  ;;  %v1016_v13 = vmul.f32 %v4077_v49, %v980_v24  ;;  %v3333_v24 = vpop.f32.mrf.mxu0  ;;  %v1183_v9 = vld [vmem:[#allocation2 + $0x2f2] sm:$0xff] }
 0x1c5   :  { %v948_v41 = vadd.f32 %v916_v35, %v847_v25  ;;  %v610_v28 = vmul.f32 %v4493_v10, %v4515_v12  ;;  %v4570_v14 = vmul.f32 %v4057_v31, %v758_v2  ;;  %v650_v26 = vadd.f32 %v4498_v15, %v612_v42  ;;  %v782_v61 = vld [vmem:[#allocation2 + $0x300] sm:$0xff]  ;;  %v1583_v48 = vld [vmem:[#allocation2 + $0x2d5] sm:$0xff] }
 0x1c6   :  { %v718_v54 = vmul.f32 %v4017_v6, %v4477_v60  ;;  %v1050_v58 = vadd.f32 %v1018_v51, %v950_v17  ;;  %v4576_v4 = vadd.f32 %v4498_v15, %v593_v20  ;;  %v1120_v5 = vmul.f32 %v4063_v33, %v4471_v8  ;;  %v780_v42 = vld [vmem:[#allocation2 + $0x2e0] sm:$0xff]  ;;  %v1384_v17 = vld [vmem:[#allocation2 + $0x2f4] sm:$0xff]  ;;  %v415_v53 = vpop.f32.mrf.mxu0 }
 0x1c7   :  { %v1048_v35 = vadd.f32 %v1016_v13, %v948_v41  ;;  %v818_v1 = vmul.f32 %v4057_v31, %v782_v61  ;;  %v1519_v2 = vmul.f32 %v4210_v47, %v4471_v8  ;;  %v917_v36 = vmul.f32 %v4060_v32, %v4488_v40  ;;  %v1382_v41 = vld [vmem:[#allocation2 + $0x2d4] sm:$0xff]  ;;  %v983_v13 = vld [vmem:[#allocation2 + $0x301] sm:$0xff] }
 0x1c8   :  { %v750_v25 = vadd.f32 %v718_v54, %v650_v26  ;;  %v1119_v20 = vmul.f32 %v4063_v33, %v4515_v12  ;;  %v1217_v30 = vmul.f32 %v4080_v50, %v1181_v34  ;;  %v648_v61 = vadd.f32 %v4498_v15, %v610_v28  ;;  %v981_v3 = vld [vmem:[#allocation2 + $0x2e1] sm:$0xff]  ;;  %v956_v7 = vld [vmem:[#allocation2 + $0x31] sm:$0xff] }
 0x1c9   :  { %v1149_v51 = vadd.f32 %v1117_v21, %v1048_v35  ;;  %v816_v11 = vmul.f32 %v4057_v31, %v780_v42  ;;  %v919_v26 = vmul.f32 %v4060_v32, %v4515_v12  ;;  %v1118_v40 = vmul.f32 %v4063_v33, %v4477_v60  ;;  %v1184_v60 = vld [vmem:[#allocation2 + $0x302] sm:$0xff] }
 0x1ca   :  { %v850_v18 = vadd.f32 %v818_v1, %v750_v25  ;;  %v1151_v54 = vadd.f32 %v1119_v20, %v1050_v58  ;;  %v1219_v55 = vmul.f32 %v4080_v50, %v1183_v9  ;;  %v748_v35 = vadd.f32 %v716_v22, %v648_v61  ;;  %v1182_v20 = vld [vmem:[#allocation2 + $0x2e2] sm:$0xff] }
 0x1cb   :  { %v1249_v21 = vadd.f32 %v1217_v30, %v1149_v51  ;;  %v1318_v34 = vmul.f32 %v4085_v52, %v4515_v12  ;;  %v1420_v28 = vmul.f32 %v4205_v46, %v1384_v17  ;;  %v1418_v42 = vmul.f32 %v4205_v46, %v1382_v41 }
 0x1cc   :  { %v1019_v1 = vmul.f32 %v4077_v49, %v983_v13  ;;  %v951_v25 = vadd.f32 %v919_v26, %v850_v18  ;;  %v1619_v23 = vmul.f32 %v4392_v38, %v1583_v48  ;;  %v848_v58 = vadd.f32 %v816_v11, %v748_v35  ;;  %v3334_v11 = vpop.f32.mrf.mxu0 }
 0x1cd   :  { %v1350_v9 = vadd.f32 %v1318_v34, %v1249_v21  ;;  %v4602_v30 = vadd.f32 %v4468_v63, %v3333_v24  ;;  %v1320_v22 = vmul.f32 %v4085_v52, %v4512_v16  ;;  %v1251_v17 = vadd.f32 %v1219_v55, %v1151_v54 }
 0x1ce   :  { %v1051_v51 = vadd.f32 %v1019_v1, %v951_v25  ;;  %v4607_v41 = vadd.f32 %v4468_v63, %v415_v53  ;;  %v949_v13 = vadd.f32 %v917_v36, %v848_v58  ;;  %v1017_v18 = vmul.f32 %v4077_v49, %v981_v3  ;;  %v763_v25 = vld [vmem:[#allocation2 + $0x110] sm:$0xff] }
 0x1cf   :  { %v1450_v61 = vadd.f32 %v1418_v42, %v1350_v9  ;;  %577 = vst [vmem:[#allocation2 + $0x333] sm:$0xff] %v4602_v30  ;;  %v615_v48 = vmul.f32 %v4493_v10, %v4602_v30  ;;  %v1220_v24 = vmul.f32 %v4080_v50, %v1184_v60  ;;  %v1720_v26 = vmul.f32 %v4400_v0, %v4512_v16 }
 0x1d0   :  { %v1218_v55 = vmul.f32 %v4080_v50, %v1182_v20  ;;  %575 = vst [vmem:[#allocation2 + $0x313] sm:$0xff] %v4607_v41  ;;  %v613_v53 = vmul.f32 %v4493_v10, %v4607_v41  ;;  %v1049_v3 = vadd.f32 %v1017_v18, %v949_v13  ;;  %v721_v21 = vmul.f32 %v4017_v6, %v4512_v16  ;;  %v1383_v13 = vld [vmem:[#allocation2 + $0x2e4] sm:$0xff] }
 0x1d1   :  { %v1551_v36 = vadd.f32 %v1519_v2, %v1450_v61  ;;  %v653_v54 = vadd.f32 %v4498_v15, %v615_v48  ;;  %v719_v34 = vmul.f32 %v4017_v6, %v4515_v12  ;;  %v1152_v42 = vadd.f32 %v1120_v5, %v1051_v51  ;;  %v418_v2 = vpop.f32.mrf.mxu0 }
 0x1d2   :  { %v651_v35 = vadd.f32 %v4498_v15, %v613_v53  ;;  %v1352_v1 = vadd.f32 %v1320_v22, %v1251_v17  ;;  %v1150_v60 = vadd.f32 %v1118_v40, %v1049_v3  ;;  %v1321_v9 = vmul.f32 %v4085_v52, %v4607_v41 }
 0x1d3   :  { %v1651_v58 = vadd.f32 %v1619_v23, %v1551_v36  ;;  %v753_v20 = vadd.f32 %v721_v21, %v653_v54  ;;  %v1252_v61 = vadd.f32 %v1220_v24, %v1152_v42  ;;  %v1521_v53 = vmul.f32 %v4210_v47, %v4607_v41  ;;  %v3550_v24 = vld [vmem:[#allocation2 + $0x43] sm:$0xff] }
 0x1d4   :  { %v751_v18 = vadd.f32 %v719_v34, %v651_v35  ;;  %v1452_v48 = vadd.f32 %v1420_v28, %v1352_v1  ;;  %v1250_v44 = vadd.f32 %v1218_v55, %v1150_v60  ;;  %v1319_v12 = vmul.f32 %v4085_v52, %v4471_v8  ;;  %v1584_v36 = vld [vmem:[#allocation2 + $0x2e5] sm:$0xff]  ;;  %v1585_v34 = vld [vmem:[#allocation2 + $0x2f5] sm:$0xff] }
 0x1d5   :  { %v4632_v5 = vadd.f32 %v1720_v26, %v1651_v58  ;;  %v4635_v23 = vadd.f32 %v4468_v63, %v3334_v11  ;;  %v799_v40 = vmul.f32 %v4057_v31, %v763_v25  ;;  %v4638_v51 = vadd.f32 %v1321_v9, %v1252_v61 }
 0x1d6   :  { %v785_v22 = vld [vmem:[#allocation2 + $0x330] sm:$0xff]  ;;  %v4640_v17 = vadd.f32 %v1521_v53, %v1452_v48  ;;  %v4643_v28 = vadd.f32 %v4468_v63, %v418_v2  ;;  %v4646_v55 = vmul.f32 %v3550_v24, %v4060_v32  ;;  %v1351_v3 = vadd.f32 %v1319_v12, %v1250_v44 }
 0x1d7   :  { %6034 = vst [vmem:[#allocation47_spill] sm:$0xff] %v4632_v5  ;;  %v1419_v26 = vmul.f32 %v4205_v46, %v1383_v13  ;;  %v821_v11 = vmul.f32 %v4057_v31, %v785_v22  ;;  %578 = vst [vmem:[#allocation2 + $0x343] sm:$0xff] %v4635_v23  ;;  %v4653_v54 = vadd.f32 %v4558_v43, %v4544_v29  ;;  %v783_v35 = vld [vmem:[#allocation2 + $0x310] sm:$0xff] }
 0x1d8   :  { %v4656_v21 = vmul.f32 %v4077_v49, %v956_v7  ;;  %v731_v63 = vadd.f32 %v4534_v39, %v4576_v4  ;;  %v1520_v44 = vmul.f32 %v4210_v47, %v4512_v16  ;;  %576 = vst [vmem:[#allocation2 + $0x323] sm:$0xff] %v4643_v28  ;;  %v819_v25 = vmul.f32 %v4057_v31, %v783_v35  ;;  %v984_v60 = vld [vmem:[#allocation2 + $0x311] sm:$0xff] }
 0x1d9   :  { %v1451_v42 = vadd.f32 %v1419_v26, %v1351_v3  ;;  %v853_v1 = vadd.f32 %v821_v11, %v753_v20  ;;  %v922_v29 = vmul.f32 %v4060_v32, %v4607_v41  ;;  %v4668_v7 = vadd.f32 %v4519_v62, %v4564_v57  ;;  %v986_v20 = vld [vmem:[#allocation2 + $0x331] sm:$0xff] }
 0x1da   :  { %v4672_v39 = vadd.f32 %v4570_v14, %v4033_v19  ;;  %v4674_v43 = vadd.f32 %v799_v40, %v731_v63  ;;  %v1620_v4 = vmul.f32 %v4392_v38, %v1584_v36  ;;  %v851_v9 = vadd.f32 %v819_v25, %v751_v18  ;;  %v1385_v14 = vld [vmem:[#allocation2 + $0x304] sm:$0xff]  ;;  %v1187_v22 = vld [vmem:[#allocation2 + $0x332] sm:$0xff] }
 0x1db   :  { %v1552_v58 = vadd.f32 %v1520_v44, %v1451_v42  ;;  %v920_v2 = vmul.f32 %v4060_v32, %v4471_v8  ;;  %v954_v13 = vadd.f32 %v922_v29, %v853_v1  ;;  %v4680_v61 = vmul.f32 %v4392_v38, %v1585_v34  ;;  %v1185_v24 = vld [vmem:[#allocation2 + $0x312] sm:$0xff] }
 0x1dc   :  { %v1121_v62 = vmul.f32 %v4063_v33, %v4512_v16  ;;  %v616_v19 = vmul.f32 %v4493_v10, %v4635_v23  ;;  %v614_v57 = vmul.f32 %v4493_v10, %v4643_v28  ;;  %v1020_v18 = vmul.f32 %v4077_v49, %v984_v60  ;;  %v1386_v1 = vld [vmem:[#allocation2 + $0x314] sm:$0xff] }
 0x1dd   :  { %v1652_v48 = vadd.f32 %v1620_v4, %v1552_v58  ;;  %v952_v53 = vadd.f32 %v920_v2, %v851_v9  ;;  %v1721_v12 = vmul.f32 %v4400_v0, %v4607_v41  ;;  %v1022_v40 = vmul.f32 %v4077_v49, %v986_v20 }
 0x1de   :  { %v654_v3 = vadd.f32 %v4498_v15, %v616_v19  ;;  %v722_v26 = vmul.f32 %v4017_v6, %v4607_v41  ;;  %v786_v36 = vld [vmem:[#allocation2 + $0x340] sm:$0xff]  ;;  %v652_v10 = vadd.f32 %v4498_v15, %v614_v57  ;;  %v720_v35 = vmul.f32 %v4017_v6, %v4471_v8 }
 0x1df   :  { %v1052_v11 = vadd.f32 %v1020_v18, %v952_v53  ;;  %v4696_v63 = vadd.f32 %v1721_v12, %v1652_v48  ;;  %v822_v44 = vmul.f32 %v4057_v31, %v786_v36  ;;  %v1421_v34 = vmul.f32 %v4205_v46, %v1385_v14  ;;  %v784_v29 = vld [vmem:[#allocation2 + $0x320] sm:$0xff]  ;;  %v1587_v36 = vld [vmem:[#allocation2 + $0x315] sm:$0xff] }
 0x1e0   :  { %v1124_v42 = vmul.f32 %v4063_v33, %v4602_v30  ;;  %v754_v25 = vadd.f32 %v722_v26, %v654_v3  ;;  %v1054_v4 = vadd.f32 %v1022_v40, %v954_v13  ;;  %v1223_v60 = vmul.f32 %v4080_v50, %v1187_v22  ;;  %v987_v20 = vld [vmem:[#allocation2 + $0x341] sm:$0xff] }
 0x1e1   :  { %6035 = vst [vmem:[#allocation48_spill] sm:$0xff] %v4696_v63  ;;  %v1153_v15 = vadd.f32 %v1121_v62, %v1052_v11  ;;  %v1221_v58 = vmul.f32 %v4080_v50, %v1185_v24  ;;  %v752_v9 = vadd.f32 %v720_v35, %v652_v10  ;;  %v820_v19 = vmul.f32 %v4057_v31, %v784_v29  ;;  %v985_v8 = vld [vmem:[#allocation2 + $0x321] sm:$0xff] }
 0x1e2   :  { %v854_v2 = vadd.f32 %v822_v44, %v754_v25  ;;  %v923_v6 = vmul.f32 %v4060_v32, %v4643_v28  ;;  %v1123_v57 = vmul.f32 %v4063_v33, %v4643_v28  ;;  %v1422_v13 = vmul.f32 %v4205_v46, %v1386_v1  ;;  %v1586_v53 = vld [vmem:[#allocation2 + $0x305] sm:$0xff] }
 0x1e3   :  { %v1253_v14 = vadd.f32 %v1221_v58, %v1153_v15  ;;  %v921_v62 = vmul.f32 %v4060_v32, %v4512_v16  ;;  %v1322_v48 = vmul.f32 %v4085_v52, %v4643_v28  ;;  %v1023_v18 = vmul.f32 %v4077_v49, %v987_v20  ;;  %v1186_v25 = vld [vmem:[#allocation2 + $0x322] sm:$0xff]  ;;  %v964_v58 = vld [vmem:[#allocation2 + $0x111] sm:$0xff] }
 0x1e4   :  { %v852_v31 = vadd.f32 %v820_v19, %v752_v9  ;;  %v955_v12 = vadd.f32 %v923_v6, %v854_v2  ;;  %v1155_v40 = vadd.f32 %v1123_v57, %v1054_v4  ;;  %v1324_v22 = vmul.f32 %v4085_v52, %v4635_v23  ;;  %v963_v19 = vld [vmem:[#allocation2 + $0xa1] sm:$0xff] }
 0x1e5   :  { %v1021_v24 = vmul.f32 %v4077_v49, %v985_v8  ;;  %v1354_v3 = vadd.f32 %v1322_v48, %v1253_v14  ;;  %v1453_v26 = vadd.f32 %v1421_v34, %v4638_v51  ;;  %v1522_v11 = vmul.f32 %v4210_v47, %v4643_v28  ;;  %v1363_v14 = vld [vmem:[#allocation2 + $0x84] sm:$0xff] }
 0x1e6   :  { %v953_v10 = vadd.f32 %v921_v62, %v852_v31  ;;  %v1055_v32 = vadd.f32 %v1023_v18, %v955_v12  ;;  %v1255_v16 = vadd.f32 %v1223_v60, %v1155_v40  ;;  %v1622_v44 = vmul.f32 %v4392_v38, %v1586_v53  ;;  %v962_v18 = vld [vmem:[#allocation2 + $0x91] sm:$0xff]  ;;  %v6052_v63 = vld [vmem:[#allocation28_spill] sm:$0xff] }
 0x1e7   :  { %v1523_v35 = vmul.f32 %v4210_v47, %v4602_v30  ;;  %v1122_v1 = vmul.f32 %v4063_v33, %v4607_v41  ;;  %v1454_v29 = vadd.f32 %v1422_v13, %v1354_v3  ;;  %v1554_v34 = vadd.f32 %v1522_v11, %v1453_v26  ;;  %v1387_v13 = vld [vmem:[#allocation2 + $0x324] sm:$0xff] }
 0x1e8   :  { %v1053_v4 = vadd.f32 %v1021_v24, %v953_v10  ;;  %v4728_v15 = vadd.f32 %v1124_v42, %v1055_v32  ;;  %v4730_v51 = vadd.f32 %v1324_v22, %v1255_v16  ;;  %v932_v60 = vadd.f32 %v4538_v27, %v4674_v43  ;;  %v1273_v24 = vld [vmem:[#allocation2 + $0x193] sm:$0xff]  ;;  %v3551_v10 = vld [vmem:[%s6001_s6] sm:$0x3f]  ;;  %s3790_s6 = smov [#allocation18]  }
 0x1e9   :  { %v1623_v20 = vmul.f32 %v4392_v38, %v1587_v36  ;;  %v1555_v9 = vadd.f32 %v1523_v35, %v1454_v29  ;;  %v1653_v2 = vadd.f32 %v4680_v61, %v4640_v17  ;;  %v1222_v6 = vmul.f32 %v4080_v50, %v1186_v25  ;;  %v1665_v61 = vld [vmem:[#allocation2 + $0xb3] sm:$0xff]  ;;  %s3202_s28 = sshll.u32 %s3790_s6, 4  ;;  %s3203_s28 = int_to_ptr.vmem [resolvable:$true] %s3202_s28 }
 0x1ea   :  { %6036 = vst [vmem:[#allocation49_spill] sm:$0xff] %v4728_v15  ;;  %6037 = vst [vmem:[#allocation50_spill] sm:$0xff] %v4730_v51  ;;  %v1154_v41 = vadd.f32 %v1122_v1, %v1053_v4  ;;  %v1654_v8 = vadd.f32 %v1622_v44, %v1554_v34  ;;  %v1722_v42 = vmul.f32 %v4400_v0, %v4643_v28  ;;  %v6041_v32 = vsub.s32 5, %v3995_v59  ;;  %v6042_v1 = vld [vmem:[#allocation45_spill] sm:$0xff]  ;;  %s3744_s29 = scalar_lea.vmem %s3203_s28, 4096  ;;  %p3749_p4 = scmp.lt.s32.totalorder %s3203_s28, %s3203_s28 }
 0x1eb   :  { %v1024_v57 = vadd.f32 %v4656_v21, %v4668_v7  ;;  %v1723_v27 = vmul.f32 %v4400_v0, %v4602_v30  ;;  %v1724_v43 = vmul.f32 %v4400_v0, %v4635_v23  ;;  %v1655_v17 = vadd.f32 %v1623_v20, %v1555_v9  ;;  %v1157_v29 = vld [vmem:[#allocation2 + $0x32] sm:$0xff]  ;;  %v4787_v20 = vld [vmem:[#allocation2 + $0xa3] sm:$0xff]  ;;  %p3745_p3 = scmp.ne.s32.totalorder %s3203_s28, %s3744_s29  ;;  %p3750_p5 = scmp.lt.s32.totalorder %s3744_s29, %s3744_s29 }
 0x1ec   :  { %v1000_v62 = vmul.f32 %v4077_v49, %v964_v58  ;;  %v1254_v48 = vadd.f32 %v1222_v6, %v1154_v41  ;;  %v1323_v53 = vmul.f32 %v4085_v52, %v4602_v30  ;;  %v4749_v28 = vadd.f32 %v1722_v42, %v1653_v2  ;;  %v3552_v59 = vld [vmem:[#allocation2 + $0x93] sm:$0xff] }
 0x1ed   :  { %v999_v21 = vmul.f32 %v4077_v49, %v963_v19  ;;  %v4752_v7 = vadd.f32 %v1723_v27, %v1654_v8  ;;  %v4754_v31 = vadd.f32 %v1724_v43, %v1655_v17  ;;  %v926_v12 = vadd.f32 %v4553_v45, %v4653_v54  ;;  %v1163_v34 = vld [vmem:[#allocation2 + $0x92] sm:$0xff]  ;;  %v6045_v8 = vld [vmem:[#allocation27_spill] sm:$0xff]  ;;  %p3751_p6 = por %p3750_p5, %p3749_p4 }
 0x1ee   :  { %6038 = vst [vmem:[#allocation51_spill] sm:$0xff] %v4749_v28  ;;  %v1399_v40 = vmul.f32 %v4205_v46, %v1363_v14  ;;  %v1032_v22 = vadd.f32 %v1000_v62, %v932_v60  ;;  %v1355_v3 = vadd.f32 %v1323_v53, %v1254_v48  ;;  %v1423_v26 = vmul.f32 %v4205_v46, %v1387_v13  ;;  %v3553_v60 = vld [vmem:[#allocation2 + $0x83] sm:$0xff]  ;;  %v1167_v9 = vld [vmem:[#allocation2 + $0x132] sm:$0xff] }
 0x1ef   :  { %6039 = vst [vmem:[#allocation52_spill] sm:$0xff] %v4752_v7  ;;  %6040 = vst [vmem:[#allocation53_spill] sm:$0xff] %v4754_v31  ;;  %v1031_v30 = vadd.f32 %v999_v21, %v4130_v56  ;;  %v4762_v36 = vmul.f32 %v4400_v0, %v1665_v61  ;;  %v4769_v16 = vrot.slane %v3551_v10, %v6041_v32  ;;  %v4777_v56 = vld [vmem:[#allocation2 + $0x273] sm:$0xff]  ;;  %v1164_v62 = vld [vmem:[#allocation2 + $0xa2] sm:$0xff]  ;;  %p3752_p7 = pnand %p3751_p6, %p3745_p3 }
 0x1f0   :  { %v4773_v45 = vadd.f32 %v4646_v55, %v4672_v39  ;;  %v998_v54 = vmul.f32 %v4077_v49, %v962_v18  ;;  %v1431_v11 = vadd.f32 %v1399_v40, %v4161_v37  ;;  %v1455_v44 = vadd.f32 %v1423_v26, %v1355_v3  ;;  %v1165_v39 = vld [vmem:[#allocation2 + $0x112] sm:$0xff]  ;;  %v4810_v18 = vld [vmem:[#allocation2 + $0x43] sm:$0xff] }
 0x1f1   :  { %v1524_v35 = vmul.f32 %v4210_v47, %v4635_v23  ;;  %v1125_v25 = vadd.f32 %v6042_v1, %v1024_v57  ;;  %v1100_v4 = vmul.f32 %v3552_v59, %v4063_v33  ;;  %v1099_v55 = vmul.f32 %v3553_v60, %v4063_v33  ;;  %v1161_v37 = vld [vmem:[#allocation2 + $0x72] sm:$0xff]  ;;  %v1564_v57 = vld [vmem:[#allocation2 + $0x85] sm:$0xff] }
 0x1f2   :  { %v4785_v58 = vmul.f32 %v4085_v52, %v1273_v24  ;;  %v1500_v23 = vmul.f32 %v4787_v20, %v4210_v47  ;;  %v6043_v2 = vld [vmem:[#allocation46_spill] sm:$0xff]  ;;  %v1030_v42 = vadd.f32 %v998_v54, %v6045_v8  ;;  %v4796_v27 = vmul.f32 %v4400_v0, %v1273_v24  ;;  %v959_v40 = vld [vmem:[#allocation2 + $0x61] sm:$0xff] }
 0x1f3   :  { %v1133_v19 = vadd.f32 %v6043_v2, %v1032_v22  ;;  %v4792_v41 = vadd.f32 %v1524_v35, %v1455_v44  ;;  %v958_v6 = vld [vmem:[#allocation2 + $0x51] sm:$0xff]  ;;  %v4800_v43 = vmul.f32 %v4085_v52, %v4777_v56  ;;  %v4804_v13 = vmul.f32 %v4210_v47, %v4777_v56  ;;  %v1572_v7 = vld [vmem:[#allocation2 + $0x165] sm:$0xff] }
 0x1f4   :  { %v1169_v14 = vld [vmem:[#allocation2 + $0x152] sm:$0xff]  ;;  %v4806_v17 = vadd.f32 %v1100_v4, %v1031_v30  ;;  %v1193_v61 = vmul.f32 %v4080_v50, %v1157_v29  ;;  %v1532_v48 = vadd.f32 %v1500_v23, %v1431_v11  ;;  %v1201_v53 = vmul.f32 %v4080_v50, %v1165_v39  ;;  %v3555_v39 = vld [vmem:[#allocation2 + $0x123] sm:$0xff] }
 0x1f5   :  { %6044 = vst [vmem:[#allocation45_spill] sm:$0xff] %v4792_v41  ;;  %v4812_v21 = vadd.f32 %v1099_v55, %v1030_v42  ;;  %v4815_v22 = vmul.f32 %v4080_v50, %v1163_v34  ;;  %v1197_v24 = vmul.f32 %v4080_v50, %v1161_v37  ;;  %v1203_v3 = vmul.f32 %v4080_v50, %v1167_v9  ;;  %v1368_v32 = vld [vmem:[#allocation2 + $0x134] sm:$0xff]  ;;  %v1570_v55 = vld [vmem:[#allocation2 + $0x145] sm:$0xff] }
 0x1f6   :  { %v994_v26 = vmul.f32 %v4077_v49, %v958_v6  ;;  %v4820_v30 = vadd.f32 %v1193_v61, %v1125_v25  ;;  %v1600_v10 = vmul.f32 %v4392_v38, %v1564_v57  ;;  %v1569_v54 = vld [vmem:[#allocation2 + $0x135] sm:$0xff]  ;;  %v1233_v11 = vadd.f32 %v1201_v53, %v1133_v19  ;;  %v1369_v25 = vld [vmem:[#allocation2 + $0x144] sm:$0xff]  ;;  %v6047_v23 = vld [vmem:[#allocation33_spill] sm:$0xff] }
 0x1f7   :  { %v1205_v44 = vmul.f32 %v4080_v50, %v1169_v14  ;;  %v4825_v35 = vmul.f32 %v4080_v50, %v1164_v62  ;;  %v1366_v1 = vld [vmem:[#allocation2 + $0x114] sm:$0xff]  ;;  %v1095_v34 = vmul.f32 %v4063_v33, %v4810_v18  ;;  %v1302_v37 = vmul.f32 %v3555_v39, %v4085_v52  ;;  %v6048_v19 = vld [vmem:[#allocation29_spill] sm:$0xff]  ;;  %v3556_v42 = vld [vmem:[#allocation2 + $0x143] sm:$0xff] }
 0x1f8   :  { %v6046_v29 = vld [vmem:[#allocation30_spill] sm:$0xff]  ;;  %v1026_v4 = vadd.f32 %v994_v26, %v926_v12  ;;  %v1632_v60 = vadd.f32 %v1600_v10, %v1532_v48  ;;  %v995_v2 = vmul.f32 %v4077_v49, %v959_v40  ;;  %v4834_v6 = vadd.f32 %v1197_v24, %v6048_v19  ;;  %v1568_v14 = vld [vmem:[#allocation2 + $0x125] sm:$0xff] }
 0x1f9   :  { %v1235_v59 = vadd.f32 %v1203_v3, %v6046_v29  ;;  %v1237_v9 = vadd.f32 %v1205_v44, %v6047_v23  ;;  %v1404_v8 = vmul.f32 %v4205_v46, %v1368_v32  ;;  %v4838_v12 = vmul.f32 %v4392_v38, %v1569_v54  ;;  %v4841_v61 = vld [vmem:[#allocation2 + $0x53] sm:$0xff]  ;;  %v4846_v53 = vld [vmem:[#allocation2 + $0x163] sm:$0xff] }
 0x1fa   :  { %v1304_v57 = vmul.f32 %v3556_v42, %v4085_v52  ;;  %v4844_v62 = vmul.f32 %v4205_v46, %v1366_v1  ;;  %v1372_v48 = vld [vmem:[#allocation2 + $0x174] sm:$0xff]  ;;  %v1306_v49 = vmul.f32 %v4846_v53, %v4085_v52  ;;  %v1027_v40 = vadd.f32 %v995_v2, %v4773_v45  ;;  %v1172_v23 = vld [vmem:[#allocation2 + $0x182] sm:$0xff] }
 0x1fb   :  { %v1159_v24 = vld [vmem:[#allocation2 + $0x52] sm:$0xff]  ;;  %v4851_v3 = vadd.f32 %v1302_v37, %v1233_v11  ;;  %v1405_v26 = vmul.f32 %v4205_v46, %v1369_v25  ;;  %v4855_v10 = vmul.f32 %v4392_v38, %v1570_v55  ;;  %v1127_v54 = vadd.f32 %v1095_v34, %v1026_v4  ;;  %v4876_v42 = vld [vmem:[#allocation2 + $0x63] sm:$0xff] }
 0x1fc   :  { %v1370_v32 = vld [vmem:[#allocation2 + $0x154] sm:$0xff]  ;;  %v1336_v44 = vadd.f32 %v1304_v57, %v1235_v59  ;;  %v4858_v1 = vadd.f32 %v4762_v36, %v1632_v60  ;;  %v1604_v29 = vmul.f32 %v4392_v38, %v1568_v14  ;;  %v1338_v19 = vadd.f32 %v1306_v49, %v1237_v9  ;;  %v1160_v59 = vld [vmem:[#allocation2 + $0x62] sm:$0xff] }
 0x1fd   :  { %v1571_v39 = vld [vmem:[#allocation2 + $0x155] sm:$0xff]  ;;  %v1096_v45 = vmul.f32 %v4063_v33, %v4841_v61  ;;  %v4864_v11 = vmul.f32 %v4205_v46, %v1372_v48  ;;  %v1195_v36 = vmul.f32 %v4080_v50, %v1159_v24  ;;  %v1406_v34 = vmul.f32 %v4205_v46, %v1370_v32  ;;  %v3560_v9 = vld [vmem:[#allocation2 + $0x183] sm:$0xff] }
 0x1fe   :  { %v3558_v25 = vld [vmem:[#allocation2 + $0x173] sm:$0xff]  ;;  %v4874_v33 = vmul.f32 %v3560_v9, %v4400_v0  ;;  %v4879_v57 = vmul.f32 %v4392_v38, %v1571_v39  ;;  %v1208_v14 = vmul.f32 %v4080_v50, %v1172_v23  ;;  %v1373_v48 = vld [vmem:[#allocation2 + $0x184] sm:$0xff]  ;;  %v6049_v49 = vld [vmem:[#allocation31_spill] sm:$0xff] }
 0x1ff   :  { %v1507_v55 = vmul.f32 %v3558_v25, %v4210_v47  ;;  %v4868_v4 = vmul.f32 %v3558_v25, %v4400_v0  ;;  %v3559_v60 = vld [vmem:[#allocation2 + $0x153] sm:$0xff]  ;;  %v1128_v2 = vadd.f32 %v1096_v45, %v1027_v40  ;;  %v1437_v24 = vadd.f32 %v1405_v26, %v6049_v49  ;;  %v1359_v32 = vld [vmem:[#allocation2 + $0x44] sm:$0xff] }
 0x200   :  { %v1505_v37 = vmul.f32 %v3559_v60, %v4210_v47  ;;  %v1227_v25 = vadd.f32 %v1195_v36, %v1127_v54  ;;  %v1438_v31 = vadd.f32 %v1406_v34, %v1338_v19  ;;  %v1196_v60 = vmul.f32 %v4080_v50, %v1160_v59  ;;  %v4884_v28 = vld [vmem:[#allocation2 + $0x73] sm:$0xff]  ;;  %v6050_v9 = vld [vmem:[#allocation32_spill] sm:$0xff] }
 0x201   :  { %v1294_v40 = vmul.f32 %v4085_v52, %v4810_v18  ;;  %v1436_v45 = vadd.f32 %v1404_v8, %v1336_v44  ;;  %v4889_v39 = vadd.f32 %v1604_v29, %v6050_v9  ;;  %v6051_v41 = vld [vmem:[#allocation34_spill] sm:$0xff]  ;;  %v1506_v26 = vmul.f32 %v4846_v53, %v4210_v47  ;;  %v4899_v49 = vld [vmem:[#allocation2 + $0x83] sm:$0xff] }
 0x202   :  { %v1240_v23 = vadd.f32 %v1208_v14, %v6051_v41  ;;  %v1296_v54 = vmul.f32 %v4085_v52, %v4876_v42  ;;  %v1358_v19 = vld [vmem:[#allocation2 + $0x34] sm:$0xff]  ;;  %v4897_v59 = vmul.f32 %v4205_v46, %v1373_v48  ;;  %v1228_v34 = vadd.f32 %v1196_v60, %v1128_v2 }
 0x203   :  { %v1575_v36 = vld [vmem:[#allocation2 + $0x1f5] sm:$0xff]  ;;  %v1326_v18 = vadd.f32 %v1294_v40, %v4820_v30  ;;  %v1395_v44 = vmul.f32 %v4205_v46, %v1359_v32  ;;  %v1538_v41 = vadd.f32 %v1506_v26, %v1437_v24  ;;  %v4904_v29 = vmul.f32 %v4392_v38, %v1572_v7  ;;  %v1361_v24 = vld [vmem:[#allocation2 + $0x64] sm:$0xff] }
 0x204   :  { %v1360_v8 = vld [vmem:[#allocation2 + $0x54] sm:$0xff]  ;;  %v1297_v14 = vmul.f32 %v4085_v52, %v4884_v28  ;;  %v1328_v9 = vadd.f32 %v1296_v54, %v1227_v25  ;;  %v1394_v48 = vmul.f32 %v4205_v46, %v1358_v19  ;;  %v4910_v2 = vadd.f32 %v1505_v37, %v1436_v45  ;;  %v6053_v45 = vld [vmem:[#allocation37_spill] sm:$0xff] }
 0x205   :  { %v1427_v5 = vadd.f32 %v1395_v44, %v6052_v63  ;;  %v1539_v60 = vadd.f32 %v1507_v55, %v1438_v31  ;;  %v4913_v30 = vadd.f32 %v4785_v58, %v1240_v23  ;;  %v1611_v32 = vmul.f32 %v4392_v38, %v1575_v36  ;;  %v1265_v26 = vld [vmem:[#allocation2 + $0xb3] sm:$0xff]  ;;  %v3561_v58 = vld [vmem:[#allocation2 + $0x223] sm:$0xff] }
 0x206   :  { %v1298_v7 = vmul.f32 %v4085_v52, %v4899_v49  ;;  %v1396_v40 = vmul.f32 %v4205_v46, %v1360_v8  ;;  %v1231_v25 = vadd.f32 %v4815_v22, %v4812_v21  ;;  %v1329_v54 = vadd.f32 %v1297_v14, %v1228_v34  ;;  %v1362_v63 = vld [vmem:[#allocation2 + $0x74] sm:$0xff]  ;;  %v1560_v44 = vld [vmem:[#allocation2 + $0x45] sm:$0xff] }
 0x207   :  { %v1426_v37 = vadd.f32 %v1394_v48, %v1326_v18  ;;  %v1496_v31 = vmul.f32 %v4210_v47, %v4876_v42  ;;  %v1712_v55 = vmul.f32 %v3561_v58, %v4400_v0  ;;  %v1643_v23 = vadd.f32 %v1611_v32, %v6053_v45  ;;  %v1364_v21 = vld [vmem:[#allocation2 + $0x94] sm:$0xff] }
 0x208   :  { %v1330_v19 = vadd.f32 %v1298_v7, %v4834_v6  ;;  %v1428_v36 = vadd.f32 %v1396_v40, %v1328_v9  ;;  %v1300_v8 = vmul.f32 %v4787_v20, %v4085_v52  ;;  %v1397_v22 = vmul.f32 %v4205_v46, %v1361_v24  ;;  %v1559_v9 = vld [vmem:[#allocation2 + $0x35] sm:$0xff]  ;;  %v1365_v7 = vld [vmem:[#allocation2 + $0xa4] sm:$0xff] }
 0x209   :  { %v1495_v34 = vmul.f32 %v4210_v47, %v4841_v61  ;;  %v1528_v18 = vadd.f32 %v1496_v31, %v1427_v5  ;;  %v1232_v14 = vadd.f32 %v4825_v35, %v4806_v17  ;;  %v1301_v48 = vmul.f32 %v4085_v52, %v1265_v26  ;;  %v1463_v58 = vld [vmem:[#allocation2 + $0x93] sm:$0xff] }
 0x20a   :  { %v1398_v32 = vmul.f32 %v4205_v46, %v1362_v63  ;;  %v1497_v6 = vmul.f32 %v4210_v47, %v4884_v28  ;;  %v1332_v20 = vadd.f32 %v1300_v8, %v1231_v25  ;;  %v1429_v40 = vadd.f32 %v1397_v22, %v1329_v54  ;;  %v1561_v45 = vld [vmem:[#allocation2 + $0x55] sm:$0xff]  ;;  %v1562_v63 = vld [vmem:[#allocation2 + $0x65] sm:$0xff] }
 0x20b   :  { %v1527_v24 = vadd.f32 %v1495_v34, %v1426_v37  ;;  %v1596_v61 = vmul.f32 %v4392_v38, %v1560_v44  ;;  %v1400_v5 = vmul.f32 %v4205_v46, %v1364_v21  ;;  %v1498_v17 = vmul.f32 %v4210_v47, %v4899_v49  ;;  %v1466_v21 = vld [vmem:[#allocation2 + $0xc3] sm:$0xff]  ;;  %v1563_v34 = vld [vmem:[#allocation2 + $0x75] sm:$0xff] }
 0x20c   :  { %v1430_v31 = vadd.f32 %v1398_v32, %v1330_v19  ;;  %v1529_v35 = vadd.f32 %v1497_v6, %v1428_v36  ;;  %v1595_v51 = vmul.f32 %v4392_v38, %v1559_v9  ;;  %v1638_v15 = vadd.f32 %v4855_v10, %v1538_v41 }
 0x20d   :  { %v1628_v52 = vadd.f32 %v1596_v61, %v1528_v18  ;;  %v1639_v25 = vadd.f32 %v4879_v57, %v1539_v60  ;;  %v1333_v54 = vadd.f32 %v1301_v48, %v1232_v14  ;;  %v1401_v37 = vmul.f32 %v4205_v46, %v1365_v7  ;;  %v1761_v60 = vld [vmem:[#allocation2 + $0x46] sm:$0xff] }
 0x20e   :  { %v1499_v44 = vmul.f32 %v4210_v47, %v1463_v58  ;;  %v1597_v8 = vmul.f32 %v4392_v38, %v1561_v45  ;;  %v1432_v19 = vadd.f32 %v1400_v5, %v1332_v20  ;;  %v1530_v22 = vadd.f32 %v1498_v17, %v1429_v40  ;;  %v1760_v20 = vld [vmem:[#allocation2 + $0x36] sm:$0xff] }
 0x20f   :  { %v1627_v36 = vadd.f32 %v1595_v51, %v1527_v24  ;;  %v1697_v32 = vmul.f32 %v4400_v0, %v4884_v28  ;;  %v1501_v18 = vmul.f32 %v4210_v47, %v1265_v26  ;;  %v1598_v57 = vmul.f32 %v4392_v38, %v1562_v63  ;;  %v1565_v40 = vld [vmem:[#allocation2 + $0x95] sm:$0xff] }
 0x210   :  { %v1531_v10 = vadd.f32 %v1499_v44, %v1430_v31  ;;  %v1629_v41 = vadd.f32 %v1597_v8, %v1529_v35  ;;  %v1696_v14 = vmul.f32 %v4400_v0, %v4876_v42  ;;  %v4954_v6 = vadd.f32 %v4868_v4, %v1638_v15  ;;  %v6054_v4 = vld [vmem:[#allocation35_spill] sm:$0xff]  ;;  %v1566_v31 = vld [vmem:[#allocation2 + $0xa5] sm:$0xff]  ;;  %v1667_v8 = vld [vmem:[#allocation2 + $0xd3] sm:$0xff] }
 0x211   :  { %v1729_v48 = vadd.f32 %v1697_v32, %v1628_v52  ;;  %v4957_v9 = vadd.f32 %v4874_v33, %v1639_v25  ;;  %v1433_v51 = vadd.f32 %v1401_v37, %v1333_v54  ;;  %v1502_v28 = vmul.f32 %v4210_v47, %v1466_v21  ;;  %v1763_v37 = vld [vmem:[#allocation2 + $0x66] sm:$0xff]  ;;  %v1567_v44 = vld [vmem:[#allocation2 + $0x115] sm:$0xff] }
 0x212   :  { %v1599_v26 = vmul.f32 %v4392_v38, %v1563_v34  ;;  %v4961_v7 = vadd.f32 %v1712_v55, %v1643_v23  ;;  %v1630_v24 = vadd.f32 %v1598_v57, %v1530_v22  ;;  %v1698_v42 = vmul.f32 %v4400_v0, %v4899_v49  ;;  %v1664_v55 = vld [vmem:[#allocation2 + $0xa3] sm:$0xff]  ;;  %v1762_v23 = vld [vmem:[#allocation2 + $0x56] sm:$0xff] }
 0x213   :  { %v1728_v52 = vadd.f32 %v1696_v14, %v1627_v36  ;;  %v1797_v15 = vmul.f32 %v4769_v16, %v1761_v60  ;;  %v4968_v33 = vadd.f32 %v4864_v11, %v6054_v4  ;;  %v1434_v45 = vadd.f32 %v4844_v62, %v4851_v3  ;;  %v3562_v11 = vld [vmem:[#allocation2 + $0x133] sm:$0xff]  ;;  %v6055_v4 = vld [vmem:[#allocation36_spill] sm:$0xff] }
 0x214   :  { %v1533_v61 = vadd.f32 %v1501_v18, %v1432_v19  ;;  %v1631_v5 = vadd.f32 %v1599_v26, %v1531_v10  ;;  %v1699_v17 = vmul.f32 %v4400_v0, %v1463_v58  ;;  %v1730_v35 = vadd.f32 %v1698_v42, %v1629_v41  ;;  %v1764_v18 = vld [vmem:[#allocation2 + $0x76] sm:$0xff]  ;;  %v1765_v10 = vld [vmem:[#allocation2 + $0x86] sm:$0xff] }
 0x215   :  { %v1796_v49 = vmul.f32 %v4769_v16, %v1760_v20  ;;  %v4974_v63 = vadd.f32 %v1797_v15, %v1729_v48  ;;  %v4978_v25 = vadd.f32 %v4897_v59, %v4913_v30  ;;  %v1503_v54 = vmul.f32 %v3562_v11, %v4210_v47  ;;  %v1473_v57 = vld [vmem:[#allocation2 + $0x193] sm:$0xff] }
 0x216   :  { %v1534_v62 = vadd.f32 %v1502_v28, %v1433_v51  ;;  %v1601_v3 = vmul.f32 %v4392_v38, %v1565_v40  ;;  %v1700_v58 = vmul.f32 %v4400_v0, %v1664_v55  ;;  %v1731_v19 = vadd.f32 %v1699_v17, %v1630_v24  ;;  %v1668_v40 = vld [vmem:[#allocation2 + $0x143] sm:$0xff]  ;;  %v1669_v55 = vld [vmem:[#allocation2 + $0x153] sm:$0xff] }
 0x217   :  { %v1798_v22 = vmul.f32 %v4769_v16, %v1762_v23  ;;  %v4984_v34 = vadd.f32 %v1796_v49, %v1728_v52  ;;  %v1535_v36 = vadd.f32 %v1503_v54, %v1434_v45  ;;  %v1602_v59 = vmul.f32 %v4392_v38, %v1566_v31  ;;  %v1766_v23 = vld [vmem:[#allocation2 + $0x96] sm:$0xff] }
 0x218   :  { %v1633_v30 = vadd.f32 %v1601_v3, %v1533_v61  ;;  %v1702_v32 = vmul.f32 %v4400_v0, %v1466_v21  ;;  %v1732_v41 = vadd.f32 %v1700_v58, %v1631_v5  ;;  %v1799_v60 = vmul.f32 %v4769_v16, %v1763_v37  ;;  %v4997_v21 = vld [vmem:[#allocation2 + $0x1a3] sm:$0xff] }
 0x219   :  { %v4989_v14 = vadd.f32 %v1798_v22, %v1730_v35  ;;  %v1860_v48 = vadd.f32 %v4974_v63, %v4984_v34  ;;  %v1603_v51 = vmul.f32 %v4392_v38, %v1567_v44  ;;  %v1634_v28 = vadd.f32 %v1602_v59, %v1534_v62  ;;  %v1767_v62 = vld [vmem:[#allocation2 + $0xa6] sm:$0xff] }
 0x21a   :  { %v1703_v26 = vmul.f32 %v4400_v0, %v1667_v8  ;;  %v1900_v20 = vmul.f32 %v4974_v63, %v4974_v63  ;;  %v1800_v24 = vmul.f32 %v4769_v16, %v1764_v18  ;;  %v1801_v42 = vmul.f32 %v4769_v16, %v1765_v10  ;;  %v1769_v59 = vld [vmem:[#allocation2 + $0x126] sm:$0xff]  ;;  %v1573_v18 = vld [vmem:[#allocation2 + $0x175] sm:$0xff] }
 0x21b   :  { %v5001_v52 = vadd.f32 %v1799_v60, %v1731_v19  ;;  %v1861_v15 = vadd.f32 %v1860_v48, %v4989_v14  ;;  %v1640_v45 = vadd.f32 %v4904_v29, %v6055_v4  ;;  %v1509_v61 = vmul.f32 %v4210_v47, %v1473_v57  ;;  %v1772_v10 = vld [vmem:[#allocation2 + $0x156] sm:$0xff] }
 0x21c   :  { %v1635_v5 = vadd.f32 %v1603_v51, %v1535_v36  ;;  %v1899_v31 = vmul.f32 %v4984_v34, %v4984_v34  ;;  %v1734_v17 = vadd.f32 %v1702_v32, %v1633_v30  ;;  %v5009_v35 = vadd.f32 %v1800_v24, %v1732_v41  ;;  %v1768_v36 = vld [vmem:[#allocation2 + $0x116] sm:$0xff] }
 0x21d   :  { %v5012_v49 = vadd.f32 %v1801_v42, %v4858_v1  ;;  %v1862_v11 = vadd.f32 %v1861_v15, %v5001_v52  ;;  %v1510_v54 = vmul.f32 %v4210_v47, %v4997_v21  ;;  %v1704_v29 = vmul.f32 %v4400_v0, %v1668_v40 }
 0x21e   :  { %v1901_v3 = vmul.f32 %v4989_v14, %v4989_v14  ;;  %v1931_v37 = vadd.f32 %v1900_v20, %v1899_v31  ;;  %v1705_v44 = vmul.f32 %v4400_v0, %v1669_v55  ;;  %v1735_v8 = vadd.f32 %v1703_v26, %v1634_v28  ;;  %v1574_v26 = vld [vmem:[#allocation2 + $0x185] sm:$0xff] }
 0x21f   :  { %v1802_v58 = vmul.f32 %v4769_v16, %v1766_v23  ;;  %v1863_v1 = vadd.f32 %v1862_v11, %v5009_v35  ;;  %v1637_v19 = vadd.f32 %v4838_v12, %v4910_v2  ;;  %v1736_v22 = vadd.f32 %v1704_v29, %v1635_v5  ;;  %v1180_v20 = vld [vmem:[#allocation2 + $0x262] sm:$0xff]  ;;  %v1770_v5 = vld [vmem:[#allocation2 + $0x136] sm:$0xff] }
 0x220   :  { %v1902_v30 = vmul.f32 %v5001_v52, %v5001_v52  ;;  %v1932_v32 = vadd.f32 %v1931_v37, %v1901_v3  ;;  %v1737_v57 = vadd.f32 %v1705_v44, %v4889_v39  ;;  %v1803_v41 = vmul.f32 %v4769_v16, %v1767_v62  ;;  %v1771_v29 = vld [vmem:[#allocation2 + $0x146] sm:$0xff] }
 0x221   :  { %v5029_v60 = vadd.f32 %v1802_v58, %v1734_v17  ;;  %v1864_v48 = vadd.f32 %v1863_v1, %v5012_v49  ;;  %v1706_v12 = vmul.f32 %v4846_v53, %v4400_v0  ;;  %v1903_v2 = vmul.f32 %v5009_v35, %v5009_v35 }
 0x222   :  { %v1904_v51 = vmul.f32 %v5012_v49, %v5012_v49  ;;  %v1933_v28 = vadd.f32 %v1932_v32, %v1902_v30  ;;  %v1804_v39 = vmul.f32 %v4769_v16, %v1768_v36  ;;  %v1805_v40 = vmul.f32 %v4769_v16, %v1769_v59  ;;  %v1675_v59 = vld [vmem:[#allocation2 + $0x1b3] sm:$0xff] }
 0x223   :  { %v5040_v24 = vadd.f32 %v1803_v41, %v1735_v8  ;;  %v1865_v42 = vadd.f32 %v1864_v48, %v5029_v60  ;;  %v1609_v15 = vmul.f32 %v4392_v38, %v1573_v18  ;;  %v1808_v53 = vmul.f32 %v4769_v16, %v1772_v10  ;;  %v1482_v18 = vld [vmem:[#allocation2 + $0x283] sm:$0xff] }
 0x224   :  { %v1541_v4 = vadd.f32 %v1509_v61, %v4968_v33  ;;  %v1934_v55 = vadd.f32 %v1933_v28, %v1903_v2  ;;  %v1738_v23 = vadd.f32 %v1706_v12, %v1637_v19  ;;  %v5046_v31 = vadd.f32 %v1804_v39, %v1736_v22  ;;  %v1773_v61 = vld [vmem:[#allocation2 + $0x166] sm:$0xff] }
 0x225   :  { %v5048_v17 = vadd.f32 %v1805_v40, %v1737_v57  ;;  %v1866_v11 = vadd.f32 %v1865_v42, %v5040_v24  ;;  %v1610_v62 = vmul.f32 %v4392_v38, %v1574_v26  ;;  %v1216_v3 = vmul.f32 %v4080_v50, %v1180_v20  ;;  %v6056_v19 = vld [vmem:[#allocation40_spill] sm:$0xff]  ;;  %v1380_v57 = vld [vmem:[#allocation2 + $0x254] sm:$0xff] }
 0x226   :  { %v1905_v37 = vmul.f32 %v5029_v60, %v5029_v60  ;;  %v1935_v44 = vadd.f32 %v1934_v55, %v1904_v51  ;;  %v1741_v33 = vadd.f32 %v4796_v27, %v1640_v45  ;;  %v1542_v8 = vadd.f32 %v1510_v54, %v4978_v25  ;;  %v1381_v2 = vld [vmem:[#allocation2 + $0x264] sm:$0xff]  ;;  %v1774_v20 = vld [vmem:[#allocation2 + $0x176] sm:$0xff] }
 0x227   :  { %v1806_v58 = vmul.f32 %v4769_v16, %v1770_v5  ;;  %v1867_v1 = vadd.f32 %v1866_v11, %v5046_v31  ;;  %v1248_v22 = vadd.f32 %v1216_v3, %v6056_v19  ;;  %v1641_v36 = vadd.f32 %v1609_v15, %v1541_v4  ;;  %v1776_v11 = vld [vmem:[#allocation2 + $0x1f6] sm:$0xff] }
 0x228   :  { %v1906_v30 = vmul.f32 %v5040_v24, %v5040_v24  ;;  %v1936_v32 = vadd.f32 %v1935_v44, %v1905_v37  ;;  %v1710_v10 = vmul.f32 %v4400_v0, %v4997_v21  ;;  %v1807_v27 = vmul.f32 %v4769_v16, %v1771_v29  ;;  %v6057_v44 = vld [vmem:[#allocation39_spill] sm:$0xff] }
 0x229   :  { %v5065_v45 = vadd.f32 %v1806_v58, %v1738_v23  ;;  %v1868_v25 = vadd.f32 %v1867_v1, %v5048_v17  ;;  %v1809_v54 = vmul.f32 %v4769_v16, %v1773_v61  ;;  %v1907_v41 = vmul.f32 %v5046_v31, %v5046_v31  ;;  %v1580_v61 = vld [vmem:[#allocation2 + $0x245] sm:$0xff] }
 0x22a   :  { %v1908_v48 = vmul.f32 %v5048_v17, %v5048_v17  ;;  %v1937_v12 = vadd.f32 %v1936_v32, %v1906_v30  ;;  %v1642_v51 = vadd.f32 %v1610_v62, %v1542_v8  ;;  %v1711_v21 = vmul.f32 %v4400_v0, %v1675_v59  ;;  %v1777_v8 = vld [vmem:[#allocation2 + $0x206] sm:$0xff]  ;;  %v1683_v59 = vld [vmem:[#allocation2 + $0x293] sm:$0xff] }
 0x22b   :  { %v5075_v28 = vadd.f32 %v1807_v27, %v4954_v6  ;;  %v1869_v26 = vadd.f32 %v1868_v25, %v5065_v45  ;;  %v5078_v39 = vadd.f32 %v1809_v54, %v1741_v33  ;;  %v1349_v40 = vadd.f32 %v4800_v43, %v1248_v22  ;;  %v1775_v6 = vld [vmem:[#allocation2 + $0x186] sm:$0xff]  ;;  %v1581_v27 = vld [vmem:[#allocation2 + $0x255] sm:$0xff] }
 0x22c   :  { %v1518_v42 = vmul.f32 %v4210_v47, %v1482_v18  ;;  %v1938_v15 = vadd.f32 %v1937_v12, %v1907_v41  ;;  %v1416_v4 = vmul.f32 %v4205_v46, %v1380_v57  ;;  %v1742_v5 = vadd.f32 %v1710_v10, %v1641_v36  ;;  %v1778_v57 = vld [vmem:[#allocation2 + $0x216] sm:$0xff] }
 0x22d   :  { %v5084_v55 = vadd.f32 %v1808_v53, %v4957_v9  ;;  %v1870_v23 = vadd.f32 %v1869_v26, %v5075_v28  ;;  %v1417_v29 = vmul.f32 %v4205_v46, %v1381_v2  ;;  %v1717_v62 = vmul.f32 %v4400_v0, %v4777_v56  ;;  %v1780_v26 = vld [vmem:[#allocation2 + $0x236] sm:$0xff] }
 0x22e   :  { %v1909_v43 = vmul.f32 %v5065_v45, %v5065_v45  ;;  %v1939_v3 = vadd.f32 %v1938_v15, %v1908_v48  ;;  %v1810_v37 = vmul.f32 %v4769_v16, %v1774_v20  ;;  %v1448_v33 = vadd.f32 %v1416_v4, %v6057_v44  ;;  %v1582_v48 = vld [vmem:[#allocation2 + $0x265] sm:$0xff] }
 0x22f   :  { %v1743_v9 = vadd.f32 %v1711_v21, %v1642_v51  ;;  %v1871_v53 = vadd.f32 %v1870_v23, %v5084_v55  ;;  %v1449_v58 = vadd.f32 %v1417_v29, %v1349_v40  ;;  %v1718_v1 = vmul.f32 %v4400_v0, %v1482_v18  ;;  %v1779_v21 = vld [vmem:[#allocation2 + $0x226] sm:$0xff] }
 0x230   :  { %v1910_v19 = vmul.f32 %v5075_v28, %v5075_v28  ;;  %v1940_v56 = vadd.f32 %v1939_v3, %v1909_v43  ;;  %v1811_v22 = vmul.f32 %v4769_v16, %v1775_v6  ;;  %v1812_v36 = vmul.f32 %v4769_v16, %v1776_v11  ;;  %v6058_v40 = vld [vmem:[#allocation44_spill] sm:$0xff]  ;;  %v6059_v6 = vld [vmem:[#allocation38_spill] sm:$0xff] }
 0x231   :  { %v5100_v30 = vadd.f32 %v1810_v37, %v1742_v5  ;;  %v1872_v32 = vadd.f32 %v1871_v53, %v5078_v39  ;;  %v1912_v10 = vmul.f32 %v5078_v39, %v5078_v39  ;;  %v1616_v25 = vmul.f32 %v4392_v38, %v1580_v61  ;;  %v1781_v53 = vld [vmem:[#allocation2 + $0x246] sm:$0xff] }
 0x232   :  { %v1911_v18 = vmul.f32 %v5084_v55, %v5084_v55  ;;  %v1941_v54 = vadd.f32 %v1940_v56, %v1910_v19  ;;  %v1813_v41 = vmul.f32 %v4769_v16, %v1777_v8  ;;  %v1549_v12 = vadd.f32 %v4804_v13, %v1448_v33  ;;  %v1289_v19 = vld [vmem:[#allocation2 + $0x353] sm:$0xff] }
 0x233   :  { %v5110_v2 = vadd.f32 %v1811_v22, %v1743_v9  ;;  %v1873_v51 = vadd.f32 %v1872_v32, %v5100_v30  ;;  %v1550_v20 = vadd.f32 %v1518_v42, %v1449_v58  ;;  %v1648_v15 = vadd.f32 %v1616_v25, %v6058_v40  ;;  %v1188_v42 = vld [vmem:[#allocation2 + $0x342] sm:$0xff]  ;;  %v1782_v25 = vld [vmem:[#allocation2 + $0x256] sm:$0xff] }
 0x234   :  { %v1719_v4 = vmul.f32 %v4400_v0, %v1683_v59  ;;  %v1942_v5 = vadd.f32 %v1941_v54, %v1911_v18  ;;  %v1617_v23 = vmul.f32 %v4392_v38, %v1581_v27  ;;  %v5117_v11 = vadd.f32 %v1813_v41, %v6059_v6  ;;  %v6060_v59 = vld [vmem:[#allocation41_spill] sm:$0xff]  ;;  %v6061_v54 = vld [vmem:[#allocation42_spill] sm:$0xff] }
 0x235   :  { %v5120_v29 = vadd.f32 %v1812_v36, %v4961_v7  ;;  %v1874_v13 = vadd.f32 %v1873_v51, %v5110_v2  ;;  %v1814_v43 = vmul.f32 %v4769_v16, %v1778_v57  ;;  %v1618_v3 = vmul.f32 %v4392_v38, %v1582_v48  ;;  %v1783_v48 = vld [vmem:[#allocation2 + $0x266] sm:$0xff] }
 0x236   :  { %v1913_v37 = vmul.f32 %v5100_v30, %v5100_v30  ;;  %v1943_v44 = vadd.f32 %v1942_v5, %v1912_v10  ;;  %v1815_v33 = vmul.f32 %v4769_v16, %v1779_v21  ;;  %v1816_v61 = vmul.f32 %v4769_v16, %v1780_v26  ;;  %v6062_v51 = vld [vmem:[#allocation49_spill] sm:$0xff]  ;;  %v6063_v26 = vld [vmem:[#allocation26_spill] sm:$0xff] }
 0x237   :  { %v1649_v9 = vadd.f32 %v1617_v23, %v1549_v12  ;;  %v1875_v7 = vadd.f32 %v1874_v13, %v5120_v29  ;;  %v1650_v8 = vadd.f32 %v1618_v3, %v1550_v20  ;;  %v1749_v58 = vadd.f32 %v1717_v62, %v1648_v15  ;;  %v1388_v5 = vld [vmem:[#allocation2 + $0x334] sm:$0xff]  ;;  %v6064_v13 = vld [vmem:[#allocation43_spill] sm:$0xff] }
 0x238   :  { %v1914_v56 = vmul.f32 %v5110_v2, %v5110_v2  ;;  %v1944_v22 = vadd.f32 %v1943_v44, %v1913_v37  ;;  %v1916_v36 = vmul.f32 %v5117_v11, %v5117_v11  ;;  %v5135_v32 = vadd.f32 %v1814_v43, %v6060_v59  ;;  %v1784_v3 = vld [vmem:[#allocation2 + $0x2d6] sm:$0xff]  ;;  %v1389_v44 = vld [vmem:[#allocation2 + $0x344] sm:$0xff] }
 0x239   :  { %v1224_v10 = vmul.f32 %v4080_v50, %v1188_v42  ;;  %v1876_v27 = vadd.f32 %v1875_v7, %v5117_v11  ;;  %v1817_v18 = vmul.f32 %v4769_v16, %v1781_v53  ;;  %v5141_v62 = vadd.f32 %v1815_v33, %v6061_v54  ;;  %v1785_v53 = vld [vmem:[#allocation2 + $0x2e6] sm:$0xff] }
 0x23a   :  { %v1915_v57 = vmul.f32 %v5120_v29, %v5120_v29  ;;  %v1945_v41 = vadd.f32 %v1944_v22, %v1914_v56  ;;  %v1750_v12 = vadd.f32 %v1718_v1, %v1649_v9  ;;  %v1325_v20 = vmul.f32 %v6063_v26, %v1289_v19  ;;  %v1490_v59 = vld [vmem:[#allocation2 + $0x363] sm:$0xff]  ;;  %v1786_v26 = vld [vmem:[#allocation2 + $0x2f6] sm:$0xff] }
 0x23b   :  { %v1256_v21 = vadd.f32 %v1224_v10, %v6062_v51  ;;  %v1877_v50 = vadd.f32 %v1876_v27, %v5135_v32  ;;  %v1751_v40 = vadd.f32 %v1719_v4, %v1650_v8  ;;  %v5148_v15 = vadd.f32 %v1817_v18, %v1749_v58  ;;  %v1588_v10 = vld [vmem:[#allocation2 + $0x325] sm:$0xff] }
 0x23c   :  { %v1946_v23 = vadd.f32 %v1945_v41, %v1915_v57  ;;  %v1818_v6 = vmul.f32 %v4769_v16, %v1782_v25  ;;  %v5152_v43 = vadd.f32 %v1816_v61, %v6064_v13  ;;  %v1819_v1 = vmul.f32 %v4769_v16, %v1783_v48  ;;  %v6065_v25 = vld [vmem:[#allocation50_spill] sm:$0xff]  ;;  %v6066_v48 = vld [vmem:[#allocation47_spill] sm:$0xff] }
 0x23d   :  { %v1878_v42 = vadd.f32 %v1877_v50, %v5141_v62  ;;  %v1917_v37 = vmul.f32 %v5135_v32, %v5135_v32  ;;  %v1918_v4 = vmul.f32 %v5141_v62, %v5141_v62  ;;  %v1424_v7 = vmul.f32 %v4205_v46, %v1388_v5 }
 0x23e   :  { %v1947_v33 = vadd.f32 %v1946_v23, %v1916_v36  ;;  %v5160_v9 = vadd.f32 %v1818_v6, %v1750_v12  ;;  %v1357_v61 = vadd.f32 %v1325_v20, %v1256_v21  ;;  %v5164_v58 = vadd.f32 %v1819_v1, %v1751_v40  ;;  %v1787_v20 = vld [vmem:[#allocation2 + $0x306] sm:$0xff]  ;;  %v1589_v23 = vld [vmem:[#allocation2 + $0x335] sm:$0xff] }
 0x23f   :  { %v1879_v8 = vadd.f32 %v1878_v42, %v5152_v43  ;;  %v1920_v56 = vmul.f32 %v5148_v15, %v5148_v15  ;;  %v1820_v22 = vmul.f32 %v4769_v16, %v1784_v3  ;;  %v1425_v36 = vmul.f32 %v4205_v46, %v1389_v44  ;;  %v6067_v6 = vld [vmem:[#allocation48_spill] sm:$0xff] }
 0x240   :  { %v1948_v27 = vadd.f32 %v1947_v33, %v1917_v37  ;;  %v1456_v18 = vadd.f32 %v1424_v7, %v6065_v25  ;;  %v1525_v54 = vmul.f32 %v4210_v47, %v1289_v19  ;;  %v1821_v41 = vmul.f32 %v4769_v16, %v1785_v53  ;;  %v1590_v42 = vld [vmem:[#allocation2 + $0x345] sm:$0xff] }
 0x241   :  { %v1880_v57 = vadd.f32 %v1879_v8, %v5148_v15  ;;  %v5175_v12 = vadd.f32 %v1820_v22, %v6066_v48  ;;  %v1919_v51 = vmul.f32 %v5152_v43, %v5152_v43  ;;  %v1457_v50 = vadd.f32 %v1425_v36, %v1357_v61  ;;  %v6068_v37 = vld [vmem:[#allocation45_spill] sm:$0xff] }
 0x242   :  { %v1949_v21 = vadd.f32 %v1948_v27, %v1918_v4  ;;  %v1526_v46 = vmul.f32 %v4210_v47, %v1490_v59  ;;  %v1624_v40 = vmul.f32 %v4392_v38, %v1588_v10  ;;  %v5183_v13 = vadd.f32 %v1821_v41, %v6067_v6  ;;  %v1788_v10 = vld [vmem:[#allocation2 + $0x316] sm:$0xff] }
 0x243   :  { %v1881_v5 = vadd.f32 %v1880_v57, %v5160_v9  ;;  %v1557_v1 = vadd.f32 %v1525_v54, %v1456_v18  ;;  %v1725_v4 = vmul.f32 %v4400_v0, %v1289_v19  ;;  %v1822_v53 = vmul.f32 %v4769_v16, %v1786_v26  ;;  %v1691_v36 = vld [vmem:[#allocation2 + $0x373] sm:$0xff]  ;;  %v1789_v54 = vld [vmem:[#allocation2 + $0x326] sm:$0xff] }
 0x244   :  { %v1950_v3 = vadd.f32 %v1949_v21, %v1919_v51  ;;  %v1656_v44 = vadd.f32 %v1624_v40, %v6068_v37  ;;  %v1823_v47 = vmul.f32 %v4769_v16, %v1787_v20  ;;  %v1921_v7 = vmul.f32 %v5160_v9, %v5160_v9  ;;  %v6069_v51 = vld [vmem:[#allocation51_spill] sm:$0xff]  ;;  %v6071_v37 = vld [vmem:[#allocation53_spill] sm:$0xff] }
 0x245   :  { %v1882_v33 = vadd.f32 %v1881_v5, %v5164_v58  ;;  %v1923_v8 = vmul.f32 %v5175_v12, %v5175_v12  ;;  %v1625_v22 = vmul.f32 %v4392_v38, %v1589_v23  ;;  %v1558_v27 = vadd.f32 %v1526_v46, %v1457_v50  ;;  %v6070_v5 = vld [vmem:[#allocation52_spill] sm:$0xff] }
 0x246   :  { %v1951_v61 = vadd.f32 %v1950_v3, %v1920_v56  ;;  %v1626_v25 = vmul.f32 %v4392_v38, %v1590_v42  ;;  %v1726_v18 = vmul.f32 %v4400_v0, %v1490_v59  ;;  %v1922_v57 = vmul.f32 %v5164_v58, %v5164_v58  ;;  %v1790_v3 = vld [vmem:[#allocation2 + $0x336] sm:$0xff] }
 0x247   :  { %v1883_v19 = vadd.f32 %v1882_v33, %v5175_v12  ;;  %v1657_v56 = vadd.f32 %v1625_v22, %v1557_v1  ;;  %v1757_v48 = vadd.f32 %v1725_v4, %v1656_v44  ;;  %v5201_v21 = vadd.f32 %v1822_v53, %v6069_v51 }
 0x248   :  { %v1952_v41 = vadd.f32 %v1951_v61, %v1921_v7  ;;  %v1824_v20 = vmul.f32 %v4769_v16, %v1788_v10  ;;  %v1924_v50 = vmul.f32 %v5183_v13, %v5183_v13  ;;  %v1727_v38 = vmul.f32 %v4400_v0, %v1691_v36  ;;  %v1791_v0 = vld [vmem:[#allocation2 + $0x346] sm:$0xff] }
 0x249   :  { %v1884_v26 = vadd.f32 %v1883_v19, %v5183_v13  ;;  %v1658_v46 = vadd.f32 %v1626_v25, %v1558_v27  ;;  %v1825_v40 = vmul.f32 %v4769_v16, %v1789_v54  ;;  %v5210_v23 = vadd.f32 %v1823_v47, %v6070_v5 }
 0x24a   :  { %v1953_v59 = vadd.f32 %v1952_v41, %v1922_v57  ;;  %v1758_v1 = vadd.f32 %v1726_v18, %v1657_v56  ;;  %v5214_v44 = vadd.f32 %v1824_v20, %v6071_v37  ;;  %v1925_v53 = vmul.f32 %v5201_v21, %v5201_v21 }
 0x24b   :  { %v1885_v6 = vadd.f32 %v1884_v26, %v5201_v21  ;;  %v5216_v4 = vadd.f32 %v1825_v40, %v1757_v48  ;;  %v1826_v47 = vmul.f32 %v4769_v16, %v1790_v3  ;;  %v1759_v61 = vadd.f32 %v1727_v38, %v1658_v46 }
 0x24c   :  { %v1954_v42 = vadd.f32 %v1953_v59, %v1923_v8  ;;  %v1926_v8 = vmul.f32 %v5210_v23, %v5210_v23  ;;  %v1827_v27 = vmul.f32 %v4769_v16, %v1791_v0  ;;  %v1927_v25 = vmul.f32 %v5214_v44, %v5214_v44 }
 0x24d   :  { %v1886_v33 = vadd.f32 %v1885_v6, %v5210_v23  ;;  %v5226_v36 = vadd.f32 %v1826_v47, %v1758_v1  ;;  %v1928_v18 = vmul.f32 %v5216_v4, %v5216_v4 }
 0x24e   :  { %v1955_v7 = vadd.f32 %v1954_v42, %v1924_v50  ;;  %v5233_v57 = vadd.f32 %v1827_v27, %v1759_v61 }
 0x24f   :  { %v1887_v22 = vadd.f32 %v1886_v33, %v5214_v44  ;;  %v1929_v16 = vmul.f32 %v5226_v36, %v5226_v36 }
 0x250   :  { %v1956_v10 = vadd.f32 %v1955_v7, %v1925_v53  ;;  %v1930_v20 = vmul.f32 %v5233_v57, %v5233_v57 }
 0x251   :  { %v1888_v19 = vadd.f32 %v1887_v22, %v5216_v4 }
 0x252   :  { %v1957_v54 = vadd.f32 %v1956_v10, %v1926_v8  ;;  %v2006_v10 = vld [vmem:[#allocation15] sm:$0x1] }
 0x253   :  { %v1889_v41 = vadd.f32 %v1888_v19, %v5226_v36 }
 0x254   :  { %v1958_v56 = vadd.f32 %v1957_v54, %v1927_v25  ;;  %v6072_v54 = vld [vmem:[#allocation25_spill] sm:$0xff] }
 0x255   :  { %v1890_v48 = vadd.f32 %v1889_v41, %v5233_v57 }
 0x256   :  { %v1959_v51 = vadd.f32 %v1958_v56, %v1928_v18 }
 0x257   :  { %v1891_v26 = vrot.slane %v1890_v48, 4 }
 0x258   :  { %v1960_v50 = vadd.f32 %v1959_v51, %v1929_v16  ;;  %v5256_v16 = vld [vmem:[#allocation17] ss:$0 sm:$0xff] }
 0x259   :  { %v1892_v38 = vadd.f32 %v1891_v26, %v1890_v48 }
 0x25a   :  { %v1961_v59 = vadd.f32 %v1960_v50, %v1930_v20 }
 0x25b   :  { %v1893_v46 = vrot.slane %v1892_v38, 2 }
 0x25c   :  { %v1962_v40 = vrot.slane %v1961_v59, 4 }
 0x25d   :  { %v1894_v5 = vadd.f32 %v1893_v46, %v1892_v38 }
 0x25e   :  { %v1963_v6 = vadd.f32 %v1962_v40, %v1961_v59 }
 0x25f   :  { %v1895_v3 = vrot.slane %v1894_v5, 1 }
 0x260   :  { %v1964_v42 = vrot.slane %v1963_v6, 2 }
 0x261   :  { %v1896_v1 = vadd.f32 %v1895_v3, %v1894_v5 }
 0x262   :  { %v1965_v37 = vadd.f32 %v1964_v42, %v1963_v6 }
 0x263   :  { %v5241_v33 = vmul.f32 0.00390625, %v1896_v1 }
 0x264   :  { %v1966_v0 = vrot.slane %v1965_v37, 1 }
 0x265   :  { %v1969_v7 = vmul.f32 %v5241_v33, %v5241_v33  ;;  %v1974_v25 = vsub.f32 %v4984_v34, %v5241_v33  ;;  %v1975_v18 = vsub.f32 %v4974_v63, %v5241_v33  ;;  %v1976_v56 = vsub.f32 %v4989_v14, %v5241_v33 }
 0x266   :  { %v1967_v53 = vadd.f32 %v1966_v0, %v1965_v37  ;;  %v1977_v48 = vsub.f32 %v5001_v52, %v5241_v33  ;;  %v1978_v51 = vsub.f32 %v5009_v35, %v5241_v33  ;;  %v1979_v34 = vsub.f32 %v5012_v49, %v5241_v33 }
 0x267   :  { %v1980_v5 = vsub.f32 %v5029_v60, %v5241_v33  ;;  %v1981_v6 = vsub.f32 %v5040_v24, %v5241_v33  ;;  %v1982_v1 = vsub.f32 %v5046_v31, %v5241_v33  ;;  %v1983_v37 = vsub.f32 %v5048_v17, %v5241_v33 }
 0x268   :  { %v1968_v47 = vmul.f32 0.00390625, %v1967_v53 }
 0x26a   :  { %v1970_v61 = vsub.f32 %v1968_v47, %v1969_v7 }
 0x26c   :  { %v1971_v22 = vmax.f32 %v1970_v61, 0.0 }
 0x26e   :  { %v1972_v8 = vadd.f32 1e-05, %v1971_v22  ;;  %v1984_v22 = vsub.f32 %v5065_v45, %v5241_v33 }
 0x270   :  { %3414 = vrsqrt.f32 %v1972_v8  ;;  %v1985_v8 = vsub.f32 %v5075_v28, %v5241_v33 }
 0x27d   :  { %v3415_v27 = vpop.eup %3414 }
 0x27e   :  { %v2007_v19 = vmul.f32 %v3415_v27, %v2006_v10  ;;  %v1986_v10 = vsub.f32 %v5084_v55, %v5241_v33  ;;  %v1987_v27 = vsub.f32 %v5078_v39, %v5241_v33 }
 0x280   :  { %v5250_v41 = vrot.slane %v2007_v19, %v6072_v54 }
 0x282   :  { %v2014_v26 = vmul.f32 %v5250_v41, %v1974_v25  ;;  %v2015_v63 = vmul.f32 %v5250_v41, %v1975_v18  ;;  %v2016_v20 = vmul.f32 %v5250_v41, %v1976_v56  ;;  %v2017_v50 = vmul.f32 %v5250_v41, %v1977_v48 }
 0x283   :  { %v2018_v14 = vmul.f32 %v5250_v41, %v1978_v51  ;;  %v2019_v52 = vmul.f32 %v5250_v41, %v1979_v34  ;;  %v2020_v0 = vmul.f32 %v5250_v41, %v1980_v5  ;;  %v2021_v53 = vmul.f32 %v5250_v41, %v1981_v6 }
 0x284   :  { %v2053_v38 = vadd.f32 %v5256_v16, %v2014_v26  ;;  %v2054_v59 = vadd.f32 %v5256_v16, %v2015_v63  ;;  %v2055_v35 = vadd.f32 %v5256_v16, %v2016_v20  ;;  %v2056_v49 = vadd.f32 %v5256_v16, %v2017_v50 }
 0x285   :  { %v2057_v46 = vadd.f32 %v5256_v16, %v2018_v14  ;;  %v2058_v40 = vadd.f32 %v5256_v16, %v2019_v52  ;;  %v2022_v47 = vmul.f32 %v5250_v41, %v1982_v1  ;;  %v2023_v60 = vmul.f32 %v5250_v41, %v1983_v37 }
 0x286   :  { %v2085_v3 = vpack.c.bf16 %v2054_v59, %v2053_v38  ;;  %v2086_v42 = vpack.c.bf16 %v2056_v49, %v2055_v35  ;;  %v2059_v24 = vadd.f32 %v5256_v16, %v2020_v0  ;;  %v2060_v61 = vadd.f32 %v5256_v16, %v2021_v53 }
 0x287   :  { %v2087_v7 = vpack.c.bf16 %v2058_v40, %v2057_v46  ;;  %v2061_v31 = vadd.f32 %v5256_v16, %v2022_v47  ;;  %v2062_v17 = vadd.f32 %v5256_v16, %v2023_v60  ;;  %v2024_v25 = vmul.f32 %v5250_v41, %v1984_v22 }
 0x288   :  { %3351 = vmatprep.mubr.bf16.mxu1 %v2085_v3  ;;  %v2088_v19 = vpack.c.bf16 %v2060_v61, %v2059_v24  ;;  %v2025_v18 = vmul.f32 %v5250_v41, %v1985_v8  ;;  %v2026_v56 = vmul.f32 %v5250_v41, %v1986_v10  ;;  %v2027_v48 = vmul.f32 %v5250_v41, %v1987_v27 }
 0x289   :  { %3352 = vmatmul.mubr.bf16.vlgmr.msra.gmra.mxu1 %v2086_v42  ;;  %v2089_v54 = vpack.c.bf16 %v2062_v17, %v2061_v31  ;;  %v2063_v45 = vadd.f32 %v5256_v16, %v2024_v25  ;;  %v1988_v51 = vsub.f32 %v5100_v30, %v5241_v33  ;;  %v1989_v34 = vsub.f32 %v5110_v2, %v5241_v33 }
 0x28a   :  { %3355 = vmatprep.mubr.bf16.mxu1 %v2087_v7  ;;  %v2064_v28 = vadd.f32 %v5256_v16, %v2025_v18  ;;  %v2065_v55 = vadd.f32 %v5256_v16, %v2026_v56  ;;  %v2066_v39 = vadd.f32 %v5256_v16, %v2027_v48  ;;  %v1990_v26 = vsub.f32 %v5120_v29, %v5241_v33 }
 0x28b   :  { %v1991_v63 = vsub.f32 %v5117_v11, %v5241_v33  ;;  %v2028_v50 = vmul.f32 %v5250_v41, %v1988_v51  ;;  %v2029_v14 = vmul.f32 %v5250_v41, %v1989_v34  ;;  %v1992_v35 = vsub.f32 %v5135_v32, %v5241_v33 }
 0x28c   :  { %v2090_v20 = vpack.c.bf16 %v2064_v28, %v2063_v45  ;;  %v2091_v52 = vpack.c.bf16 %v2066_v39, %v2065_v55  ;;  %v2030_v38 = vmul.f32 %v5250_v41, %v1990_v26  ;;  %v1993_v49 = vsub.f32 %v5141_v62, %v5241_v33 }
 0x28d   :  { %v2031_v59 = vmul.f32 %v5250_v41, %v1991_v63  ;;  %v2067_v30 = vadd.f32 %v5256_v16, %v2028_v50  ;;  %v2068_v2 = vadd.f32 %v5256_v16, %v2029_v14  ;;  %v1994_v46 = vsub.f32 %v5152_v43, %v5241_v33  ;;  %v5378_v14 = vld [vmem:[#allocation14] ss:$0 sm:$0xff] }
 0x28e   :  { %v2069_v29 = vadd.f32 %v5256_v16, %v2030_v38  ;;  %v1995_v40 = vsub.f32 %v5148_v15, %v5241_v33  ;;  %v2032_v6 = vmul.f32 %v5250_v41, %v1992_v35  ;;  %v2033_v3 = vmul.f32 %v5250_v41, %v1993_v49 }
 0x28f   :  { %v2070_v11 = vadd.f32 %v5256_v16, %v2031_v59  ;;  %v2092_v5 = vpack.c.bf16 %v2068_v2, %v2067_v30  ;;  %v2034_v1 = vmul.f32 %v5250_v41, %v1994_v46  ;;  %v1996_v0 = vsub.f32 %v5160_v9, %v5241_v33 }
 0x290   :  { %v2035_v37 = vmul.f32 %v5250_v41, %v1995_v40  ;;  %v2071_v32 = vadd.f32 %v5256_v16, %v2032_v6  ;;  %v2072_v62 = vadd.f32 %v5256_v16, %v2033_v3  ;;  %v1997_v53 = vsub.f32 %v5164_v58, %v5241_v33 }
 0x291   :  { %3356 = vmatmul.mubr.bf16.gmra.mxu1 %v2088_v19  ;;  %v2093_v42 = vpack.c.bf16 %v2070_v11, %v2069_v29  ;;  %v2073_v43 = vadd.f32 %v5256_v16, %v2034_v1  ;;  %v1998_v7 = vsub.f32 %v5175_v12, %v5241_v33  ;;  %v1999_v47 = vsub.f32 %v5183_v13, %v5241_v33 }
 0x292   :  { %3359 = vmatprep.mubr.bf16.mxu1 %v2089_v54  ;;  %v2074_v15 = vadd.f32 %v5256_v16, %v2035_v37  ;;  %v2094_v60 = vpack.c.bf16 %v2072_v62, %v2071_v32  ;;  %v2036_v24 = vmul.f32 %v5250_v41, %v1996_v0  ;;  %v2037_v61 = vmul.f32 %v5250_v41, %v1997_v53 }
 0x293   :  { %v2038_v17 = vmul.f32 %v5250_v41, %v1998_v7  ;;  %v2039_v22 = vmul.f32 %v5250_v41, %v1999_v47  ;;  %v2000_v8 = vsub.f32 %v5201_v21, %v5241_v33  ;;  %v2001_v10 = vsub.f32 %v5210_v23, %v5241_v33 }
 0x294   :  { %v2095_v31 = vpack.c.bf16 %v2074_v15, %v2073_v43  ;;  %v2075_v9 = vadd.f32 %v5256_v16, %v2036_v24  ;;  %v2076_v58 = vadd.f32 %v5256_v16, %v2037_v61  ;;  %v2002_v27 = vsub.f32 %v5214_v44, %v5241_v33 }
 0x295   :  { %v2077_v12 = vadd.f32 %v5256_v16, %v2038_v17  ;;  %v2078_v13 = vadd.f32 %v5256_v16, %v2039_v22  ;;  %v2003_v19 = vsub.f32 %v5216_v4, %v5241_v33  ;;  %v2040_v18 = vmul.f32 %v5250_v41, %v2000_v8 }
 0x296   :  { %v2096_v25 = vpack.c.bf16 %v2076_v58, %v2075_v9  ;;  %v2041_v54 = vmul.f32 %v5250_v41, %v2001_v10  ;;  %v2042_v48 = vmul.f32 %v5250_v41, %v2002_v27  ;;  %v2004_v28 = vsub.f32 %v5226_v36, %v5241_v33 }
 0x297   :  { %v2097_v56 = vpack.c.bf16 %v2078_v13, %v2077_v12  ;;  %v2043_v45 = vmul.f32 %v5250_v41, %v2003_v19  ;;  %v2079_v21 = vadd.f32 %v5256_v16, %v2040_v18  ;;  %v2005_v55 = vsub.f32 %v5233_v57, %v5241_v33 }
 0x298   :  { %v2080_v23 = vadd.f32 %v5256_v16, %v2041_v54  ;;  %v2081_v44 = vadd.f32 %v5256_v16, %v2042_v48  ;;  %v2044_v51 = vmul.f32 %v5250_v41, %v2004_v28 }
 0x299   :  { %3360 = vmatmul.mubr.bf16.gmra.mxu1 %v2090_v20  ;;  %v2082_v4 = vadd.f32 %v5256_v16, %v2043_v45  ;;  %v2045_v34 = vmul.f32 %v5250_v41, %v2005_v55 }
 0x29a   :  { %3363 = vmatprep.mubr.bf16.mxu1 %v2091_v52  ;;  %v2098_v39 = vpack.c.bf16 %v2080_v23, %v2079_v21  ;;  %v2083_v63 = vadd.f32 %v5256_v16, %v2044_v51 }
 0x29b   :  { %v2099_v26 = vpack.c.bf16 %v2082_v4, %v2081_v44  ;;  %v2084_v20 = vadd.f32 %v5256_v16, %v2045_v34 }
 0x29d   :  { %v2100_v50 = vpack.c.bf16 %v2084_v20, %v2083_v63 }
 0x2a1   :  { %3364 = vmatmul.mubr.bf16.gmra.mxu1 %v2092_v5 }
 0x2a2   :  { %3367 = vmatprep.mubr.bf16.mxu1 %v2093_v42 }
 0x2a9   :  { %3368 = vmatmul.mubr.bf16.gmra.mxu1 %v2094_v60 }
 0x2aa   :  { %3371 = vmatprep.mubr.bf16.mxu1 %v2095_v31 }
 0x2b1   :  { %3372 = vmatmul.mubr.bf16.gmra.mxu1 %v2096_v25 }
 0x2b2   :  { %3375 = vmatprep.mubr.bf16.mxu1 %v2097_v56 }
 0x2b9   :  { %3376 = vmatmul.mubr.bf16.gmra.mxu1 %v2098_v39 }
 0x2ba   :  { %3379 = vmatprep.mubr.bf16.mxu1 %v2099_v26 }
 0x2c1   :  { %3380 = vmatmul.mubr.bf16.gmra.mxu1 %v2100_v50 }
 0x349   :  { %v3353_v36 = vpop.f32.mrf.mxu1 }
 0x34a   :  { %v2215_v52 = vadd.f32 %v3353_v36, %v5378_v14 }
 0x34b   :  { %v2206_v57 = vpop.f32.mrf.mxu1 }
 0x34c   :  { %v5381_v33 = vmul.f32 0.70710677, %v2215_v52  ;;  %v2207_v38 = vadd.f32 %v5378_v14, %v2206_v57  ;;  %v5411_v8 = vmul.f32 0.5, %v2215_v52 }
 0x34d   :  { %v3354_v41 = vpop.f32.mrf.mxu1 }
 0x34e   :  { %v2367_v59 = vand.u32 2147483647, %v5381_v33  ;;  %v5385_v30 = vmul.f32 0.70710677, %v2207_v38  ;;  %v2218_v2 = vadd.f32 %v3354_v41, %v5378_v14  ;;  %v5418_v56 = vmul.f32 0.5, %v2207_v38 }
 0x34f   :  { %v2209_v16 = vpop.f32.mrf.mxu1  ;;  %vm2975_vm0 = vcmp.ge.f32.partialorder %v5381_v33, 0.0 }
 0x350   :  { %v2399_v29 = vmul.f32 0.3275911, %v2367_v59  ;;  %v2783_v11 = vsub.f32 0.0, %v2367_v59  ;;  %v2365_v35 = vand.u32 2147483647, %v5385_v30  ;;  %v5392_v46 = vadd.f32 %v5378_v14, %v2209_v16 }
 0x351   :  { %v5389_v49 = vmul.f32 0.70710677, %v2218_v2  ;;  %v3357_v40 = vpop.f32.mrf.mxu1  ;;  %v5427_v20 = vmul.f32 0.5, %v2218_v2  ;;  %vm2973_vm1 = vcmp.ge.f32.partialorder %v5385_v30, 0.0 }
 0x352   :  { %v2431_v5 = vadd.f32 1.0, %v2399_v29  ;;  %v2815_v6 = vmul.f32 %v2783_v11, %v2367_v59  ;;  %v2397_v3 = vmul.f32 0.3275911, %v2365_v35  ;;  %v2781_v42 = vsub.f32 0.0, %v2365_v35 }
 0x353   :  { %v2368_v1 = vand.u32 2147483647, %v5389_v49  ;;  %v5396_v37 = vmul.f32 0.70710677, %v5392_v46  ;;  %v2222_v32 = vpop.f32.mrf.mxu1  ;;  %v5400_v47 = vadd.f32 %v3357_v40, %v5378_v14  ;;  %v5436_v16 = vmul.f32 0.5, %v5392_v46 }
 0x354   :  { %3416 = vrcp.f32 %v2431_v5  ;;  %v2429_v62 = vadd.f32 1.0, %v2397_v3  ;;  %v2813_v43 = vmul.f32 %v2781_v42, %v2365_v35  ;;  %v2849_v7 = vmul.f32 1.442695, %v2815_v6 }
 0x355   :  { %v2400_v15 = vmul.f32 0.3275911, %v2368_v1  ;;  %v2784_v0 = vsub.f32 0.0, %v2368_v1  ;;  %v2366_v53 = vand.u32 2147483647, %v5396_v37  ;;  %v5403_v60 = vadd.f32 %v5378_v14, %v2222_v32  ;;  %v3358_v17 = vpop.f32.mrf.mxu1 }
 0x356   :  { %3418 = vrcp.f32 %v2429_v62  ;;  %v5406_v9 = vmul.f32 0.70710677, %v5400_v47  ;;  %v2845_v58 = vmul.f32 1.442695, %v2813_v43  ;;  %v5416_v18 = vadd.f32 %v3358_v17, %v5378_v14 }
 0x357   :  { %v2432_v24 = vadd.f32 1.0, %v2400_v15  ;;  %v2816_v61 = vmul.f32 %v2784_v0, %v2368_v1  ;;  %v2398_v31 = vmul.f32 0.3275911, %v2366_v53  ;;  %v2782_v22 = vsub.f32 0.0, %v2366_v53  ;;  %v2225_v54 = vpop.f32.mrf.mxu1 }
 0x358   :  { %v5409_v13 = vmul.f32 0.70710677, %v5403_v60  ;;  %v2371_v27 = vand.u32 2147483647, %v5406_v9  ;;  %v5421_v44 = vmul.f32 0.70710677, %v5416_v18  ;;  %v5424_v39 = vadd.f32 %v5378_v14, %v2225_v54 }
 0x359   :  { %3420 = vrcp.f32 %v2432_v24  ;;  %v2430_v12 = vadd.f32 1.0, %v2398_v31  ;;  %v2814_v10 = vmul.f32 %v2782_v22, %v2366_v53  ;;  %v2851_v19 = vmul.f32 1.442695, %v2816_v61  ;;  %v3361_v63 = vpop.f32.mrf.mxu1 }
 0x35a   :  { %3422 = vpow2.f32 %v2849_v7  ;;  %v2369_v25 = vand.u32 2147483647, %v5409_v13  ;;  %v2403_v48 = vmul.f32 0.3275911, %v2371_v27  ;;  %v2787_v45 = vsub.f32 0.0, %v2371_v27 }
 0x35b   :  { %3424 = vrcp.f32 %v2430_v12  ;;  %v2847_v4 = vmul.f32 1.442695, %v2814_v10  ;;  %v2372_v26 = vand.u32 2147483647, %v5421_v44  ;;  %v5430_v36 = vmul.f32 0.70710677, %v5424_v39  ;;  %v2238_v40 = vpop.f32.mrf.mxu1 }
 0x35c   :  { %3426 = vpow2.f32 %v2845_v58  ;;  %v2401_v21 = vmul.f32 0.3275911, %v2369_v25  ;;  %v2785_v23 = vsub.f32 0.0, %v2369_v25  ;;  %v2435_v28 = vadd.f32 1.0, %v2403_v48 }
 0x35d   :  { %v2819_v55 = vmul.f32 %v2787_v45, %v2371_v27  ;;  %3428 = vpow2.f32 %v2851_v19  ;;  %v2404_v38 = vmul.f32 0.3275911, %v2372_v26  ;;  %v2788_v41 = vsub.f32 0.0, %v2372_v26  ;;  %v3362_v54 = vpop.f32.mrf.mxu1 }
 0x35e   :  { %v2433_v51 = vadd.f32 1.0, %v2401_v21  ;;  %v2817_v34 = vmul.f32 %v2785_v23, %v2369_v25  ;;  %3430 = vrcp.f32 %v2435_v28  ;;  %v2370_v2 = vand.u32 2147483647, %v5430_v36 }
 0x35f   :  { %v2857_v50 = vmul.f32 1.442695, %v2819_v55  ;;  %v2436_v29 = vadd.f32 1.0, %v2404_v38  ;;  %v2820_v11 = vmul.f32 %v2788_v41, %v2372_v26  ;;  %v5440_v35 = vadd.f32 %v3361_v63, %v5378_v14 }
 0x360   :  { %3432 = vrcp.f32 %v2433_v51  ;;  %v2853_v57 = vmul.f32 1.442695, %v2817_v34  ;;  %v2402_v3 = vmul.f32 0.3275911, %v2370_v2  ;;  %v2786_v42 = vsub.f32 0.0, %v2370_v2 }
 0x361   :  { %v5432_v52 = vpop.eup %3416  ;;  %3434 = vpow2.f32 %v2847_v4  ;;  %v2859_v46 = vmul.f32 1.442695, %v2820_v11  ;;  %v5446_v32 = vmul.f32 0.70710677, %v5440_v35  ;;  %v5452_v53 = vadd.f32 %v5378_v14, %v2238_v40 }
 0x362   :  { %v2495_v59 = vmul.f32 1.0614054, %v5432_v52  ;;  %3436 = vpow2.f32 %v2857_v50  ;;  %v2434_v15 = vadd.f32 1.0, %v2402_v3  ;;  %v2818_v0 = vmul.f32 %v2786_v42, %v2370_v2  ;;  %v2241_v2 = vpop.f32.mrf.mxu1 }
 0x363   :  { %v5442_v5 = vpop.eup %3418  ;;  %3438 = vpow2.f32 %v2853_v57  ;;  %v2375_v61 = vand.u32 2147483647, %v5446_v32  ;;  %v5457_v22 = vmul.f32 0.5, %v5400_v47  ;;  %v5467_v47 = vmul.f32 0.70710677, %v5452_v53 }
 0x364   :  { %v2527_v6 = vadd.f32 -1.4531521, %v2495_v59  ;;  %v2493_v1 = vmul.f32 1.0614054, %v5442_v5  ;;  %3440 = vrcp.f32 %v2436_v29  ;;  %v2855_v58 = vmul.f32 1.442695, %v2818_v0 }
 0x365   :  { %3442 = vpow2.f32 %v2859_v46  ;;  %v2407_v19 = vmul.f32 0.3275911, %v2375_v61  ;;  %v2791_v25 = vsub.f32 0.0, %v2375_v61  ;;  %v2373_v63 = vand.u32 2147483647, %v5467_v47 }
 0x366   :  { %v5448_v62 = vpop.eup %3420  ;;  %v2559_v43 = vmul.f32 %v5432_v52, %v2527_v6  ;;  %v2525_v7 = vadd.f32 -1.4531521, %v2493_v1  ;;  %3444 = vrcp.f32 %v2434_v15  ;;  %v5474_v50 = vadd.f32 %v3362_v54, %v5378_v14 }
 0x367   :  { %v2496_v24 = vmul.f32 1.0614054, %v5448_v62  ;;  %v3423_v31 = vpop.eup %3422  ;;  %3446 = vpow2.f32 %v2855_v58  ;;  %v2439_v28 = vadd.f32 1.0, %v2407_v19  ;;  %v2823_v55 = vmul.f32 %v2791_v25, %v2375_v61 }
 0x368   :  { %v2591_v17 = vadd.f32 1.4214138, %v2559_v43  ;;  %v5459_v12 = vpop.eup %3424  ;;  %v2557_v10 = vmul.f32 %v5442_v5, %v2525_v7  ;;  %v2405_v3 = vmul.f32 0.3275911, %v2373_v63  ;;  %v5491_v61 = vadd.f32 %v5378_v14, %v2241_v2 }
 0x369   :  { %v2528_v27 = vadd.f32 -1.4531521, %v2496_v24  ;;  %v5462_v48 = vpop.eup %3426  ;;  %v2494_v21 = vmul.f32 1.0614054, %v5459_v12  ;;  %3448 = vrcp.f32 %v2439_v28  ;;  %v2865_v59 = vmul.f32 1.442695, %v2823_v55 }
 0x36a   :  { %v2623_v45 = vmul.f32 %v5432_v52, %v2591_v17  ;;  %v2589_v23 = vadd.f32 1.4214138, %v2557_v10  ;;  %v5470_v51 = vpop.eup %3428  ;;  %v2437_v19 = vadd.f32 1.0, %v2405_v3  ;;  %vm2976_vm2 = vcmp.ge.f32.partialorder %v5389_v49, 0.0 }
 0x36b   :  { %v2560_v4 = vmul.f32 %v5448_v62, %v2528_v27  ;;  %v2526_v26 = vadd.f32 -1.4531521, %v2494_v21  ;;  %v5476_v57 = vpop.eup %3430  ;;  %3450 = vpow2.f32 %v2865_v59  ;;  %vm2974_vm3 = vcmp.ge.f32.partialorder %v5396_v37, 0.0 }
 0x36c   :  { %v2655_v34 = vadd.f32 -0.28449672, %v2623_v45  ;;  %v2621_v38 = vmul.f32 %v5442_v5, %v2589_v23  ;;  %v2499_v6 = vmul.f32 1.0614054, %v5476_v57  ;;  %v2789_v23 = vsub.f32 0.0, %v2373_v63 }
 0x36d   :  { %v2592_v41 = vadd.f32 1.4214138, %v2560_v4  ;;  %v5479_v29 = vpop.eup %3432  ;;  %v2558_v40 = vmul.f32 %v5459_v12, %v2526_v26  ;;  %3452 = vrcp.f32 %v2437_v19  ;;  %vm2979_vm4 = vcmp.ge.f32.partialorder %v5406_v9, 0.0 }
 0x36e   :  { %v2687_v11 = vmul.f32 %v5432_v52, %v2655_v34  ;;  %v5484_v42 = vpop.eup %3434  ;;  %v2653_v1 = vadd.f32 -0.28449672, %v2621_v38  ;;  %v2497_v43 = vmul.f32 1.0614054, %v5479_v29  ;;  %v2531_v24 = vadd.f32 -1.4531521, %v2499_v6 }
 0x36f   :  { %v2624_v46 = vmul.f32 %v5448_v62, %v2592_v41  ;;  %v5488_v15 = vpop.eup %3436  ;;  %v2590_v7 = vadd.f32 1.4214138, %v2558_v40  ;;  %v2821_v19 = vmul.f32 %v2789_v23, %v2373_v63  ;;  %vm2977_vm5 = vcmp.ge.f32.partialorder %v5409_v13, 0.0 }
 0x370   :  { %v2719_v0 = vadd.f32 0.2548296, %v2687_v11  ;;  %v5493_v17 = vpop.eup %3438  ;;  %v2685_v58 = vmul.f32 %v5442_v5, %v2653_v1  ;;  %v2529_v27 = vadd.f32 -1.4531521, %v2497_v43  ;;  %v2563_v21 = vmul.f32 %v5476_v57, %v2531_v24 }
 0x371   :  { %v2656_v10 = vadd.f32 -0.28449672, %v2624_v46  ;;  %v5497_v25 = vpop.eup %3440  ;;  %v2622_v45 = vmul.f32 %v5459_v12, %v2590_v7  ;;  %v5572_v13 = vmul.f32 0.70710677, %v5474_v50  ;;  %vm2980_vm6 = vcmp.ge.f32.partialorder %v5421_v44, 0.0 }
 0x372   :  { %v2751_v54 = vmul.f32 %v5432_v52, %v2719_v0  ;;  %v2717_v4 = vadd.f32 0.2548296, %v2685_v58  ;;  %v2561_v55 = vmul.f32 %v5479_v29, %v2529_v27  ;;  %v2500_v34 = vmul.f32 1.0614054, %v5497_v25  ;;  %v5505_v26 = vpop.eup %3442 }
 0x373   :  { %v2688_v28 = vmul.f32 %v5448_v62, %v2656_v10  ;;  %v2654_v41 = vadd.f32 -0.28449672, %v2622_v45  ;;  %v2595_v59 = vadd.f32 1.4214138, %v2563_v21  ;;  %v5508_v52 = vpop.eup %3444  ;;  %vm2978_vm7 = vcmp.ge.f32.partialorder %v5430_v36, 0.0 }
 0x374   :  { %v2911_v38 = vmul.f32 %v3423_v31, %v2751_v54  ;;  %v2749_v2 = vmul.f32 %v5442_v5, %v2717_v4  ;;  %v2593_v40 = vadd.f32 1.4214138, %v2561_v55  ;;  %v2532_v6 = vadd.f32 -1.4531521, %v2500_v34  ;;  %v5515_v43 = vpop.eup %3446 }
 0x375   :  { %v2720_v11 = vadd.f32 0.2548296, %v2688_v28  ;;  %v2686_v1 = vmul.f32 %v5459_v12, %v2654_v41  ;;  %v2627_v46 = vmul.f32 %v5476_v57, %v2595_v59  ;;  %v2498_v31 = vmul.f32 1.0614054, %v5508_v52 }
 0x376   :  { %v2943_v3 = vsub.f32 1.0, %v2911_v38  ;;  %v2909_v0 = vmul.f32 %v5462_v48, %v2749_v2  ;;  %v2625_v5 = vmul.f32 %v5479_v29, %v2593_v40  ;;  %v2564_v24 = vmul.f32 %v5497_v25, %v2532_v6  ;;  %v5523_v28 = vpop.eup %3448 }
 0x377   :  { %v2752_v7 = vmul.f32 %v5448_v62, %v2720_v11  ;;  %v2718_v10 = vadd.f32 0.2548296, %v2686_v1  ;;  %v2659_v27 = vadd.f32 -0.28449672, %v2627_v46  ;;  %v2530_v34 = vadd.f32 -1.4531521, %v2498_v31 }
 0x378   :  { %v3007_v58 = vsub.f32 0.0, %v2943_v3  ;;  %v2941_v54 = vsub.f32 1.0, %v2909_v0  ;;  %v2657_v21 = vadd.f32 -0.28449672, %v2625_v5  ;;  %v2596_v4 = vadd.f32 1.4214138, %v2564_v24 }
 0x379   :  { %v2912_v45 = vmul.f32 %v5470_v51, %v2752_v7  ;;  %v2750_v48 = vmul.f32 %v5459_v12, %v2718_v10  ;;  %v2691_v55 = vmul.f32 %v5476_v57, %v2659_v27  ;;  %v5530_v51 = vpop.eup %3450  ;;  %v2562_v33 = vmul.f32 %v5508_v52, %v2530_v34 }
 0x37a   :  { %v3039_v62 = vsel %vm2975_vm0, %v2943_v3, %v3007_v58  ;;  %v3005_v41 = vsub.f32 0.0, %v2941_v54  ;;  %v2689_v23 = vmul.f32 %v5479_v29, %v2657_v21  ;;  %v2628_v11 = vmul.f32 %v5497_v25, %v2596_v4  ;;  %v5547_v27 = vpop.eup %3452 }
 0x37b   :  { %v3103_v38 = vadd.f32 1.0, %v3039_v62  ;;  %v2944_v63 = vsub.f32 1.0, %v2912_v45  ;;  %v2910_v59 = vmul.f32 %v5484_v42, %v2750_v48  ;;  %v2723_v2 = vadd.f32 0.2548296, %v2691_v55 }
 0x37c   :  { %v3037_v12 = vsel %vm2973_vm1, %v2941_v54, %v3005_v41  ;;  %v2721_v3 = vadd.f32 0.2548296, %v2689_v23  ;;  %v2660_v42 = vadd.f32 -0.28449672, %v2628_v11  ;;  %v2594_v7 = vadd.f32 1.4214138, %v2562_v33 }
 0x37d   :  { %v3135_v40 = vmul.f32 %v3103_v38, %v5411_v8  ;;  %v3008_v6 = vsub.f32 0.0, %v2944_v63  ;;  %v3101_v1 = vadd.f32 1.0, %v3037_v12  ;;  %v2942_v46 = vsub.f32 1.0, %v2910_v59 }
 0x37e   :  { %v2755_v31 = vmul.f32 %v5476_v57, %v2723_v2  ;;  %v2753_v8 = vmul.f32 %v5479_v29, %v2721_v3  ;;  %v2503_v30 = vmul.f32 1.0614054, %v5523_v28  ;;  %v2692_v54 = vmul.f32 %v5497_v25, %v2660_v42 }
 0x37f   :  { %3167 = vst [vmem:[#allocation18 + $0x10] sm:$0xff] %v3135_v40  ;;  %v3040_v0 = vsel %vm2976_vm2, %v2944_v63, %v3008_v6  ;;  %v3133_v5 = vmul.f32 %v3101_v1, %v5418_v56  ;;  %v3006_v58 = vsub.f32 0.0, %v2942_v46  ;;  %v2626_v49 = vmul.f32 %v5508_v52, %v2594_v7 }
 0x380   :  { %v3104_v24 = vadd.f32 1.0, %v3040_v0  ;;  %v2915_v10 = vmul.f32 %v5488_v15, %v2755_v31  ;;  %v2913_v57 = vmul.f32 %v5493_v17, %v2753_v8  ;;  %v2535_v45 = vadd.f32 -1.4531521, %v2503_v30 }
 0x381   :  { %3165 = vst [vmem:[#allocation18] sm:$0xff] %v3133_v5  ;;  %v3038_v21 = vsel %vm2974_vm3, %v2942_v46, %v3006_v58  ;;  %v2501_v4 = vmul.f32 1.0614054, %v5547_v27  ;;  %v2724_v48 = vadd.f32 0.2548296, %v2692_v54  ;;  %v3073_v12 = vmul.f32 0.5, %v5403_v60 }
 0x382   :  { %v3136_v29 = vmul.f32 %v3104_v24, %v5427_v20  ;;  %v2947_v56 = vsub.f32 1.0, %v2915_v10  ;;  %v3102_v62 = vadd.f32 1.0, %v3038_v21  ;;  %v2945_v15 = vsub.f32 1.0, %v2913_v57 }
 0x383   :  { %v2658_v55 = vadd.f32 -0.28449672, %v2626_v49  ;;  %v2567_v34 = vmul.f32 %v5523_v28, %v2535_v45  ;;  %v2533_v38 = vadd.f32 -1.4531521, %v2501_v4  ;;  %v2861_v41 = vmul.f32 1.442695, %v2821_v19 }
 0x384   :  { %3168 = vst [vmem:[#allocation18 + $0x18] sm:$0xff] %v3136_v29  ;;  %v3011_v17 = vsub.f32 0.0, %v2947_v56  ;;  %v3134_v63 = vmul.f32 %v3102_v62, %v5436_v16  ;;  %v3009_v23 = vsub.f32 0.0, %v2945_v15  ;;  %v2756_v20 = vmul.f32 %v5497_v25, %v2724_v48 }
 0x385   :  { %v2690_v37 = vmul.f32 %v5508_v52, %v2658_v55  ;;  %v2599_v2 = vadd.f32 1.4214138, %v2567_v34  ;;  %v2565_v11 = vmul.f32 %v5547_v27, %v2533_v38  ;;  %3454 = vpow2.f32 %v2861_v41 }
 0x386   :  { %v3043_v59 = vsel %vm2979_vm4, %v2947_v56, %v3011_v17  ;;  %3166 = vst [vmem:[#allocation18 + $0x8] sm:$0xff] %v3134_v63  ;;  %v3041_v40 = vsel %vm2977_vm5, %v2945_v15, %v3009_v23  ;;  %v2916_v19 = vmul.f32 %v5505_v26, %v2756_v20  ;;  %v3365_v26 = vpop.f32.mrf.mxu1  ;;  %v5576_v7 = vmul.f32 0.70710677, %v5491_v61 }
 0x387   :  { %v3107_v33 = vadd.f32 1.0, %v3043_v59  ;;  %v2722_v16 = vadd.f32 0.2548296, %v2690_v37  ;;  %v3105_v25 = vadd.f32 1.0, %v3041_v40  ;;  %v2631_v6 = vmul.f32 %v5523_v28, %v2599_v2 }
 0x388   :  { %v2597_v3 = vadd.f32 1.4214138, %v2565_v11  ;;  %v2948_v1 = vsub.f32 1.0, %v2916_v19  ;;  %v2376_v30 = vand.u32 2147483647, %v5572_v13  ;;  %v3076_v24 = vmul.f32 0.5, %v5416_v18  ;;  %v2254_v45 = vpop.f32.mrf.mxu1 }
 0x389   :  { %v3139_v9 = vmul.f32 %v3107_v33, %v5457_v22  ;;  %v2754_v46 = vmul.f32 %v5508_v52, %v2722_v16  ;;  %v3137_v31 = vmul.f32 %v3105_v25, %v3073_v12  ;;  %v2663_v42 = vadd.f32 -0.28449672, %v2631_v6 }
 0x38a   :  { %v2629_v0 = vmul.f32 %v5547_v27, %v2597_v3  ;;  %v3012_v8 = vsub.f32 0.0, %v2948_v1  ;;  %v2374_v10 = vand.u32 2147483647, %v5576_v7  ;;  %v2408_v49 = vmul.f32 0.3275911, %v2376_v30  ;;  %v3366_v36 = vpop.f32.mrf.mxu1 }
 0x38b   :  { %3171 = vst [vmem:[#allocation18 + $0x30] sm:$0xff] %v3139_v9  ;;  %v2914_v60 = vmul.f32 %v5515_v43, %v2754_v46  ;;  %3169 = vst [vmem:[#allocation18 + $0x20] sm:$0xff] %v3137_v31  ;;  %v2695_v22 = vmul.f32 %v5523_v28, %v2663_v42  ;;  %v2792_v29 = vsub.f32 0.0, %v2376_v30  ;;  %v3074_v48 = vmul.f32 0.5, %v5424_v39 }
 0x38c   :  { %v2661_v52 = vadd.f32 -0.28449672, %v2629_v0  ;;  %v3044_v5 = vsel %vm2980_vm6, %v2948_v1, %v3012_v8  ;;  %v2406_v21 = vmul.f32 0.3275911, %v2374_v10  ;;  %v2440_v15 = vadd.f32 1.0, %v2408_v49  ;;  %v2257_v40 = vpop.f32.mrf.mxu1 }
 0x38d   :  { %v2946_v58 = vsub.f32 1.0, %v2914_v60  ;;  %v3108_v57 = vadd.f32 1.0, %v3044_v5  ;;  %v2727_v54 = vadd.f32 0.2548296, %v2695_v22  ;;  %v2824_v63 = vmul.f32 %v2792_v29, %v2376_v30 }
 0x38e   :  { %v2693_v43 = vmul.f32 %v5547_v27, %v2661_v52  ;;  %v2438_v55 = vadd.f32 1.0, %v2406_v21  ;;  %3456 = vrcp.f32 %v2440_v15  ;;  %v2790_v23 = vsub.f32 0.0, %v2374_v10 }
 0x38f   :  { %v3010_v44 = vsub.f32 0.0, %v2946_v58  ;;  %v3140_v56 = vmul.f32 %v3108_v57, %v3076_v24  ;;  %v2759_v4 = vmul.f32 %v5523_v28, %v2727_v54  ;;  %v2263_v59 = vadd.f32 %v3365_v26, %v5378_v14  ;;  %v3369_v26 = vpop.f32.mrf.mxu1 }
 0x390   :  { %v2725_v62 = vadd.f32 0.2548296, %v2693_v43  ;;  %3458 = vrcp.f32 %v2438_v55  ;;  %v2255_v39 = vadd.f32 %v5378_v14, %v2254_v45  ;;  %v5592_v2 = vadd.f32 %v3366_v36, %v5378_v14 }
 0x391   :  { %v3042_v18 = vsel %vm2978_vm7, %v2946_v58, %v3010_v44  ;;  %3172 = vst [vmem:[#allocation18 + $0x38] sm:$0xff] %v3140_v56  ;;  %v2919_v34 = vmul.f32 %v5530_v51, %v2759_v4  ;;  %v5595_v33 = vmul.f32 0.70710677, %v2263_v59  ;;  %vm2983_vm8 = vcmp.ge.f32.partialorder %v5446_v32, 0.0  ;;  %v2270_v54 = vpop.f32.mrf.mxu1 }
 0x392   :  { %v3106_v17 = vadd.f32 1.0, %v3042_v18  ;;  %v2757_v38 = vmul.f32 %v5547_v27, %v2725_v62  ;;  %v3455_v41 = vpop.eup %3454  ;;  %v3079_v27 = vmul.f32 0.5, %v5440_v35  ;;  %v2822_v19 = vmul.f32 %v2790_v23, %v2374_v10 }
 0x393   :  { %v2951_v28 = vsub.f32 1.0, %v2919_v34  ;;  %v5598_v16 = vmul.f32 0.70710677, %v2255_v39  ;;  %v5601_v12 = vmul.f32 0.70710677, %v5592_v2  ;;  %vm2981_vm9 = vcmp.ge.f32.partialorder %v5467_v47, 0.0 }
 0x394   :  { %v3138_v20 = vmul.f32 %v3106_v17, %v3074_v48  ;;  %v2917_v37 = vmul.f32 %v3455_v41, %v2757_v38  ;;  %v2867_v3 = vmul.f32 1.442695, %v2824_v63  ;;  %v2379_v9 = vand.u32 2147483647, %v5595_v33  ;;  %v3370_v17 = vpop.f32.mrf.mxu1 }
 0x395   :  { %v3015_v51 = vsub.f32 0.0, %v2951_v28  ;;  %v2377_v35 = vand.u32 2147483647, %v5598_v16  ;;  %v2380_v46 = vand.u32 2147483647, %v5601_v12  ;;  %v3077_v32 = vmul.f32 0.5, %v5452_v53 }
 0x396   :  { %3170 = vst [vmem:[#allocation18 + $0x28] sm:$0xff] %v3138_v20  ;;  %v2949_v11 = vsub.f32 1.0, %v2917_v37  ;;  %v2411_v42 = vmul.f32 0.3275911, %v2379_v9  ;;  %v2795_v0 = vsub.f32 0.0, %v2379_v9  ;;  %v5609_v52 = vadd.f32 %v5378_v14, %v2257_v40 }
 0x397   :  { %v3047_v25 = vsel %vm2983_vm8, %v2951_v28, %v3015_v51  ;;  %v2409_v22 = vmul.f32 0.3275911, %v2377_v35  ;;  %v2863_v30 = vmul.f32 1.442695, %v2822_v19  ;;  %v2412_v24 = vmul.f32 0.3275911, %v2380_v46 }
 0x398   :  { %v3013_v6 = vsub.f32 0.0, %v2949_v11  ;;  %v3111_v1 = vadd.f32 1.0, %v3047_v25  ;;  %v2443_v5 = vadd.f32 1.0, %v2411_v42  ;;  %3460 = vpow2.f32 %v2867_v3 }
 0x399   :  { %v2441_v58 = vadd.f32 1.0, %v2409_v22  ;;  %v2793_v10 = vsub.f32 0.0, %v2377_v35  ;;  %v2827_v57 = vmul.f32 %v2795_v0, %v2379_v9  ;;  %v2444_v53 = vadd.f32 1.0, %v2412_v24 }
 0x39a   :  { %v3045_v31 = vsel %vm2981_vm9, %v2949_v11, %v3013_v6  ;;  %v3143_v8 = vmul.f32 %v3111_v1, %v3079_v27  ;;  %3462 = vrcp.f32 %v2443_v5  ;;  %v5614_v49 = vmul.f32 0.5, %v5474_v50 }
 0x39b   :  { %v3109_v60 = vadd.f32 1.0, %v3045_v31  ;;  %v5611_v43 = vpop.eup %3456  ;;  %3464 = vrcp.f32 %v2441_v58  ;;  %v5617_v45 = vmul.f32 0.70710677, %v5609_v52  ;;  %v5623_v21 = vmul.f32 0.5, %v5491_v61 }
 0x39c   :  { %3175 = vst [vmem:[#allocation18 + $0x50] sm:$0xff] %v3143_v8  ;;  %v2504_v29 = vmul.f32 1.0614054, %v5611_v43  ;;  %3466 = vpow2.f32 %v2863_v30  ;;  %v5626_v56 = vadd.f32 %v3369_v26, %v5378_v14  ;;  %v2825_v62 = vmul.f32 %v2793_v10, %v2377_v35 }
 0x39d   :  { %v3141_v47 = vmul.f32 %v3109_v60, %v3077_v32  ;;  %v5619_v44 = vpop.eup %3458  ;;  %v2796_v50 = vsub.f32 0.0, %v2380_v46  ;;  %v2378_v15 = vand.u32 2147483647, %v5617_v45  ;;  %v2873_v48 = vmul.f32 1.442695, %v2827_v57 }
 0x39e   :  { %v2502_v4 = vmul.f32 1.0614054, %v5619_v44  ;;  %v2536_v18 = vadd.f32 -1.4531521, %v2504_v29  ;;  %3468 = vrcp.f32 %v2444_v53  ;;  %v5631_v55 = vmul.f32 0.70710677, %v5626_v56 }
 0x39f   :  { %3173 = vst [vmem:[#allocation18 + $0x40] sm:$0xff] %v3141_v47  ;;  %v5633_v38 = vmul.f32 0.5, %v2263_v59  ;;  %v5635_v61 = vmul.f32 0.5, %v2255_v39  ;;  %v2410_v36 = vmul.f32 0.3275911, %v2378_v15  ;;  %v2794_v63 = vsub.f32 0.0, %v2378_v15 }
 0x3a0   :  { %v2534_v34 = vadd.f32 -1.4531521, %v2502_v4  ;;  %v2568_v41 = vmul.f32 %v5611_v43, %v2536_v18  ;;  %v2383_v23 = vand.u32 2147483647, %v5631_v55  ;;  %v5640_v20 = vadd.f32 %v5378_v14, %v2270_v54 }
 0x3a1   :  { %v2869_v37 = vmul.f32 1.442695, %v2825_v62  ;;  %v2442_v51 = vadd.f32 1.0, %v2410_v36  ;;  %v5644_v27 = vadd.f32 %v3370_v17, %v5378_v14  ;;  %3470 = vpow2.f32 %v2873_v48 }
 0x3a2   :  { %v2566_v28 = vmul.f32 %v5619_v44, %v2534_v34  ;;  %v2600_v59 = vadd.f32 1.4214138, %v2568_v41  ;;  %v2828_v39 = vmul.f32 %v2796_v50, %v2380_v46  ;;  %v2415_v11 = vmul.f32 0.3275911, %v2383_v23 }
 0x3a3   :  { %3472 = vrcp.f32 %v2442_v51  ;;  %v2799_v19 = vsub.f32 0.0, %v2383_v23  ;;  %v5647_v25 = vmul.f32 0.70710677, %v5640_v20  ;;  %v2826_v3 = vmul.f32 %v2794_v63, %v2378_v15 }
 0x3a4   :  { %v2598_v40 = vadd.f32 1.4214138, %v2566_v28  ;;  %v2632_v6 = vmul.f32 %v5611_v43, %v2600_v59  ;;  %v2447_v9 = vadd.f32 1.0, %v2415_v11  ;;  %v5651_v1 = vmul.f32 0.70710677, %v5644_v27 }
 0x3a5   :  { %3474 = vpow2.f32 %v2869_v37  ;;  %v5655_v31 = vmul.f32 0.5, %v5592_v2  ;;  %v2381_v46 = vand.u32 2147483647, %v5647_v25  ;;  %v3461_v32 = vpop.eup %3460  ;;  %v2875_v0 = vmul.f32 1.442695, %v2828_v39 }
 0x3a6   :  { %v2630_v35 = vmul.f32 %v5619_v44, %v2598_v40  ;;  %v2664_v42 = vadd.f32 -0.28449672, %v2632_v6  ;;  %3476 = vrcp.f32 %v2447_v9  ;;  %v2384_v26 = vand.u32 2147483647, %v5651_v1  ;;  %v2273_v9 = vpop.f32.mrf.mxu1 }
 0x3a7   :  { %v5659_v8 = vpop.eup %3462  ;;  %v2831_v22 = vmul.f32 %v2799_v19, %v2383_v23  ;;  %v2413_v30 = vmul.f32 0.3275911, %v2381_v46  ;;  %v2797_v5 = vsub.f32 0.0, %v2381_v46  ;;  %v2871_v58 = vmul.f32 1.442695, %v2826_v3 }
 0x3a8   :  { %v2662_v60 = vadd.f32 -0.28449672, %v2630_v35  ;;  %v5661_v24 = vpop.eup %3464  ;;  %v2696_v47 = vmul.f32 %v5611_v43, %v2664_v42  ;;  %v2507_v2 = vmul.f32 1.0614054, %v5659_v8  ;;  %v2416_v10 = vmul.f32 0.3275911, %v2384_v26 }
 0x3a9   :  { %v3467_v57 = vpop.eup %3466  ;;  %v2505_v54 = vmul.f32 1.0614054, %v5661_v24  ;;  %v2445_v29 = vadd.f32 1.0, %v2413_v30  ;;  %v2829_v4 = vmul.f32 %v2797_v5, %v2381_v46  ;;  %v2800_v18 = vsub.f32 0.0, %v2384_v26 }
 0x3aa   :  { %v2694_v53 = vmul.f32 %v5619_v44, %v2662_v60  ;;  %v2728_v62 = vadd.f32 0.2548296, %v2696_v47  ;;  %v2539_v50 = vadd.f32 -1.4531521, %v2507_v2  ;;  %v2448_v15 = vadd.f32 1.0, %v2416_v10 }
 0x3ab   :  { %v5667_v48 = vpop.eup %3468  ;;  %vm2984_vm10 = vcmp.ge.f32.partialorder %v5572_v13, 0.0  ;;  %v2537_v34 = vadd.f32 -1.4531521, %v2505_v54  ;;  %v2881_v36 = vmul.f32 1.442695, %v2831_v22  ;;  %3478 = vrcp.f32 %v2445_v29 }
 0x3ac   :  { %v2726_v17 = vadd.f32 0.2548296, %v2694_v53  ;;  %v2760_v41 = vmul.f32 %v5611_v43, %v2728_v62  ;;  %vm2982_vm11 = vcmp.ge.f32.partialorder %v5576_v7, 0.0  ;;  %v2571_v63 = vmul.f32 %v5659_v8, %v2539_v50  ;;  %v3373_v53 = vpop.f32.mrf.mxu1 }
 0x3ad   :  { %v2508_v23 = vmul.f32 1.0614054, %v5667_v48  ;;  %3480 = vrcp.f32 %v2448_v15  ;;  %v2569_v37 = vmul.f32 %v5661_v24, %v2537_v34  ;;  %v2832_v51 = vmul.f32 %v2800_v18, %v2384_v26 }
 0x3ae   :  { %v2758_v28 = vmul.f32 %v5619_v44, %v2726_v17  ;;  %3482 = vpow2.f32 %v2875_v0  ;;  %v2920_v59 = vmul.f32 %v3461_v32, %v2760_v41  ;;  %v2603_v39 = vadd.f32 1.4214138, %v2571_v63  ;;  %v3471_v19 = vpop.eup %3470 }
 0x3af   :  { %v2540_v11 = vadd.f32 -1.4531521, %v2508_v23  ;;  %v2877_v40 = vmul.f32 1.442695, %v2829_v4  ;;  %v2601_v43 = vadd.f32 1.4214138, %v2569_v37  ;;  %3484 = vpow2.f32 %v2871_v58 }
 0x3b0   :  { %v2918_v6 = vmul.f32 %v3467_v57, %v2758_v28  ;;  %v5677_v3 = vmul.f32 0.5, %v5609_v52  ;;  %v5679_v35 = vpop.eup %3472  ;;  %v2952_v46 = vsub.f32 1.0, %v2920_v59  ;;  %v2635_v44 = vmul.f32 %v5659_v8, %v2603_v39 }
 0x3b1   :  { %v2572_v42 = vmul.f32 %v5667_v48, %v2540_v11  ;;  %3486 = vpow2.f32 %v2881_v36  ;;  %v2633_v0 = vmul.f32 %v5661_v24, %v2601_v43  ;;  %v2506_v26 = vmul.f32 1.0614054, %v5679_v35 }
 0x3b2   :  { %v2950_v32 = vsub.f32 1.0, %v2918_v6  ;;  %v5685_v60 = vmul.f32 1.442695, %v2832_v51  ;;  %v3475_v22 = vpop.eup %3474  ;;  %v3016_v30 = vsub.f32 0.0, %v2952_v46  ;;  %v2667_v52 = vadd.f32 -0.28449672, %v2635_v44 }
 0x3b3   :  { %v2604_v5 = vadd.f32 1.4214138, %v2572_v42  ;;  %3488 = vpow2.f32 %v2877_v40  ;;  %v5687_v47 = vpop.eup %3476  ;;  %v2665_v58 = vadd.f32 -0.28449672, %v2633_v0  ;;  %v2538_v10 = vadd.f32 -1.4531521, %v2506_v26 }
 0x3b4   :  { %v3014_v2 = vsub.f32 0.0, %v2950_v32  ;;  %v5690_v57 = vadd.f32 %v5378_v14, %v2273_v9  ;;  %v3048_v54 = vsel %vm2984_vm10, %v2952_v46, %v3016_v30  ;;  %v2699_v29 = vmul.f32 %v5659_v8, %v2667_v52 }
 0x3b5   :  { %v2636_v4 = vmul.f32 %v5667_v48, %v2604_v5  ;;  %v2511_v62 = vmul.f32 1.0614054, %v5687_v47  ;;  %v3112_v50 = vadd.f32 1.0, %v3048_v54  ;;  %v2697_v18 = vmul.f32 %v5661_v24, %v2665_v58 }
 0x3b6   :  { %v3046_v15 = vsel %vm2982_vm11, %v2950_v32, %v3014_v2  ;;  %v2570_v17 = vmul.f32 %v5679_v35, %v2538_v10  ;;  %v2731_v36 = vadd.f32 0.2548296, %v2699_v29  ;;  %v5702_v13 = vadd.f32 %v3373_v53, %v5378_v14 }
 0x3b7   :  { %v3110_v34 = vadd.f32 1.0, %v3046_v15  ;;  %v2668_v41 = vadd.f32 -0.28449672, %v2636_v4  ;;  %v3144_v63 = vmul.f32 %v3112_v50, %v5614_v49  ;;  %vm2987_vm12 = vcmp.ge.f32.partialorder %v5595_v33, 0.0 }
 0x3b8   :  { %v2729_v23 = vadd.f32 0.2548296, %v2697_v18  ;;  %v2602_v28 = vadd.f32 1.4214138, %v2570_v17  ;;  %v2543_v37 = vadd.f32 -1.4531521, %v2511_v62  ;;  %v5706_v51 = vpop.eup %3478  ;;  %v2763_v59 = vmul.f32 %v5659_v8, %v2731_v36 }
 0x3b9   :  { %v3142_v7 = vmul.f32 %v3110_v34, %v5623_v21  ;;  %vm2985_vm13 = vcmp.ge.f32.partialorder %v5598_v16, 0.0  ;;  %v2700_v39 = vmul.f32 %v5667_v48, %v2668_v41  ;;  %v5713_v14 = vmul.f32 0.70710677, %v5690_v57  ;;  %3176 = vst [vmem:[#allocation18 + $0x58] sm:$0xff] %v3144_v63 }
 0x3ba   :  { %v5715_v11 = vpop.eup %3480  ;;  %v2761_v49 = vmul.f32 %v5661_v24, %v2729_v23  ;;  %v2634_v40 = vmul.f32 %v5679_v35, %v2602_v28  ;;  %v2575_v6 = vmul.f32 %v5687_v47, %v2543_v37  ;;  %v2509_v21 = vmul.f32 1.0614054, %v5706_v51 }
 0x3bb   :  { %v3483_v43 = vpop.eup %3482  ;;  %3174 = vst [vmem:[#allocation18 + $0x48] sm:$0xff] %v3142_v7  ;;  %v2923_v8 = vmul.f32 %v3471_v19, %v2763_v59  ;;  %v2732_v9 = vadd.f32 0.2548296, %v2700_v39  ;;  %v2512_v46 = vmul.f32 1.0614054, %v5715_v11  ;;  %vm2988_vm14 = vcmp.ge.f32.partialorder %v5601_v12, 0.0 }
 0x3bc   :  { %v5723_v44 = vand.u32 2147483647, %v5713_v14  ;;  %v2921_v42 = vmul.f32 %v3475_v22, %v2761_v49  ;;  %v2666_v32 = vadd.f32 -0.28449672, %v2634_v40  ;;  %v2607_v24 = vadd.f32 1.4214138, %v2575_v6  ;;  %v3485_v26 = vpop.eup %3484  ;;  %v2286_v6 = vpop.f32.mrf.mxu1 }
 0x3bd   :  { %v2541_v0 = vadd.f32 -1.4531521, %v2509_v21  ;;  %v2955_v30 = vsub.f32 1.0, %v2923_v8  ;;  %v2764_v52 = vmul.f32 %v5667_v48, %v2732_v9  ;;  %v2544_v5 = vadd.f32 -1.4531521, %v2512_v46 }
 0x3be   :  { %v2414_v2 = vmul.f32 0.3275911, %v5723_v44  ;;  %v3487_v19 = vpop.eup %3486  ;;  %v2953_v58 = vsub.f32 1.0, %v2921_v42  ;;  %v2698_v10 = vmul.f32 %v5679_v35, %v2666_v32  ;;  %v2639_v53 = vmul.f32 %v5687_v47, %v2607_v24 }
 0x3bf   :  { %v2573_v22 = vmul.f32 %v5706_v51, %v2541_v0  ;;  %v3019_v54 = vsub.f32 0.0, %v2955_v30  ;;  %v2924_v29 = vmul.f32 %v3483_v43, %v2764_v52  ;;  %v2576_v4 = vmul.f32 %v5715_v11, %v2544_v5 }
 0x3c0   :  { %3490 = vpow2.f32 %v5685_v60  ;;  %v3489_v62 = vpop.eup %3488  ;;  %v3017_v50 = vsub.f32 0.0, %v2953_v58  ;;  %v2730_v48 = vadd.f32 0.2548296, %v2698_v10  ;;  %v2671_v15 = vadd.f32 -0.28449672, %v2639_v53 }
 0x3c1   :  { %v2446_v18 = vadd.f32 1.0, %v2414_v2  ;;  %v3051_v17 = vsel %vm2987_vm12, %v2955_v30, %v3019_v54  ;;  %v2956_v34 = vsub.f32 1.0, %v2924_v29  ;;  %v2605_v36 = vadd.f32 1.4214138, %v2573_v22 }
 0x3c2   :  { %v2608_v41 = vadd.f32 1.4214138, %v2576_v4  ;;  %v3115_v63 = vadd.f32 1.0, %v3051_v17  ;;  %v3049_v23 = vsel %vm2985_vm13, %v2953_v58, %v3017_v50  ;;  %v2762_v28 = vmul.f32 %v5679_v35, %v2730_v48 }
 0x3c3   :  { %v2703_v37 = vmul.f32 %v5687_v47, %v2671_v15  ;;  %v3113_v60 = vadd.f32 1.0, %v3049_v23  ;;  %v3020_v7 = vsub.f32 0.0, %v2956_v34  ;;  %v2637_v59 = vmul.f32 %v5706_v51, %v2605_v36 }
 0x3c4   :  { %v2640_v39 = vmul.f32 %v5715_v11, %v2608_v41  ;;  %v3147_v33 = vmul.f32 %v3115_v63, %v5633_v38  ;;  %v2922_v49 = vmul.f32 %v3485_v26, %v2762_v28  ;;  %3492 = vrcp.f32 %v2446_v18 }
 0x3c5   :  { %v2735_v40 = vadd.f32 0.2548296, %v2703_v37  ;;  %v3145_v21 = vmul.f32 %v3113_v60, %v5635_v61  ;;  %v3052_v16 = vsel %vm2988_vm14, %v2956_v34, %v3020_v7  ;;  %v2669_v35 = vadd.f32 -0.28449672, %v2637_v59  ;;  %v5752_v61 = vld [vmem:[#allocation14] ss:$0 sm:$0xff] }
 0x3c6   :  { %v2672_v43 = vadd.f32 -0.28449672, %v2640_v39  ;;  %3179 = vst [vmem:[#allocation18 + $0x70] sm:$0xff] %v3147_v33  ;;  %v3116_v8 = vadd.f32 1.0, %v3052_v16  ;;  %v2954_v9 = vsub.f32 1.0, %v2922_v49  ;;  %vm2986_vm15 = vcmp.ge.f32.partialorder %v5617_v45, 0.0 }
 0x3c7   :  { %v2767_v46 = vmul.f32 %v5687_v47, %v2735_v40  ;;  %3177 = vst [vmem:[#allocation18 + $0x60] sm:$0xff] %v3145_v21  ;;  %v2701_v38 = vmul.f32 %v5706_v51, %v2669_v35  ;;  %v5750_v32 = vmul.f32 0.70710677, %v5702_v13  ;;  %v5755_v12 = vadd.f32 %v5752_v61, %v2286_v6  ;;  %v3374_v47 = vpop.f32.mrf.mxu1 }
 0x3c8   :  { %v2704_v42 = vmul.f32 %v5715_v11, %v2672_v43  ;;  %v3148_v24 = vmul.f32 %v3116_v8, %v5655_v31  ;;  %v3018_v0 = vsub.f32 0.0, %v2954_v9  ;;  %v2798_v30 = vsub.f32 0.0, %v5723_v44 }
 0x3c9   :  { %v2927_v26 = vmul.f32 %v3487_v19, %v2767_v46  ;;  %v2733_v52 = vadd.f32 0.2548296, %v2701_v38  ;;  %v2387_v2 = vand.u32 2147483647, %v5750_v32  ;;  %vm2991_vm0 = vcmp.ge.f32.partialorder %v5631_v55, 0.0  ;;  %v2289_v15 = vpop.f32.mrf.mxu1 }
 0x3ca   :  { %v2736_v5 = vadd.f32 0.2548296, %v2704_v42  ;;  %3180 = vst [vmem:[#allocation18 + $0x78] sm:$0xff] %v3148_v24  ;;  %v3050_v58 = vsel %vm2986_vm15, %v2954_v9, %v3018_v0  ;;  %v3087_v53 = vmul.f32 0.5, %v5626_v56  ;;  %v2830_v50 = vmul.f32 %v2798_v30, %v5723_v44 }
 0x3cb   :  { %v2959_v10 = vsub.f32 1.0, %v2927_v26  ;;  %v3114_v22 = vadd.f32 1.0, %v3050_v58  ;;  %v2765_v31 = vmul.f32 %v5706_v51, %v2733_v52  ;;  %v2419_v54 = vmul.f32 0.3275911, %v2387_v2  ;;  %v3377_v28 = vpop.f32.mrf.mxu1 }
 0x3cc   :  { %v2768_v19 = vmul.f32 %v5715_v11, %v2736_v5  ;;  %v5768_v48 = vmul.f32 0.70710677, %v5755_v12  ;;  %v5771_v45 = vadd.f32 %v5752_v61, %v3374_v47  ;;  %v3085_v11 = vmul.f32 0.5, %v5640_v20 }
 0x3cd   :  { %v3491_v29 = vpop.eup %3490  ;;  %v3023_v4 = vsub.f32 0.0, %v2959_v10  ;;  %v3146_v18 = vmul.f32 %v3114_v22, %v5677_v3  ;;  %v2925_v56 = vmul.f32 %v3489_v62, %v2765_v31  ;;  %v2451_v34 = vadd.f32 1.0, %v2419_v54  ;;  %v2302_v43 = vpop.f32.mrf.mxu1 }
 0x3ce   :  { %v2928_v17 = vmul.f32 %v3491_v29, %v2768_v19  ;;  %v2803_v36 = vsub.f32 0.0, %v2387_v2  ;;  %v2385_v44 = vand.u32 2147483647, %v5768_v48  ;;  %vm2989_vm1 = vcmp.ge.f32.partialorder %v5647_v25, 0.0 }
 0x3cf   :  { %v3055_v51 = vsel %vm2991_vm0, %v2959_v10, %v3023_v4  ;;  %3178 = vst [vmem:[#allocation18 + $0x68] sm:$0xff] %v3146_v18  ;;  %v2957_v63 = vsub.f32 1.0, %v2925_v56  ;;  %3494 = vrcp.f32 %v2451_v34  ;;  %vm2992_vm2 = vcmp.ge.f32.partialorder %v5651_v1, 0.0 }
 0x3d0   :  { %v3119_v41 = vadd.f32 1.0, %v3055_v51  ;;  %v2960_v23 = vsub.f32 1.0, %v2928_v17  ;;  %v2879_v3 = vmul.f32 1.442695, %v2830_v50  ;;  %v2417_v62 = vmul.f32 0.3275911, %v2385_v44 }
 0x3d1   :  { %v5780_v37 = vpop.eup %3492  ;;  %v3021_v60 = vsub.f32 0.0, %v2957_v63  ;;  %v5783_v7 = vmul.f32 0.70710677, %v5771_v45  ;;  %v3088_v59 = vmul.f32 0.5, %v5644_v27  ;;  %v2835_v33 = vmul.f32 %v2803_v36, %v2387_v2  ;;  %v3378_v2 = vpop.f32.mrf.mxu1 }
 0x3d2   :  { %v3151_v55 = vmul.f32 %v3119_v41, %v3087_v53  ;;  %v3024_v20 = vsub.f32 0.0, %v2960_v23  ;;  %v2510_v39 = vmul.f32 1.0614054, %v5780_v37  ;;  %v2449_v49 = vadd.f32 1.0, %v2417_v62 }
 0x3d3   :  { %v3053_v25 = vsel %vm2989_vm1, %v2957_v63, %v3021_v60  ;;  %v2801_v40 = vsub.f32 0.0, %v2385_v44  ;;  %v2388_v6 = vand.u32 2147483647, %v5783_v7  ;;  %v5789_v27 = vadd.f32 %v5752_v61, %v2289_v15 }
 0x3d4   :  { %3183 = vst [vmem:[#allocation18 + $0x90] sm:$0xff] %v3151_v55  ;;  %v3056_v1 = vsel %vm2992_vm2, %v2960_v23, %v3024_v20  ;;  %v3117_v21 = vadd.f32 1.0, %v3053_v25  ;;  %v2542_v35 = vadd.f32 -1.4531521, %v2510_v39  ;;  %3496 = vrcp.f32 %v2449_v49 }
 0x3d5   :  { %v3120_v16 = vadd.f32 1.0, %v3056_v1  ;;  %3498 = vpow2.f32 %v2879_v3  ;;  %v2420_v8 = vmul.f32 0.3275911, %v2388_v6  ;;  %v2804_v9 = vsub.f32 0.0, %v2388_v6 }
 0x3d6   :  { %v3149_v46 = vmul.f32 %v3117_v21, %v3085_v11  ;;  %v2574_v42 = vmul.f32 %v5780_v37, %v2542_v35  ;;  %v5793_v24 = vadd.f32 %v5752_v61, %v3377_v28  ;;  %v5796_v26 = vmul.f32 0.70710677, %v5789_v27 }
 0x3d7   :  { %v3152_v38 = vmul.f32 %v3120_v16, %v3088_v59  ;;  %v2452_v0 = vadd.f32 1.0, %v2420_v8  ;;  %v2889_v47 = vmul.f32 1.442695, %v2835_v33  ;;  %v2833_v52 = vmul.f32 %v2801_v40, %v2385_v44 }
 0x3d8   :  { %3181 = vst [vmem:[#allocation18 + $0x80] sm:$0xff] %v3149_v46  ;;  %v2606_v30 = vadd.f32 1.4214138, %v2574_v42  ;;  %v5799_v5 = vmul.f32 0.70710677, %v5793_v24  ;;  %v2836_v53 = vmul.f32 %v2804_v9, %v2388_v6  ;;  %v5805_v31 = vadd.f32 %v5752_v61, %v2302_v43  ;;  %v2305_v6 = vpop.f32.mrf.mxu1 }
 0x3d9   :  { %3184 = vst [vmem:[#allocation18 + $0x98] sm:$0xff] %v3152_v38  ;;  %3500 = vrcp.f32 %v2452_v0  ;;  %v2386_v58 = vand.u32 2147483647, %v5796_v26  ;;  %v5808_v19 = vmul.f32 0.5, %v5690_v57  ;;  %v5811_v54 = vmul.f32 0.5, %v5702_v13 }
 0x3da   :  { %v2638_v10 = vmul.f32 %v5780_v37, %v2606_v30  ;;  %v2391_v22 = vand.u32 2147483647, %v5799_v5  ;;  %v5814_v4 = vadd.f32 %v5752_v61, %v3378_v2  ;;  %3502 = vpow2.f32 %v2889_v47 }
 0x3db   :  { %v2418_v29 = vmul.f32 0.3275911, %v2386_v58  ;;  %v2885_v18 = vmul.f32 1.442695, %v2833_v52  ;;  %v2802_v51 = vsub.f32 0.0, %v2386_v58  ;;  %v5828_v62 = vmul.f32 0.5, %v5755_v12 }
 0x3dc   :  { %v5816_v50 = vpop.eup %3494  ;;  %v2670_v15 = vadd.f32 -0.28449672, %v2638_v10  ;;  %v2423_v56 = vmul.f32 0.3275911, %v2391_v22  ;;  %v5820_v57 = vmul.f32 0.70710677, %v5805_v31  ;;  %v3381_v10 = vpop.f32.mrf.mxu1 }
 0x3dd   :  { %v2515_v17 = vmul.f32 1.0614054, %v5816_v50  ;;  %v2450_v34 = vadd.f32 1.0, %v2418_v29  ;;  %v2891_v11 = vmul.f32 1.442695, %v2836_v53  ;;  %v2807_v63 = vsub.f32 0.0, %v2391_v22 }
 0x3de   :  { %v2702_v13 = vmul.f32 %v5780_v37, %v2670_v15  ;;  %v2455_v36 = vadd.f32 1.0, %v2423_v56  ;;  %v5824_v44 = vmul.f32 0.70710677, %v5814_v4  ;;  %v2389_v23 = vand.u32 2147483647, %v5820_v57 }
 0x3df   :  { %v2547_v41 = vadd.f32 -1.4531521, %v2515_v17  ;;  %3504 = vrcp.f32 %v2450_v34  ;;  %v5831_v28 = vmul.f32 0.5, %v5771_v45  ;;  %vm2990_vm3 = vcmp.ge.f32.partialorder %v5713_v14, 0.0 }
 0x3e0   :  { %v2734_v3 = vadd.f32 0.2548296, %v2702_v13  ;;  %3506 = vrcp.f32 %v2455_v36  ;;  %v2834_v20 = vmul.f32 %v2802_v51, %v2386_v58  ;;  %v2421_v59 = vmul.f32 0.3275911, %v2389_v23 }
 0x3e1   :  { %v5833_v55 = vpop.eup %3496  ;;  %v2579_v60 = vmul.f32 %v5816_v50, %v2547_v41  ;;  %3508 = vpow2.f32 %v2885_v18  ;;  %v2805_v12 = vsub.f32 0.0, %v2389_v23  ;;  %v2392_v25 = vand.u32 2147483647, %v5824_v44 }
 0x3e2   :  { %v3499_v39 = vpop.eup %3498  ;;  %v2766_v33 = vmul.f32 %v5780_v37, %v2734_v3  ;;  %v2513_v49 = vmul.f32 1.0614054, %v5833_v55  ;;  %3510 = vpow2.f32 %v2891_v11  ;;  %v2839_v1 = vmul.f32 %v2807_v63, %v2391_v22 }
 0x3e3   :  { %v2611_v45 = vadd.f32 1.4214138, %v2579_v60  ;;  %v2453_v40 = vadd.f32 1.0, %v2421_v59  ;;  %v2424_v35 = vmul.f32 0.3275911, %v2392_v25  ;;  %v2808_v43 = vsub.f32 0.0, %v2392_v25 }
 0x3e4   :  { %v2926_v21 = vmul.f32 %v3499_v39, %v2766_v33  ;;  %v2545_v16 = vadd.f32 -1.4531521, %v2513_v49  ;;  %v2887_v9 = vmul.f32 1.442695, %v2834_v20  ;;  %v5842_v46 = vmul.f32 0.5, %v5789_v27 }
 0x3e5   :  { %v2643_v8 = vmul.f32 %v5816_v50, %v2611_v45  ;;  %3512 = vrcp.f32 %v2453_v40  ;;  %v2837_v0 = vmul.f32 %v2805_v12, %v2389_v23  ;;  %v2456_v30 = vadd.f32 1.0, %v2424_v35 }
 0x3e6   :  { %v5844_v37 = vpop.eup %3500  ;;  %v2958_v38 = vsub.f32 1.0, %v2926_v21  ;;  %v2577_v42 = vmul.f32 %v5833_v55, %v2545_v16  ;;  %v2897_v2 = vmul.f32 1.442695, %v2839_v1  ;;  %v5849_v58 = vadd.f32 %v5752_v61, %v2305_v6 }
 0x3e7   :  { %v2675_v47 = vadd.f32 -0.28449672, %v2643_v8  ;;  %v2516_v52 = vmul.f32 1.0614054, %v5844_v37  ;;  %3514 = vrcp.f32 %v2456_v30  ;;  %v2840_v27 = vmul.f32 %v2808_v43, %v2392_v25  ;;  %v3503_v29 = vpop.eup %3502 }
 0x3e8   :  { %v3022_v53 = vsub.f32 0.0, %v2958_v38  ;;  %v2609_v22 = vadd.f32 1.4214138, %v2577_v42  ;;  %3516 = vpow2.f32 %v2887_v9  ;;  %v5853_v56 = vmul.f32 0.70710677, %v5849_v58 }
 0x3e9   :  { %v2707_v15 = vmul.f32 %v5816_v50, %v2675_v47  ;;  %v2548_v18 = vadd.f32 -1.4531521, %v2516_v52  ;;  %v2893_v51 = vmul.f32 1.442695, %v2837_v0  ;;  %v5859_v13 = vadd.f32 %v5752_v61, %v3381_v10 }
 0x3ea   :  { %v3054_v17 = vsel %vm2990_vm3, %v2958_v38, %v3022_v53  ;;  %v2641_v34 = vmul.f32 %v5833_v55, %v2609_v22  ;;  %v5863_v63 = vand.u32 2147483647, %v5853_v56  ;;  %vm2995_vm4 = vcmp.ge.f32.partialorder %v5750_v32, 0.0 }
 0x3eb   :  { %v3118_v11 = vadd.f32 1.0, %v3054_v17  ;;  %v2739_v36 = vadd.f32 0.2548296, %v2707_v15  ;;  %v2580_v41 = vmul.f32 %v5844_v37, %v2548_v18  ;;  %3518 = vpow2.f32 %v2897_v2 }
 0x3ec   :  { %v5865_v23 = vpop.eup %3504  ;;  %v2673_v3 = vadd.f32 -0.28449672, %v2641_v34  ;;  %v2899_v14 = vmul.f32 1.442695, %v2840_v27  ;;  %v5869_v60 = vmul.f32 0.70710677, %v5859_v13  ;;  %3520 = vpow2.f32 %v2893_v51 }
 0x3ed   :  { %v5871_v20 = vpop.eup %3506  ;;  %v3150_v59 = vmul.f32 %v3118_v11, %v5808_v19  ;;  %v2771_v39 = vmul.f32 %v5816_v50, %v2739_v36  ;;  %v2612_v33 = vadd.f32 1.4214138, %v2580_v41  ;;  %v2514_v49 = vmul.f32 1.0614054, %v5865_v23 }
 0x3ee   :  { %v3509_v12 = vpop.eup %3508  ;;  %v2705_v25 = vmul.f32 %v5833_v55, %v2673_v3  ;;  %v2519_v45 = vmul.f32 1.0614054, %v5871_v20  ;;  %v2422_v1 = vmul.f32 0.3275911, %v5863_v63  ;;  %v5881_v19 = vand.u32 2147483647, %v5869_v60 }
 0x3ef   :  { %3182 = vst [vmem:[#allocation18 + $0x88] sm:$0xff] %v3150_v59  ;;  %v2931_v40 = vmul.f32 %v3503_v29, %v2771_v39  ;;  %v2644_v6 = vmul.f32 %v5844_v37, %v2612_v33  ;;  %v2546_v21 = vadd.f32 -1.4531521, %v2514_v49  ;;  %v3511_v50 = vpop.eup %3510  ;;  %3522 = vpow2.f32 %v2899_v14 }
 0x3f0   :  { %v2737_v16 = vadd.f32 0.2548296, %v2705_v25  ;;  %v2551_v35 = vadd.f32 -1.4531521, %v2519_v45  ;;  %v2454_v43 = vadd.f32 1.0, %v2422_v1  ;;  %vm2993_vm5 = vcmp.ge.f32.partialorder %v5768_v48, 0.0 }
 0x3f1   :  { %v2963_v8 = vsub.f32 1.0, %v2931_v40  ;;  %v2676_v9 = vadd.f32 -0.28449672, %v2644_v6  ;;  %v2578_v38 = vmul.f32 %v5865_v23, %v2546_v21  ;;  %v2427_v42 = vmul.f32 0.3275911, %v5881_v19 }
 0x3f2   :  { %v5886_v0 = vpop.eup %3512  ;;  %v2769_v30 = vmul.f32 %v5833_v55, %v2737_v16  ;;  %v2583_v47 = vmul.f32 %v5871_v20, %v2551_v35  ;;  %v5891_v52 = vmul.f32 0.5, %v5793_v24  ;;  %3524 = vrcp.f32 %v2454_v43  ;;  %v2318_v16 = vpop.f32.mrf.mxu1 }
 0x3f3   :  { %v3027_v2 = vsub.f32 0.0, %v2963_v8  ;;  %v2708_v10 = vmul.f32 %v5844_v37, %v2676_v9  ;;  %v2610_v53 = vadd.f32 1.4214138, %v2578_v38  ;;  %v2517_v22 = vmul.f32 1.0614054, %v5886_v0 }
 0x3f4   :  { %v2929_v27 = vmul.f32 %v3509_v12, %v2769_v30  ;;  %v2615_v29 = vadd.f32 1.4214138, %v2583_v47  ;;  %v2806_v15 = vsub.f32 0.0, %v5863_v63  ;;  %v2459_v18 = vadd.f32 1.0, %v2427_v42  ;;  %v5896_v17 = vpop.eup %3514 }
 0x3f5   :  { %v3059_v55 = vsel %vm2995_vm4, %v2963_v8, %v3027_v2  ;;  %v2740_v34 = vadd.f32 0.2548296, %v2708_v10  ;;  %v2642_v24 = vmul.f32 %v5865_v23, %v2610_v53  ;;  %v2549_v51 = vadd.f32 -1.4531521, %v2517_v22  ;;  %v3517_v11 = vpop.eup %3516 }
 0x3f6   :  { %v3123_v36 = vadd.f32 1.0, %v3059_v55  ;;  %v2961_v41 = vsub.f32 1.0, %v2929_v27  ;;  %vm2996_vm6 = vcmp.ge.f32.partialorder %v5783_v7, 0.0  ;;  %v2647_v3 = vmul.f32 %v5871_v20, %v2615_v29 }
 0x3f7   :  { %v2520_v14 = vmul.f32 1.0614054, %v5896_v17  ;;  %v2772_v59 = vmul.f32 %v5844_v37, %v2740_v34  ;;  %v2674_v39 = vadd.f32 -0.28449672, %v2642_v24  ;;  %v2581_v33 = vmul.f32 %v5886_v0, %v2549_v51 }
 0x3f8   :  { %3526 = vrcp.f32 %v2459_v18  ;;  %v3155_v32 = vmul.f32 %v3123_v36, %v5811_v54  ;;  %v3025_v49 = vsub.f32 0.0, %v2961_v41  ;;  %v2679_v12 = vadd.f32 -0.28449672, %v2647_v3  ;;  %v3519_v45 = vpop.eup %3518 }
 0x3f9   :  { %v2552_v25 = vadd.f32 -1.4531521, %v2520_v14  ;;  %v2932_v1 = vmul.f32 %v3511_v50, %v2772_v59  ;;  %v2706_v40 = vmul.f32 %v5865_v23, %v2674_v39  ;;  %v2613_v6 = vadd.f32 1.4214138, %v2581_v33  ;;  %v3521_v8 = vpop.eup %3520 }
 0x3fa   :  { %v2838_v21 = vmul.f32 %v2806_v15, %v5863_v63  ;;  %3187 = vst [vmem:[#allocation18 + $0xb0] sm:$0xff] %v3155_v32  ;;  %v3057_v37 = vsel %vm2993_vm5, %v2961_v41, %v3025_v49  ;;  %v2711_v35 = vmul.f32 %v5871_v20, %v2679_v12  ;;  %v2811_v54 = vsub.f32 0.0, %v5881_v19  ;;  %v3382_v12 = vpop.f32.mrf.mxu1 }
 0x3fb   :  { %v2584_v43 = vmul.f32 %v5896_v17, %v2552_v25  ;;  %v3121_v9 = vadd.f32 1.0, %v3057_v37  ;;  %v2964_v38 = vsub.f32 1.0, %v2932_v1  ;;  %v2738_v50 = vadd.f32 0.2548296, %v2706_v40 }
 0x3fc   :  { %v2645_v42 = vmul.f32 %v5886_v0, %v2613_v6  ;;  %vm2994_vm7 = vcmp.ge.f32.partialorder %v5796_v26, 0.0  ;;  %v2743_v63 = vadd.f32 0.2548296, %v2711_v35  ;;  %v5917_v47 = vadd.f32 %v5752_v61, %v2318_v16  ;;  %v3523_v48 = vpop.eup %3522 }
 0x3fd   :  { %v2616_v30 = vadd.f32 1.4214138, %v2584_v43  ;;  %v3153_v2 = vmul.f32 %v3121_v9, %v5828_v62  ;;  %v3028_v10 = vsub.f32 0.0, %v2964_v38  ;;  %v2770_v53 = vmul.f32 %v5865_v23, %v2738_v50 }
 0x3fe   :  { %v2677_v22 = vadd.f32 -0.28449672, %v2645_v42  ;;  %v2775_v27 = vmul.f32 %v5871_v20, %v2743_v63  ;;  %v2895_v15 = vmul.f32 1.442695, %v2838_v21  ;;  %v5924_v18 = vmul.f32 0.70710677, %v5917_v47  ;;  %v2321_v42 = vpop.f32.mrf.mxu1 }
 0x3ff   :  { %v2648_v29 = vmul.f32 %v5896_v17, %v2616_v30  ;;  %v5926_v55 = vpop.eup %3524  ;;  %3185 = vst [vmem:[#allocation18 + $0xa0] sm:$0xff] %v3153_v2  ;;  %v3060_v34 = vsel %vm2996_vm6, %v2964_v38, %v3028_v10  ;;  %v2930_v24 = vmul.f32 %v3517_v11, %v2770_v53  ;;  %v2843_v23 = vmul.f32 %v2811_v54, %v5881_v19 }
 0x400   :  { %v2709_v62 = vmul.f32 %v5886_v0, %v2677_v22  ;;  %v3124_v51 = vadd.f32 1.0, %v3060_v34  ;;  %v2935_v36 = vmul.f32 %v3519_v45, %v2775_v27  ;;  %v2518_v41 = vmul.f32 1.0614054, %v5926_v55 }
 0x401   :  { %v2680_v20 = vadd.f32 -0.28449672, %v2648_v29  ;;  %v2962_v3 = vsub.f32 1.0, %v2930_v24  ;;  %vm2999_vm8 = vcmp.ge.f32.partialorder %v5799_v5, 0.0  ;;  %v5935_v59 = vand.u32 2147483647, %v5924_v18 }
 0x402   :  { %v2741_v14 = vadd.f32 0.2548296, %v2709_v62  ;;  %v3156_v7 = vmul.f32 %v3124_v51, %v5831_v28  ;;  %v2967_v39 = vsub.f32 1.0, %v2935_v36  ;;  %v2550_v33 = vadd.f32 -1.4531521, %v2518_v41 }
 0x403   :  { %v2712_v11 = vmul.f32 %v5896_v17, %v2680_v20  ;;  %v3026_v32 = vsub.f32 0.0, %v2962_v3  ;;  %3528 = vpow2.f32 %v2895_v15  ;;  %v2425_v49 = vmul.f32 0.3275911, %v5935_v59 }
 0x404   :  { %v2773_v19 = vmul.f32 %v5886_v0, %v2741_v14  ;;  %3188 = vst [vmem:[#allocation18 + $0xb8] sm:$0xff] %v3156_v7  ;;  %v3031_v45 = vsub.f32 0.0, %v2967_v39  ;;  %v2582_v40 = vmul.f32 %v5926_v55, %v2550_v33  ;;  %v2905_v6 = vmul.f32 1.442695, %v2843_v23 }
 0x405   :  { %v5941_v25 = vpop.eup %3526  ;;  %v2744_v1 = vadd.f32 0.2548296, %v2712_v11  ;;  %v3058_v28 = vsel %vm2994_vm7, %v2962_v3, %v3026_v32  ;;  %v2457_v37 = vadd.f32 1.0, %v2425_v49  ;;  %v5955_v10 = vadd.f32 %v5752_v61, %v3382_v12 }
 0x406   :  { %v2933_v21 = vmul.f32 %v3521_v8, %v2773_v19  ;;  %v2523_v16 = vmul.f32 1.0614054, %v5941_v25  ;;  %v3122_v0 = vadd.f32 1.0, %v3058_v28  ;;  %v3063_v35 = vsel %vm2999_vm8, %v2967_v39, %v3031_v45 }
 0x407   :  { %v2776_v43 = vmul.f32 %v5896_v17, %v2744_v1  ;;  %v2614_v54 = vadd.f32 1.4214138, %v2582_v40  ;;  %v3127_v9 = vadd.f32 1.0, %v3063_v35  ;;  %3530 = vrcp.f32 %v2457_v37 }
 0x408   :  { %v2965_v38 = vsub.f32 1.0, %v2933_v21  ;;  %v2555_v50 = vadd.f32 -1.4531521, %v2523_v16  ;;  %v3154_v63 = vmul.f32 %v3122_v0, %v5842_v46  ;;  %3532 = vpow2.f32 %v2905_v6 }
 0x409   :  { %v2936_v26 = vmul.f32 %v3523_v48, %v2776_v43  ;;  %v2646_v8 = vmul.f32 %v5926_v55, %v2614_v54  ;;  %v3159_v30 = vmul.f32 %v3127_v9, %v5891_v52  ;;  %vm2997_vm9 = vcmp.ge.f32.partialorder %v5820_v57, 0.0 }
 0x40a   :  { %v3029_v2 = vsub.f32 0.0, %v2965_v38  ;;  %v2587_v5 = vmul.f32 %v5941_v25, %v2555_v50  ;;  %3186 = vst [vmem:[#allocation18 + $0xa8] sm:$0xff] %v3154_v63  ;;  %v5959_v22 = vadd.f32 %v5752_v61, %v2321_v42  ;;  %v3093_v48 = vmul.f32 0.5, %v5805_v31 }
 0x40b   :  { %v2968_v17 = vsub.f32 1.0, %v2936_v26  ;;  %v2678_v53 = vadd.f32 -0.28449672, %v2646_v8  ;;  %3191 = vst [vmem:[#allocation18 + $0xd0] sm:$0xff] %v3159_v30  ;;  %v5963_v52 = vmul.f32 0.70710677, %v5955_v10 }
 0x40c   :  { %v3061_v46 = vsel %vm2997_vm9, %v2965_v38, %v3029_v2  ;;  %v2619_v27 = vadd.f32 1.4214138, %v2587_v5  ;;  %v2809_v24 = vsub.f32 0.0, %v5935_v59  ;;  %vm3000_vm10 = vcmp.ge.f32.partialorder %v5824_v44, 0.0 }
 0x40d   :  { %v3125_v29 = vadd.f32 1.0, %v3061_v46  ;;  %v3032_v15 = vsub.f32 0.0, %v2968_v17  ;;  %v2710_v34 = vmul.f32 %v5926_v55, %v2678_v53  ;;  %v2396_v61 = vand.u32 2147483647, %v5963_v52 }
 0x40e   :  { %v2651_v57 = vmul.f32 %v5941_v25, %v2619_v27  ;;  %v5971_v62 = vmul.f32 0.70710677, %v5959_v22  ;;  %v3096_v36 = vmul.f32 0.5, %v5814_v4  ;;  %v2841_v44 = vmul.f32 %v2809_v24, %v5935_v59 }
 0x40f   :  { %v3157_v31 = vmul.f32 %v3125_v29, %v3093_v48  ;;  %v3064_v23 = vsel %vm3000_vm10, %v2968_v17, %v3032_v15  ;;  %v2742_v51 = vadd.f32 0.2548296, %v2710_v34  ;;  %v2428_v3 = vmul.f32 0.3275911, %v2396_v61 }
 0x410   :  { %v3128_v20 = vadd.f32 1.0, %v3064_v23  ;;  %v2683_v41 = vadd.f32 -0.28449672, %v2651_v57  ;;  %v3529_v14 = vpop.eup %3528  ;;  %v2394_v39 = vand.u32 2147483647, %v5971_v62  ;;  %vm2998_vm11 = vcmp.ge.f32.partialorder %v5853_v56, 0.0 }
 0x411   :  { %3189 = vst [vmem:[#allocation18 + $0xc0] sm:$0xff] %v3157_v31  ;;  %v2774_v7 = vmul.f32 %v5926_v55, %v2742_v51  ;;  %v2460_v32 = vadd.f32 1.0, %v2428_v3  ;;  %v2901_v1 = vmul.f32 1.442695, %v2841_v44  ;;  %v3094_v0 = vmul.f32 0.5, %v5849_v58 }
 0x412   :  { %v3160_v11 = vmul.f32 %v3128_v20, %v3096_v36  ;;  %v2715_v33 = vmul.f32 %v5941_v25, %v2683_v41  ;;  %v2426_v49 = vmul.f32 0.3275911, %v2394_v39  ;;  %v2812_v9 = vsub.f32 0.0, %v2396_v61 }
 0x413   :  { %v2934_v19 = vmul.f32 %v3529_v14, %v2774_v7  ;;  %3534 = vrcp.f32 %v2460_v32  ;;  %vm3003_vm12 = vcmp.ge.f32.partialorder %v5869_v60, 0.0  ;;  %v3099_v8 = vmul.f32 0.5, %v5859_v13 }
 0x414   :  { %3192 = vst [vmem:[#allocation18 + $0xd8] sm:$0xff] %v3160_v11  ;;  %v2747_v12 = vadd.f32 0.2548296, %v2715_v33  ;;  %v3531_v4 = vpop.eup %3530  ;;  %v2458_v40 = vadd.f32 1.0, %v2426_v49  ;;  %v2844_v56 = vmul.f32 %v2812_v9, %v2396_v61  ;;  %vm3001_vm13 = vcmp.ge.f32.partialorder %v5924_v18, 0.0 }
 0x415   :  { %v2966_v45 = vsub.f32 1.0, %v2934_v19  ;;  %v3533_v6 = vpop.eup %3532  ;;  %v2521_v28 = vmul.f32 1.0614054, %v3531_v4  ;;  %v3097_v11 = vmul.f32 0.5, %v5917_v47  ;;  %vm3004_vm14 = vcmp.ge.f32.partialorder %v5963_v52, 0.0 }
 0x416   :  { %v2779_v55 = vmul.f32 %v5941_v25, %v2747_v12  ;;  %3536 = vrcp.f32 %v2458_v40  ;;  %v2810_v25 = vsub.f32 0.0, %v2394_v39  ;;  %v2907_v48 = vmul.f32 1.442695, %v2844_v56 }
 0x417   :  { %v3030_v59 = vsub.f32 0.0, %v2966_v45  ;;  %v2553_v16 = vadd.f32 -1.4531521, %v2521_v28  ;;  %3538 = vpow2.f32 %v2901_v1  ;;  %v3100_v47 = vmul.f32 0.5, %v5955_v10 }
 0x418   :  { %v2939_v21 = vmul.f32 %v3533_v6, %v2779_v55  ;;  %v2842_v17 = vmul.f32 %v2810_v25, %v2394_v39  ;;  %3540 = vpow2.f32 %v2907_v48  ;;  %vm3002_vm15 = vcmp.ge.f32.partialorder %v5971_v62, 0.0 }
 0x419   :  { %v3062_v37 = vsel %vm2998_vm11, %v2966_v45, %v3030_v59  ;;  %v2585_v54 = vmul.f32 %v3531_v4, %v2553_v16 }
 0x41a   :  { %v3126_v35 = vadd.f32 1.0, %v3062_v37  ;;  %v2971_v43 = vsub.f32 1.0, %v2939_v21  ;;  %v2903_v34 = vmul.f32 1.442695, %v2842_v17 }
 0x41b   :  { %v2617_v42 = vadd.f32 1.4214138, %v2585_v54  ;;  %v3098_v54 = vmul.f32 0.5, %v5959_v22 }
 0x41c   :  { %v3158_v38 = vmul.f32 %v3126_v35, %v3094_v0  ;;  %v3035_v50 = vsub.f32 0.0, %v2971_v43  ;;  %3542 = vpow2.f32 %v2903_v34 }
 0x41d   :  { %v2649_v26 = vmul.f32 %v3531_v4, %v2617_v42 }
 0x41e   :  { %3190 = vst [vmem:[#allocation18 + $0xc8] sm:$0xff] %v3158_v38  ;;  %v3067_v63 = vsel %vm3003_vm12, %v2971_v43, %v3035_v50 }
 0x41f   :  { %v3131_v30 = vadd.f32 1.0, %v3067_v63  ;;  %v2681_v2 = vadd.f32 -0.28449672, %v2649_v26 }
 0x420   :  { %v3535_v58 = vpop.eup %3534 }
 0x421   :  { %v3163_v5 = vmul.f32 %v3131_v30, %v3099_v8  ;;  %v2713_v53 = vmul.f32 %v3531_v4, %v2681_v2  ;;  %v2524_v46 = vmul.f32 1.0614054, %v3535_v58 }
 0x423   :  { %3195 = vst [vmem:[#allocation18 + $0xf0] sm:$0xff] %v3163_v5  ;;  %v3537_v27 = vpop.eup %3536  ;;  %v2745_v29 = vadd.f32 0.2548296, %v2713_v53  ;;  %v2556_v15 = vadd.f32 -1.4531521, %v2524_v46 }
 0x424   :  { %v2522_v60 = vmul.f32 1.0614054, %v3537_v27  ;;  %v3539_v24 = vpop.eup %3538 }
 0x425   :  { %v2777_v57 = vmul.f32 %v3531_v4, %v2745_v29  ;;  %v2588_v31 = vmul.f32 %v3535_v58, %v2556_v15  ;;  %v3541_v45 = vpop.eup %3540 }
 0x426   :  { %v2554_v61 = vadd.f32 -1.4531521, %v2522_v60 }
 0x427   :  { %v2937_v13 = vmul.f32 %v3539_v24, %v2777_v57  ;;  %v2620_v23 = vadd.f32 1.4214138, %v2588_v31 }
 0x428   :  { %v2586_v51 = vmul.f32 %v3537_v27, %v2554_v61 }
 0x429   :  { %v2969_v36 = vsub.f32 1.0, %v2937_v13  ;;  %v2652_v20 = vmul.f32 %v3535_v58, %v2620_v23  ;;  %v3543_v55 = vpop.eup %3542 }
 0x42a   :  { %v2618_v41 = vadd.f32 1.4214138, %v2586_v51 }
 0x42b   :  { %v3033_v3 = vsub.f32 0.0, %v2969_v36  ;;  %v2684_v14 = vadd.f32 -0.28449672, %v2652_v20 }
 0x42c   :  { %v2650_v7 = vmul.f32 %v3537_v27, %v2618_v41 }
 0x42d   :  { %v3065_v44 = vsel %vm3001_vm13, %v2969_v36, %v3033_v3  ;;  %v2716_v39 = vmul.f32 %v3535_v58, %v2684_v14 }
 0x42e   :  { %v3129_v33 = vadd.f32 1.0, %v3065_v44  ;;  %v2682_v32 = vadd.f32 -0.28449672, %v2650_v7 }
 0x42f   :  { %v2748_v19 = vadd.f32 0.2548296, %v2716_v39 }
 0x430   :  { %v3161_v49 = vmul.f32 %v3129_v33, %v3097_v11  ;;  %v2714_v12 = vmul.f32 %v3537_v27, %v2682_v32 }
 0x431   :  { %v2780_v4 = vmul.f32 %v3535_v58, %v2748_v19 }
 0x432   :  { %3193 = vst [vmem:[#allocation18 + $0xe0] sm:$0xff] %v3161_v49  ;;  %v2746_v1 = vadd.f32 0.2548296, %v2714_v12 }
 0x433   :  { %v2940_v40 = vmul.f32 %v3541_v45, %v2780_v4 }
 0x434   :  { %v2778_v6 = vmul.f32 %v3537_v27, %v2746_v1 }
 0x435   :  { %v2972_v28 = vsub.f32 1.0, %v2940_v40 }
 0x436   :  { %v2938_v59 = vmul.f32 %v3543_v55, %v2778_v6 }
 0x437   :  { %v3036_v18 = vsub.f32 0.0, %v2972_v28 }
 0x438   :  { %v2970_v21 = vsub.f32 1.0, %v2938_v59 }
 0x439   :  { %v3068_v16 = vsel %vm3004_vm14, %v2972_v28, %v3036_v18 }
 0x43a   :  { %v3132_v37 = vadd.f32 1.0, %v3068_v16  ;;  %v3034_v0 = vsub.f32 0.0, %v2970_v21 }
 0x43c   :  { %v3164_v35 = vmul.f32 %v3132_v37, %v3100_v47  ;;  %v3066_v43 = vsel %vm3002_vm15, %v2970_v21, %v3034_v0 }
 0x43d   :  { %v3130_v9 = vadd.f32 1.0, %v3066_v43 }
 0x43e   :  { %3196 = vst [vmem:[#allocation18 + $0xf8] sm:$0xff] %v3164_v35 }
 0x43f   :  { %v3162_v38 = vmul.f32 %v3130_v9, %v3098_v54 }
 0x441   :  { %3194 = vst [vmem:[#allocation18 + $0xe8] sm:$0xff] %v3162_v38 }
 0x442   :  { %3755 = shalt.err (!%p3752_p7)
}
 0x443   :  { %3208 = dma.vmem_to_hbm [thread:$0]  %s3203_s28, 4096, %s6006_s11, [#allocation5], %s3783_s7, %s3783_s7, %s3784_s20  }
 0x444   :  { %3774 = dma.done.wait [#allocation5], 4096  }
 0x445   :  { %3775 = vsyncadd [#allocation5], 4294963200 }
 0x446   :  { %3212 = vsyncpa [#allocation4], 1 }
 0x447   :  { %3213 = vsyncpa [#allocation7], 1 }
 0x448   :  { %3214 = vsyncpa [#allocation10], 1 }
 0x449   :  { %3215 = vsyncpa [#allocation13], 1 }
 0x44a   :  { %3216 = vsyncpa [#allocation16], 1 }
 0x44b   :  { %3217 = vsyncpa [#allocation5], 1 }

</bundles_post_ra>
